<compile_context>
chip_gen: v7x
topology: tpu7x:2x2x1
jax: 0.10.0
libtpu: 0.0.40
codegen_flags: <defaults>
</compile_context>

<pallas_src>
import jax
import jax.numpy as jnp
from jax.experimental import pallas as pl
from jax.experimental.pallas import tpu as pltpu

LATENT_DIM = 2
N_CLASSES = 10
EMB_DIM = 100
IMG_HW = 28
HID_DIM = 256
C1_OUT = 32
C2_OUT = 64
FC_IN = C2_OUT * 7 * 7          # 3136
HEAD_PAD = 128                  # packed/padded head output width (lane-dense)

_COMPILER_PARAMS = pltpu.CompilerParams(
    dimension_semantics=("parallel",),
    vmem_limit_bytes=32 * 1024 * 1024,
)


# ----------------------------- Pallas kernels --------------------------------

def _gemm_bias_relu_kernel(x_ref, w_ref, b_ref, o_ref):
    """o = relu(x @ w + b); bf16 in/out, f32 accumulation."""
    acc = jnp.dot(x_ref[...], w_ref[...], preferred_element_type=jnp.float32)
    acc = acc + b_ref[...]
    o_ref[...] = jnp.maximum(acc, 0.0).astype(o_ref.dtype)


def _fc_heads_kernel(x_ref, w3_ref, b3_ref, wh_ref, bh_ref, o_ref):
    """h = relu(x @ w3 + b3); o = h @ wh + bh (mean | log_var packed in lanes)."""
    h = jnp.dot(x_ref[...], w3_ref[...], preferred_element_type=jnp.float32)
    h = jnp.maximum(h + b3_ref[...], 0.0)
    out = jnp.dot(h.astype(jnp.bfloat16), wh_ref[...],
                  preferred_element_type=jnp.float32) + bh_ref[...]
    o_ref[...] = out


def _gemm_bias_relu(x, w, b, *, rows_per_step):
    M, K = x.shape
    N = w.shape[1]
    tm = M if M <= rows_per_step else rows_per_step
    return pl.pallas_call(
        _gemm_bias_relu_kernel,
        out_shape=jax.ShapeDtypeStruct((M, N), jnp.bfloat16),
        grid=(pl.cdiv(M, tm),),
        in_specs=[pl.BlockSpec((tm, K), lambda i: (i, 0)),     # streamed rows
                  pl.BlockSpec((K, N), lambda i: (0, 0)),      # resident weight
                  pl.BlockSpec((1, N), lambda i: (0, 0))],     # resident bias (f32)
        out_specs=pl.BlockSpec((tm, N), lambda i: (i, 0)),
        compiler_params=_COMPILER_PARAMS,
    )(x, w, b)


def _fc_heads(x, w3, b3, wh, bh, *, rows_per_step):
    M, K = x.shape
    H = w3.shape[1]
    N = wh.shape[1]
    tm = M if M <= rows_per_step else rows_per_step
    return pl.pallas_call(
        _fc_heads_kernel,
        out_shape=jax.ShapeDtypeStruct((M, N), jnp.float32),
        grid=(pl.cdiv(M, tm),),
        in_specs=[pl.BlockSpec((tm, K), lambda i: (i, 0)),
                  pl.BlockSpec((K, H), lambda i: (0, 0)),
                  pl.BlockSpec((1, H), lambda i: (0, 0)),
                  pl.BlockSpec((H, N), lambda i: (0, 0)),
                  pl.BlockSpec((1, N), lambda i: (0, 0))],
        out_specs=pl.BlockSpec((tm, N), lambda i: (i, 0)),
        compiler_params=_COMPILER_PARAMS,
    )(x, w3, b3, wh, bh)


# ------------------------------- wrapper --------------------------------------

def _im2col_3x3_s2_p1(x_nhwc, out_hw):
    """3x3 / stride-2 / pad-1 patches. Returns (B*out_hw^2, C*9) with
    k index = c*9 + kh*3 + kw (matches a (Cout, Cin, 3, 3) weight reshape)."""
    B = x_nhwc.shape[0]
    C = x_nhwc.shape[-1]
    xp = jnp.pad(x_nhwc, ((0, 0), (1, 1), (1, 1), (0, 0)))
    slabs = [xp[:, kh:kh + 2 * out_hw - 1:2, kw:kw + 2 * out_hw - 1:2, :]
             for kh in range(3) for kw in range(3)]
    p = jnp.stack(slabs, axis=-1)                       # (B, oh, ow, C, 9)
    return p.reshape(B * out_hw * out_hw, C * 9)


@jax.jit
def cnn_encoder_forward(x, y, params):
    """x: (B,1,28,28) float (NCHW), y: (B,) int32 labels -> (mean, log_var)."""
    B = x.shape[0]
    f32, bf16 = jnp.float32, jnp.bfloat16

    # Label branch: Embedding -> Linear, folded into one (10, 784) table lookup.
    label_table = params["emb"] @ params["lab_w"].T + params["lab_b"]    # (10, 784)
    y_img = label_table[y].reshape(B, 1, IMG_HW, IMG_HW)                 # (B,1,28,28)
    x_cat = jnp.concatenate([x.astype(f32), y_img], axis=1)              # (B,2,28,28)

    # Conv1 as GEMM: (B*196, 18) @ (18, 32), fused bias + ReLU.
    p1 = _im2col_3x3_s2_p1(jnp.transpose(x_cat, (0, 2, 3, 1)), 14).astype(bf16)
    w1 = params["conv1_w"].reshape(C1_OUT, 2 * 9).T.astype(bf16)         # (18, 32)
    b1 = params["conv1_b"].reshape(1, C1_OUT).astype(f32)
    h1 = _gemm_bias_relu(p1, w1, b1, rows_per_step=2048)                 # (B*196, 32) bf16

    # Conv2 as GEMM: (B*49, 288) @ (288, 64), fused bias + ReLU.
    p2 = _im2col_3x3_s2_p1(h1.reshape(B, 14, 14, C1_OUT), 7)             # (B*49, 288) bf16
    w2 = params["conv2_w"].reshape(C2_OUT, C1_OUT * 9).T.astype(bf16)    # (288, 64)
    b2 = params["conv2_b"].reshape(1, C2_OUT).astype(f32)
    h2 = _gemm_bias_relu(p2, w2, b2, rows_per_step=2048)                 # (B*49, 64) bf16

    # FC (3136 -> 256, ReLU) + both latent heads fused into one kernel.
    h2_flat = h2.reshape(B, FC_IN)                  # row-major index = q*64 + c
    # PyTorch flattens NCHW (index = c*49 + q): permute the FC weight to match.
    w3 = (params["fc_w"].reshape(HID_DIM, C2_OUT, 49)
          .transpose(2, 1, 0).reshape(FC_IN, HID_DIM).astype(bf16))      # (3136, 256)
    b3 = params["fc_b"].reshape(1, HID_DIM).astype(f32)
    wh = jnp.concatenate([params["mean_w"].T, params["logvar_w"].T], axis=1)  # (256, 4)
    wh = jnp.pad(wh, ((0, 0), (0, HEAD_PAD - 2 * LATENT_DIM))).astype(bf16)   # (256, 128)
    bh = jnp.pad(jnp.concatenate([params["mean_b"], params["logvar_b"]]),
                 (0, HEAD_PAD - 2 * LATENT_DIM)).reshape(1, HEAD_PAD).astype(f32)
    out = _fc_heads(h2_flat, w3, b3, wh, bh, rows_per_step=512)          # (B, 128) f32

    return out[:, 0:LATENT_DIM], out[:, LATENT_DIM:2 * LATENT_DIM]


# --------------------------- params & reference --------------------------------

def init_params(key):
    ks = jax.random.split(key, 13)

    def unif(k, shape, fan_in):
        s = 1.0 / jnp.sqrt(fan_in)
        return jax.random.uniform(k, shape, jnp.float32, -s, s)

    return {
        "emb": jax.random.normal(ks[0], (N_CLASSES, EMB_DIM), jnp.float32),
        "lab_w": unif(ks[1], (IMG_HW * IMG_HW, EMB_DIM), EMB_DIM),
        "lab_b": unif(ks[2], (IMG_HW * IMG_HW,), EMB_DIM),
        "conv1_w": unif(ks[3], (C1_OUT, 2, 3, 3), 2 * 9),
        "conv1_b": unif(ks[4], (C1_OUT,), 2 * 9),
        "conv2_w": unif(ks[5], (C2_OUT, C1_OUT, 3, 3), C1_OUT * 9),
        "conv2_b": unif(ks[6], (C2_OUT,), C1_OUT * 9),
        "fc_w": unif(ks[7], (HID_DIM, FC_IN), FC_IN),
        "fc_b": unif(ks[8], (HID_DIM,), FC_IN),
        "mean_w": unif(ks[9], (LATENT_DIM, HID_DIM), HID_DIM),
        "mean_b": unif(ks[10], (LATENT_DIM,), HID_DIM),
        "logvar_w": unif(ks[11], (LATENT_DIM, HID_DIM), HID_DIM),
        "logvar_b": unif(ks[12], (LATENT_DIM,), HID_DIM),
    }


def _reference_forward(x, y, params):
    """Pure-JAX f32 reference mirroring the PyTorch CnnEncoder exactly."""
    B = x.shape[0]
    emb = params["emb"][y]                                               # (B, 100)
    y_img = (emb @ params["lab_w"].T + params["lab_b"]).reshape(B, 1, IMG_HW, IMG_HW)
    h = jnp.concatenate([x, y_img], axis=1)                              # (B,2,28,28)
    for w, b in ((params["conv1_w"], params["conv1_b"]),
                 (params["conv2_w"], params["conv2_b"])):
        h = jax.lax.conv_general_dilated(
            h, w, window_strides=(2, 2), padding=((1, 1), (1, 1)),
            dimension_numbers=("NCHW", "OIHW", "NCHW"))
        h = jnp.maximum(h + b[None, :, None, None], 0.0)
    h = h.reshape(B, -1)                                                 # NCHW flatten
    h = jnp.maximum(h @ params["fc_w"].T + params["fc_b"], 0.0)
    mean = h @ params["mean_w"].T + params["mean_b"]
    log_var = h @ params["logvar_w"].T + params["logvar_b"]
    return mean, log_var


if __name__ == "__main__":
    key = jax.random.PRNGKey(0)
    k_params, k_x, k_y = jax.random.split(key, 3)
    params = init_params(k_params)

    B = 8
    x = jax.random.uniform(k_x, (B, 1, IMG_HW, IMG_HW), jnp.float32)   # NCHW like torch
    y = jax.random.randint(k_y, (B,), 0, N_CLASSES, jnp.int32)

    mean, log_var = cnn_encoder_forward(x, y, params)
    jax.block_until_ready((mean, log_var))

    mean_ref, log_var_ref = _reference_forward(x, y, params)
    assert mean.shape == (B, LATENT_DIM) and log_var.shape == (B, LATENT_DIM)
    # bf16 activations/weights with f32 accumulation -> relaxed tolerance vs f32 ref.
    assert jnp.allclose(mean, mean_ref, atol=5e-2, rtol=5e-2)
    assert jnp.allclose(log_var, log_var_ref, atol=5e-2, rtol=5e-2)
    print("KERNEL_OK")
</pallas_src>

<mosaic_0001>
module attributes {stable_mosaic.version = 11 : i64} {
  func.func @_gemm_bias_relu_kernel(%arg0: i32, %arg1: memref<1568x18xbf16, #tpu.memory_space<vmem>>, %arg2: memref<18x32xbf16, #tpu.memory_space<vmem>>, %arg3: memref<1x32xf32, #tpu.memory_space<vmem>>, %arg4: memref<1568x32xbf16, #tpu.memory_space<vmem>>) attributes {dimension_semantics = [#tpu.dimension_semantics<parallel>], iteration_bounds = array<i64: 1>, scalar_prefetch = 0 : i64, scratch_operands = 0 : i64, tpu.core_type = #tpu.core_type<tc>, window_params = [{transform_indices = @transform_0, window_bounds = array<i64: 1568, 18>}, {pipeline_mode = #tpu.pipeline_mode<synchronous>, transform_indices = @transform_1, window_bounds = array<i64: 18, 32>}, {pipeline_mode = #tpu.pipeline_mode<synchronous>, transform_indices = @transform_2, window_bounds = array<i64: 1, 32>}, {transform_indices = @transform_3, window_bounds = array<i64: 1568, 32>}]} {
    %c0 = arith.constant 0 : index
    %c0_0 = arith.constant 0 : index
    %0 = vector.load %arg1[%c0, %c0_0] : memref<1568x18xbf16, #tpu.memory_space<vmem>>, vector<1568x18xbf16>
    %c0_1 = arith.constant 0 : index
    %c0_2 = arith.constant 0 : index
    %1 = vector.load %arg2[%c0_1, %c0_2] : memref<18x32xbf16, #tpu.memory_space<vmem>>, vector<18x32xbf16>
    %cst = arith.constant dense<0.000000e+00> : vector<1568x32xf32>
    %2 = tpu.matmul %0, %1, %cst {dimension_numbers = #tpu.dot_dimension_numbers<[1], [0], [0], [1], [0, 0, 1, 1], [], []>} : vector<1568x18xbf16>, vector<18x32xbf16>, vector<1568x32xf32> -> vector<1568x32xf32>
    %c0_3 = arith.constant 0 : index
    %c0_4 = arith.constant 0 : index
    %3 = vector.load %arg3[%c0_3, %c0_4] : memref<1x32xf32, #tpu.memory_space<vmem>>, vector<1x32xf32>
    %4 = vector.broadcast %3 : vector<1x32xf32> to vector<1568x32xf32>
    %5 = arith.addf %2, %4 : vector<1568x32xf32>
    %cst_5 = arith.constant 0.000000e+00 : f32
    %6 = vector.broadcast %cst_5 : f32 to vector<1568x32xf32>
    %7 = arith.maximumf %5, %6 : vector<1568x32xf32>
    %8 = arith.truncf %7 : vector<1568x32xf32> to vector<1568x32xbf16>
    %c0_6 = arith.constant 0 : index
    %c0_7 = arith.constant 0 : index
    %9 = vector.load %arg4[%c0_6, %c0_7] : memref<1568x32xbf16, #tpu.memory_space<vmem>>, vector<1568x32xbf16>
    tpu.vector_store %arg4[%c0_6, %c0_7], %8 {strides = array<i32>} : memref<1568x32xbf16, #tpu.memory_space<vmem>>, vector<1568x32xbf16>,
    return
  }
  func.func @transform_0(%arg0: i32) -> (i32, i32) {
    %c0_i32 = arith.constant 0 : i32
    %c0_i32_0 = arith.constant 0 : i32
    return %arg0, %c0_i32 : i32, i32
  }
  func.func @transform_1(%arg0: i32) -> (i32, i32) {
    %c0_i32 = arith.constant 0 : i32
    %c0_i32_0 = arith.constant 0 : i32
    %c0_i32_1 = arith.constant 0 : i32
    return %c0_i32, %c0_i32_0 : i32, i32
  }
  func.func @transform_2(%arg0: i32) -> (i32, i32) {
    %c0_i32 = arith.constant 0 : i32
    %c0_i32_0 = arith.constant 0 : i32
    %c0_i32_1 = arith.constant 0 : i32
    return %c0_i32, %c0_i32_0 : i32, i32
  }
  func.func @transform_3(%arg0: i32) -> (i32, i32) {
    %c0_i32 = arith.constant 0 : i32
    %c0_i32_0 = arith.constant 0 : i32
    return %arg0, %c0_i32 : i32, i32
  }
}

module attributes {stable_mosaic.version = 11 : i64} {
  func.func @_gemm_bias_relu_kernel(%arg0: i32, %arg1: memref<392x288xbf16, #tpu.memory_space<vmem>>, %arg2: memref<288x64xbf16, #tpu.memory_space<vmem>>, %arg3: memref<1x64xf32, #tpu.memory_space<vmem>>, %arg4: memref<392x64xbf16, #tpu.memory_space<vmem>>) attributes {dimension_semantics = [#tpu.dimension_semantics<parallel>], iteration_bounds = array<i64: 1>, scalar_prefetch = 0 : i64, scratch_operands = 0 : i64, tpu.core_type = #tpu.core_type<tc>, window_params = [{transform_indices = @transform_0, window_bounds = array<i64: 392, 288>}, {pipeline_mode = #tpu.pipeline_mode<synchronous>, transform_indices = @transform_1, window_bounds = array<i64: 288, 64>}, {pipeline_mode = #tpu.pipeline_mode<synchronous>, transform_indices = @transform_2, window_bounds = array<i64: 1, 64>}, {transform_indices = @transform_3, window_bounds = array<i64: 392, 64>}]} {
    %c0 = arith.constant 0 : index
    %c0_0 = arith.constant 0 : index
    %0 = vector.load %arg1[%c0, %c0_0] : memref<392x288xbf16, #tpu.memory_space<vmem>>, vector<392x288xbf16>
    %c0_1 = arith.constant 0 : index
    %c0_2 = arith.constant 0 : index
    %1 = vector.load %arg2[%c0_1, %c0_2] : memref<288x64xbf16, #tpu.memory_space<vmem>>, vector<288x64xbf16>
    %cst = arith.constant dense<0.000000e+00> : vector<392x64xf32>
    %2 = tpu.matmul %0, %1, %cst {dimension_numbers = #tpu.dot_dimension_numbers<[1], [0], [0], [1], [0, 0, 1, 1], [], []>} : vector<392x288xbf16>, vector<288x64xbf16>, vector<392x64xf32> -> vector<392x64xf32>
    %c0_3 = arith.constant 0 : index
    %c0_4 = arith.constant 0 : index
    %3 = vector.load %arg3[%c0_3, %c0_4] : memref<1x64xf32, #tpu.memory_space<vmem>>, vector<1x64xf32>
    %4 = vector.broadcast %3 : vector<1x64xf32> to vector<392x64xf32>
    %5 = arith.addf %2, %4 : vector<392x64xf32>
    %cst_5 = arith.constant 0.000000e+00 : f32
    %6 = vector.broadcast %cst_5 : f32 to vector<392x64xf32>
    %7 = arith.maximumf %5, %6 : vector<392x64xf32>
    %8 = arith.truncf %7 : vector<392x64xf32> to vector<392x64xbf16>
    %c0_6 = arith.constant 0 : index
    %c0_7 = arith.constant 0 : index
    %9 = vector.load %arg4[%c0_6, %c0_7] : memref<392x64xbf16, #tpu.memory_space<vmem>>, vector<392x64xbf16>
    tpu.vector_store %arg4[%c0_6, %c0_7], %8 {strides = array<i32>} : memref<392x64xbf16, #tpu.memory_space<vmem>>, vector<392x64xbf16>,
    return
  }
  func.func @transform_0(%arg0: i32) -> (i32, i32) {
    %c0_i32 = arith.constant 0 : i32
    %c0_i32_0 = arith.constant 0 : i32
    return %arg0, %c0_i32 : i32, i32
  }
  func.func @transform_1(%arg0: i32) -> (i32, i32) {
    %c0_i32 = arith.constant 0 : i32
    %c0_i32_0 = arith.constant 0 : i32
    %c0_i32_1 = arith.constant 0 : i32
    return %c0_i32, %c0_i32_0 : i32, i32
  }
  func.func @transform_2(%arg0: i32) -> (i32, i32) {
    %c0_i32 = arith.constant 0 : i32
    %c0_i32_0 = arith.constant 0 : i32
    %c0_i32_1 = arith.constant 0 : i32
    return %c0_i32, %c0_i32_0 : i32, i32
  }
  func.func @transform_3(%arg0: i32) -> (i32, i32) {
    %c0_i32 = arith.constant 0 : i32
    %c0_i32_0 = arith.constant 0 : i32
    return %arg0, %c0_i32 : i32, i32
  }
}

module attributes {stable_mosaic.version = 11 : i64} {
  func.func @_fc_heads_kernel(%arg0: i32, %arg1: memref<8x3136xbf16, #tpu.memory_space<vmem>>, %arg2: memref<3136x256xbf16, #tpu.memory_space<vmem>>, %arg3: memref<1x256xf32, #tpu.memory_space<vmem>>, %arg4: memref<256x128xbf16, #tpu.memory_space<vmem>>, %arg5: memref<1x128xf32, #tpu.memory_space<vmem>>, %arg6: memref<8x128xf32, #tpu.memory_space<vmem>>) attributes {dimension_semantics = [#tpu.dimension_semantics<parallel>], iteration_bounds = array<i64: 1>, scalar_prefetch = 0 : i64, scratch_operands = 0 : i64, tpu.core_type = #tpu.core_type<tc>, window_params = [{transform_indices = @transform_0, window_bounds = array<i64: 8, 3136>}, {pipeline_mode = #tpu.pipeline_mode<synchronous>, transform_indices = @transform_1, window_bounds = array<i64: 3136, 256>}, {pipeline_mode = #tpu.pipeline_mode<synchronous>, transform_indices = @transform_2, window_bounds = array<i64: 1, 256>}, {pipeline_mode = #tpu.pipeline_mode<synchronous>, transform_indices = @transform_3, window_bounds = array<i64: 256, 128>}, {pipeline_mode = #tpu.pipeline_mode<synchronous>, transform_indices = @transform_4, window_bounds = array<i64: 1, 128>}, {transform_indices = @transform_5, window_bounds = array<i64: 8, 128>}]} {
    %c0 = arith.constant 0 : index
    %c0_0 = arith.constant 0 : index
    %0 = vector.load %arg1[%c0, %c0_0] : memref<8x3136xbf16, #tpu.memory_space<vmem>>, vector<8x3136xbf16>
    %c0_1 = arith.constant 0 : index
    %c0_2 = arith.constant 0 : index
    %1 = vector.load %arg2[%c0_1, %c0_2] : memref<3136x256xbf16, #tpu.memory_space<vmem>>, vector<3136x256xbf16>
    %cst = arith.constant dense<0.000000e+00> : vector<8x256xf32>
    %2 = tpu.matmul %0, %1, %cst {dimension_numbers = #tpu.dot_dimension_numbers<[1], [0], [0], [1], [0, 0, 1, 1], [], []>} : vector<8x3136xbf16>, vector<3136x256xbf16>, vector<8x256xf32> -> vector<8x256xf32>
    %c0_3 = arith.constant 0 : index
    %c0_4 = arith.constant 0 : index
    %3 = vector.load %arg3[%c0_3, %c0_4] : memref<1x256xf32, #tpu.memory_space<vmem>>, vector<1x256xf32>
    %4 = vector.broadcast %3 : vector<1x256xf32> to vector<8x256xf32>
    %5 = arith.addf %2, %4 : vector<8x256xf32>
    %cst_5 = arith.constant 0.000000e+00 : f32
    %6 = vector.broadcast %cst_5 : f32 to vector<8x256xf32>
    %7 = arith.maximumf %5, %6 : vector<8x256xf32>
    %8 = arith.truncf %7 : vector<8x256xf32> to vector<8x256xbf16>
    %c0_6 = arith.constant 0 : index
    %c0_7 = arith.constant 0 : index
    %9 = vector.load %arg4[%c0_6, %c0_7] : memref<256x128xbf16, #tpu.memory_space<vmem>>, vector<256x128xbf16>
    %cst_8 = arith.constant dense<0.000000e+00> : vector<8x128xf32>
    %10 = tpu.matmul %8, %9, %cst_8 {dimension_numbers = #tpu.dot_dimension_numbers<[1], [0], [0], [1], [0, 0, 1, 1], [], []>} : vector<8x256xbf16>, vector<256x128xbf16>, vector<8x128xf32> -> vector<8x128xf32>
    %c0_9 = arith.constant 0 : index
    %c0_10 = arith.constant 0 : index
    %11 = vector.load %arg5[%c0_9, %c0_10] : memref<1x128xf32, #tpu.memory_space<vmem>>, vector<1x128xf32>
    %12 = vector.broadcast %11 : vector<1x128xf32> to vector<8x128xf32>
    %13 = arith.addf %10, %12 : vector<8x128xf32>
    %c0_11 = arith.constant 0 : index
    %c0_12 = arith.constant 0 : index
    %14 = vector.load %arg6[%c0_11, %c0_12] : memref<8x128xf32, #tpu.memory_space<vmem>>, vector<8x128xf32>
    tpu.vector_store %arg6[%c0_11, %c0_12], %13 {strides = array<i32>} : memref<8x128xf32, #tpu.memory_space<vmem>>, vector<8x128xf32>,
    return
  }
  func.func @transform_0(%arg0: i32) -> (i32, i32) {
    %c0_i32 = arith.constant 0 : i32
    %c0_i32_0 = arith.constant 0 : i32
    return %arg0, %c0_i32 : i32, i32
  }
  func.func @transform_1(%arg0: i32) -> (i32, i32) {
    %c0_i32 = arith.constant 0 : i32
    %c0_i32_0 = arith.constant 0 : i32
    %c0_i32_1 = arith.constant 0 : i32
    return %c0_i32, %c0_i32_0 : i32, i32
  }
  func.func @transform_2(%arg0: i32) -> (i32, i32) {
    %c0_i32 = arith.constant 0 : i32
    %c0_i32_0 = arith.constant 0 : i32
    %c0_i32_1 = arith.constant 0 : i32
    return %c0_i32, %c0_i32_0 : i32, i32
  }
  func.func @transform_3(%arg0: i32) -> (i32, i32) {
    %c0_i32 = arith.constant 0 : i32
    %c0_i32_0 = arith.constant 0 : i32
    %c0_i32_1 = arith.constant 0 : i32
    return %c0_i32, %c0_i32_0 : i32, i32
  }
  func.func @transform_4(%arg0: i32) -> (i32, i32) {
    %c0_i32 = arith.constant 0 : i32
    %c0_i32_0 = arith.constant 0 : i32
    %c0_i32_1 = arith.constant 0 : i32
    return %c0_i32, %c0_i32_0 : i32, i32
  }
  func.func @transform_5(%arg0: i32) -> (i32, i32) {
    %c0_i32 = arith.constant 0 : i32
    %c0_i32_0 = arith.constant 0 : i32
    return %arg0, %c0_i32 : i32, i32
  }
}

</mosaic_0001>

<bundles_post_ra>
// kernel: cnn_encoder_forward.3
= control target key start
LH: loop header
LB: loop body
LE: loop exit
PB: predicated region body
PF: predicated region fallthrough
CT: control target
= control target key end

     0   :  { %vm1015_vm0 = vcmask 1040384   ;;  %vm720_vm1 = vcmask 146432   ;;  %vm2816_vm2 = vcmask 257024   ;;  %s5423_s1 = inlined_call_operand.vmem [shape: bf16[18,32], index: 1, kind: input, shape index: {}]   ;;  %s5424_s0 = inlined_call_operand.vmem [shape: bf16[1568,18], index: 0, kind: input, shape index: {}]   ;;  %s5425_s2 = inlined_call_operand.vmem [shape: f32[1,32], index: 2, kind: input, shape index: {}]   ;;  %s5426_s3 = inlined_call_operand.vmem [shape: bf16[1568,32], index: 3, kind: output, shape index: {}]  }
   0x1   :  { %v3914_v0 = vld [vmem:[%s5423_s1] sm:$0xff]   ;;  %v3915_v1 = vld [vmem:[%s5423_s1 + $0x8] ss:$0 sps:$4 sm:$0x11]   ;;  %v3918_v4 = vld [vmem:[%s5424_s0 + $0x190] sm:$0xff]  }
   0x2   :  { %v3916_v2 = vld [vmem:[%s5424_s0] sm:$0xff]   ;;  %3708 = vmatprep.subr.bf16.mxu0 %v3914_v0  ;;  %3908 = vmatprep.subr.bf16.mxu1 %v3914_v0  ;;  %v1017_v3 = vsel %vm1015_vm0, %v3915_v1, 0  ;;  %v3917_v5 = vld [vmem:[%s5424_s0 + $0x8] sm:$0xff]   ;;  %v3919_v6 = vld [vmem:[%s5424_s0 + $0x198] sm:$0xff]  }
   0x3   :  { %3709 = vmatpush3.bf16.msra.mxu0 %v3914_v0  ;;  %3910 = vmatpush3.bf16.msra.mxu1 %v3914_v0  ;;  %v3920_v7 = vld [vmem:[%s5424_s0 + $0x10] sm:$0xff]   ;;  %v3922_v8 = vld [vmem:[%s5424_s0 + $0x1a0] sm:$0xff]   ;;  %v3921_v9 = vld [vmem:[%s5424_s0 + $0x18] sm:$0xff]  }
   0x4   :  { %3912 = vmatprep.subr.msk.bf16.mxu0 %vm1015_vm0, %v3915_v1  ;;  %3712 = vmatprep.mubr.msk.bf16.mxu0 %vm720_vm1, %v3916_v2  ;;  %v3923_v10 = vld [vmem:[%s5424_s0 + $0x1a8] sm:$0xff]   ;;  %v3924_v11 = vld [vmem:[%s5424_s0 + $0x20] sm:$0xff]   ;;  %v3926_v12 = vld [vmem:[%s5424_s0 + $0x1b0] sm:$0xff]  }
   0x5   :  { %3913 = vmatprep.subr.msk.bf16.mxu1 %vm1015_vm0, %v3915_v1  ;;  %3812 = vmatprep.mubr.msk.bf16.mxu1 %vm720_vm1, %v3918_v4  ;;  %v3925_v13 = vld [vmem:[%s5424_s0 + $0x28] sm:$0xff]   ;;  %v3927_v14 = vld [vmem:[%s5424_s0 + $0x1b8] sm:$0xff]   ;;  %v3928_v15 = vld [vmem:[%s5424_s0 + $0x30] sm:$0xff]  }
   0x6   :  { %v3930_v16 = vld [vmem:[%s5424_s0 + $0x1c0] sm:$0xff]   ;;  %v3929_v17 = vld [vmem:[%s5424_s0 + $0x38] sm:$0xff]   ;;  %v3931_v18 = vld [vmem:[%s5424_s0 + $0x1c8] sm:$0xff]  }
   0x7   :  { %3711 = vmatpush3.bf16.msra.mxu0 %v1017_v3  ;;  %3911 = vmatpush3.bf16.msra.mxu1 %v1017_v3  ;;  %v3932_v19 = vld [vmem:[%s5424_s0 + $0x40] sm:$0xff]   ;;  %v3934_v20 = vld [vmem:[%s5424_s0 + $0x1d0] sm:$0xff]   ;;  %v3933_v21 = vld [vmem:[%s5424_s0 + $0x48] sm:$0xff]  }
   0x8   :  { %v3935_v22 = vld [vmem:[%s5424_s0 + $0x1d8] sm:$0xff]   ;;  %v3936_v23 = vld [vmem:[%s5424_s0 + $0x50] sm:$0xff]   ;;  %v3938_v24 = vld [vmem:[%s5424_s0 + $0x1e0] sm:$0xff]  }
   0x9   :  { %v3937_v25 = vld [vmem:[%s5424_s0 + $0x58] sm:$0xff]   ;;  %v3939_v26 = vld [vmem:[%s5424_s0 + $0x1e8] sm:$0xff]   ;;  %v3940_v27 = vld [vmem:[%s5424_s0 + $0x60] sm:$0xff]  }
   0xa   :  { %3713 = vmatmul.mubr.msk.bf16.vlgmr.msra.gmra.mrb[0].mxu0 %vm720_vm1, %v3917_v5  ;;  %3813 = vmatmul.mubr.msk.bf16.vlgmr.msra.gmra.mrb[0].mxu1 %vm720_vm1, %v3919_v6  ;;  %v3942_v28 = vld [vmem:[%s5424_s0 + $0x1f0] sm:$0xff]   ;;  %v3941_v29 = vld [vmem:[%s5424_s0 + $0x68] sm:$0xff]   ;;  %v3943_v30 = vld [vmem:[%s5424_s0 + $0x1f8] sm:$0xff]  }
   0xb   :  { %3716 = vmatprep.mubr.msk.bf16.mxu0 %vm720_vm1, %v3920_v7  ;;  %3816 = vmatprep.mubr.msk.bf16.mxu1 %vm720_vm1, %v3922_v8  ;;  %v3944_v31 = vld [vmem:[%s5424_s0 + $0x70] sm:$0xff]   ;;  %v3946_v32 = vld [vmem:[%s5424_s0 + $0x200] sm:$0xff]   ;;  %v3945_v33 = vld [vmem:[%s5424_s0 + $0x78] sm:$0xff]  }
   0xc   :  { %v3947_v34 = vld [vmem:[%s5424_s0 + $0x208] sm:$0xff]   ;;  %v3948_v35 = vld [vmem:[%s5424_s0 + $0x80] sm:$0xff]   ;;  %v3950_v36 = vld [vmem:[%s5424_s0 + $0x210] sm:$0xff]  }
   0xd   :  { %v3949_v37 = vld [vmem:[%s5424_s0 + $0x88] sm:$0xff]   ;;  %v3951_v38 = vld [vmem:[%s5424_s0 + $0x218] sm:$0xff]   ;;  %v3952_v39 = vld [vmem:[%s5424_s0 + $0x90] sm:$0xff]  }
   0xe   :  { %v3954_v40 = vld [vmem:[%s5424_s0 + $0x220] sm:$0xff]   ;;  %v3953_v41 = vld [vmem:[%s5424_s0 + $0x98] sm:$0xff]   ;;  %v3955_v42 = vld [vmem:[%s5424_s0 + $0x228] sm:$0xff]  }
   0xf   :  { %v3956_v43 = vld [vmem:[%s5424_s0 + $0xa0] sm:$0xff]   ;;  %v3958_v44 = vld [vmem:[%s5424_s0 + $0x230] sm:$0xff]   ;;  %v3957_v45 = vld [vmem:[%s5424_s0 + $0xa8] sm:$0xff]  }
  0x10   :  { %v3959_v46 = vld [vmem:[%s5424_s0 + $0x238] sm:$0xff]   ;;  %v3960_v47 = vld [vmem:[%s5424_s0 + $0xb0] sm:$0xff]   ;;  %v3962_v48 = vld [vmem:[%s5424_s0 + $0x240] sm:$0xff]  }
  0x11   :  { %v3961_v49 = vld [vmem:[%s5424_s0 + $0xb8] sm:$0xff]   ;;  %v3963_v50 = vld [vmem:[%s5424_s0 + $0x248] sm:$0xff]   ;;  %v3964_v51 = vld [vmem:[%s5424_s0 + $0xc0] sm:$0xff]  }
  0x12   :  { %3717 = vmatmul.mubr.msk.bf16.gmra.mrb[4].mxu0 %vm720_vm1, %v3921_v9  ;;  %3817 = vmatmul.mubr.msk.bf16.gmra.mrb[4].mxu1 %vm720_vm1, %v3923_v10  ;;  %v3966_v52 = vld [vmem:[%s5424_s0 + $0x250] sm:$0xff]   ;;  %v3965_v53 = vld [vmem:[%s5424_s0 + $0xc8] sm:$0xff]   ;;  %v3967_v54 = vld [vmem:[%s5424_s0 + $0x258] sm:$0xff]  }
  0x13   :  { %3720 = vmatprep.mubr.msk.bf16.mxu0 %vm720_vm1, %v3924_v11  ;;  %3820 = vmatprep.mubr.msk.bf16.mxu1 %vm720_vm1, %v3926_v12  ;;  %v3968_v55 = vld [vmem:[%s5424_s0 + $0xd0] sm:$0xff]   ;;  %v3970_v56 = vld [vmem:[%s5424_s0 + $0x260] sm:$0xff]   ;;  %v3969_v57 = vld [vmem:[%s5424_s0 + $0xd8] sm:$0xff]  }
  0x14   :  { %v3971_v58 = vld [vmem:[%s5424_s0 + $0x268] sm:$0xff]   ;;  %v3972_v59 = vld [vmem:[%s5424_s0 + $0xe0] sm:$0xff]   ;;  %v3974_v60 = vld [vmem:[%s5424_s0 + $0x270] sm:$0xff]  }
  0x15   :  { %v3973_v61 = vld [vmem:[%s5424_s0 + $0xe8] sm:$0xff]   ;;  %v3975_v62 = vld [vmem:[%s5424_s0 + $0x278] sm:$0xff]   ;;  %v3976_v63 = vld [vmem:[%s5424_s0 + $0xf0] sm:$0xff]  }
  0x16   :  { %v3978_v0 = vld [vmem:[%s5424_s0 + $0x280] sm:$0xff]   ;;  %v3977_v1 = vld [vmem:[%s5424_s0 + $0xf8] sm:$0xff]   ;;  %v3979_v2 = vld [vmem:[%s5424_s0 + $0x288] sm:$0xff]  }
  0x17   :  { %v3980_v3 = vld [vmem:[%s5424_s0 + $0x100] sm:$0xff]   ;;  %v3982_v4 = vld [vmem:[%s5424_s0 + $0x290] sm:$0xff]   ;;  %v3981_v5 = vld [vmem:[%s5424_s0 + $0x108] sm:$0xff]  }
  0x18   :  { %v3983_v6 = vld [vmem:[%s5424_s0 + $0x298] sm:$0xff]   ;;  %v3984_v7 = vld [vmem:[%s5424_s0 + $0x110] sm:$0xff]   ;;  %v3986_v8 = vld [vmem:[%s5424_s0 + $0x2a0] sm:$0xff]  }
  0x19   :  { %v3985_v9 = vld [vmem:[%s5424_s0 + $0x118] sm:$0xff]   ;;  %v3987_v10 = vld [vmem:[%s5424_s0 + $0x2a8] sm:$0xff]   ;;  %v3988_v11 = vld [vmem:[%s5424_s0 + $0x120] sm:$0xff]  }
  0x1a   :  { %3721 = vmatmul.mubr.msk.bf16.gmra.mrb[8].mxu0 %vm720_vm1, %v3925_v13  ;;  %3821 = vmatmul.mubr.msk.bf16.gmra.mrb[8].mxu1 %vm720_vm1, %v3927_v14  ;;  %v3990_v12 = vld [vmem:[%s5424_s0 + $0x2b0] sm:$0xff]   ;;  %v3989_v13 = vld [vmem:[%s5424_s0 + $0x128] sm:$0xff]   ;;  %v3991_v14 = vld [vmem:[%s5424_s0 + $0x2b8] sm:$0xff]  }
  0x1b   :  { %3724 = vmatprep.mubr.msk.bf16.mxu0 %vm720_vm1, %v3928_v15  ;;  %3824 = vmatprep.mubr.msk.bf16.mxu1 %vm720_vm1, %v3930_v16  ;;  %v3992_v15 = vld [vmem:[%s5424_s0 + $0x130] sm:$0xff]   ;;  %v3994_v16 = vld [vmem:[%s5424_s0 + $0x2c0] sm:$0xff]  }
  0x22   :  { %3725 = vmatmul.mubr.msk.bf16.gmra.mrb[12].mxu0 %vm720_vm1, %v3929_v17  ;;  %3825 = vmatmul.mubr.msk.bf16.gmra.mrb[12].mxu1 %vm720_vm1, %v3931_v18  ;;  %v3993_v17 = vld [vmem:[%s5424_s0 + $0x138] sm:$0xff]   ;;  %v3995_v18 = vld [vmem:[%s5424_s0 + $0x2c8] sm:$0xff]  }
  0x23   :  { %3728 = vmatprep.mubr.msk.bf16.mxu0 %vm720_vm1, %v3932_v19  ;;  %3828 = vmatprep.mubr.msk.bf16.mxu1 %vm720_vm1, %v3934_v20  ;;  %v3996_v19 = vld [vmem:[%s5424_s0 + $0x140] sm:$0xff]   ;;  %v3998_v20 = vld [vmem:[%s5424_s0 + $0x2d0] sm:$0xff]  }
  0x2a   :  { %3729 = vmatmul.mubr.msk.bf16.gmra.mrb[16].mxu0 %vm720_vm1, %v3933_v21  ;;  %3829 = vmatmul.mubr.msk.bf16.gmra.mrb[16].mxu1 %vm720_vm1, %v3935_v22  ;;  %v3997_v21 = vld [vmem:[%s5424_s0 + $0x148] sm:$0xff]   ;;  %v3999_v22 = vld [vmem:[%s5424_s0 + $0x2d8] sm:$0xff]  }
  0x2b   :  { %3732 = vmatprep.mubr.msk.bf16.mxu0 %vm720_vm1, %v3936_v23  ;;  %3832 = vmatprep.mubr.msk.bf16.mxu1 %vm720_vm1, %v3938_v24  ;;  %v4000_v23 = vld [vmem:[%s5424_s0 + $0x150] sm:$0xff]   ;;  %v4002_v24 = vld [vmem:[%s5424_s0 + $0x2e0] sm:$0xff]  }
  0x32   :  { %3733 = vmatmul.mubr.msk.bf16.gmra.mrb[20].mxu0 %vm720_vm1, %v3937_v25  ;;  %3833 = vmatmul.mubr.msk.bf16.gmra.mrb[20].mxu1 %vm720_vm1, %v3939_v26  ;;  %v4001_v25 = vld [vmem:[%s5424_s0 + $0x158] sm:$0xff]   ;;  %v4003_v26 = vld [vmem:[%s5424_s0 + $0x2e8] sm:$0xff]  }
  0x33   :  { %3736 = vmatprep.mubr.msk.bf16.mxu0 %vm720_vm1, %v3940_v27  ;;  %3836 = vmatprep.mubr.msk.bf16.mxu1 %vm720_vm1, %v3942_v28  ;;  %v4004_v27 = vld [vmem:[%s5424_s0 + $0x160] sm:$0xff]   ;;  %v4006_v28 = vld [vmem:[%s5424_s0 + $0x2f0] sm:$0xff]  }
  0x3a   :  { %3737 = vmatmul.mubr.msk.bf16.gmra.mrb[24].mxu0 %vm720_vm1, %v3941_v29  ;;  %3837 = vmatmul.mubr.msk.bf16.gmra.mrb[24].mxu1 %vm720_vm1, %v3943_v30  ;;  %v4005_v29 = vld [vmem:[%s5424_s0 + $0x168] sm:$0xff]   ;;  %v4007_v30 = vld [vmem:[%s5424_s0 + $0x2f8] sm:$0xff]  }
  0x3b   :  { %3740 = vmatprep.mubr.msk.bf16.mxu0 %vm720_vm1, %v3944_v31  ;;  %3840 = vmatprep.mubr.msk.bf16.mxu1 %vm720_vm1, %v3946_v32  ;;  %v4008_v31 = vld [vmem:[%s5424_s0 + $0x170] sm:$0xff]   ;;  %v4010_v32 = vld [vmem:[%s5424_s0 + $0x300] sm:$0xff]  }
  0x42   :  { %3741 = vmatmul.mubr.msk.bf16.gmra.mrb[28].mxu0 %vm720_vm1, %v3945_v33  ;;  %3841 = vmatmul.mubr.msk.bf16.gmra.mrb[28].mxu1 %vm720_vm1, %v3947_v34  ;;  %v4009_v33 = vld [vmem:[%s5424_s0 + $0x178] sm:$0xff]   ;;  %v4011_v34 = vld [vmem:[%s5424_s0 + $0x308] sm:$0xff]  }
  0x43   :  { %3744 = vmatprep.mubr.msk.bf16.mxu0 %vm720_vm1, %v3948_v35  ;;  %3844 = vmatprep.mubr.msk.bf16.mxu1 %vm720_vm1, %v3950_v36  ;;  %v4012_v35 = vld [vmem:[%s5424_s0 + $0x180] sm:$0xff]   ;;  %v4013_v36 = vld [vmem:[%s5424_s0 + $0x188] sm:$0xff]  }
  0x4a   :  { %3745 = vmatmul.mubr.msk.bf16.gmra.mrb[32].mxu0 %vm720_vm1, %v3949_v37  ;;  %3845 = vmatmul.mubr.msk.bf16.gmra.mrb[32].mxu1 %vm720_vm1, %v3951_v38  ;;  %v4436_v37 = vld [vmem:[%s5425_s2] ss:$0 sm:$0xff] }
  0x4b   :  { %3748 = vmatprep.mubr.msk.bf16.mxu0 %vm720_vm1, %v3952_v39  ;;  %3848 = vmatprep.mubr.msk.bf16.mxu1 %vm720_vm1, %v3954_v40 }
  0x52   :  { %3749 = vmatmul.mubr.msk.bf16.gmra.mrb[36].mxu0 %vm720_vm1, %v3953_v41  ;;  %3849 = vmatmul.mubr.msk.bf16.gmra.mrb[36].mxu1 %vm720_vm1, %v3955_v42 }
  0x53   :  { %3752 = vmatprep.mubr.msk.bf16.mxu0 %vm720_vm1, %v3956_v43  ;;  %3852 = vmatprep.mubr.msk.bf16.mxu1 %vm720_vm1, %v3958_v44 }
  0x5a   :  { %3753 = vmatmul.mubr.msk.bf16.gmra.mrb[40].mxu0 %vm720_vm1, %v3957_v45  ;;  %3853 = vmatmul.mubr.msk.bf16.gmra.mrb[40].mxu1 %vm720_vm1, %v3959_v46 }
  0x5b   :  { %3756 = vmatprep.mubr.msk.bf16.mxu0 %vm720_vm1, %v3960_v47  ;;  %3856 = vmatprep.mubr.msk.bf16.mxu1 %vm720_vm1, %v3962_v48 }
  0x62   :  { %3757 = vmatmul.mubr.msk.bf16.gmra.mrb[44].mxu0 %vm720_vm1, %v3961_v49  ;;  %3857 = vmatmul.mubr.msk.bf16.gmra.mrb[44].mxu1 %vm720_vm1, %v3963_v50 }
  0x63   :  { %3760 = vmatprep.mubr.msk.bf16.mxu0 %vm720_vm1, %v3964_v51  ;;  %3860 = vmatprep.mubr.msk.bf16.mxu1 %vm720_vm1, %v3966_v52 }
  0x6a   :  { %3761 = vmatmul.mubr.msk.bf16.gmra.mrb[48].mxu0 %vm720_vm1, %v3965_v53  ;;  %3861 = vmatmul.mubr.msk.bf16.gmra.mrb[48].mxu1 %vm720_vm1, %v3967_v54 }
  0x6b   :  { %3764 = vmatprep.mubr.msk.bf16.mxu0 %vm720_vm1, %v3968_v55  ;;  %3864 = vmatprep.mubr.msk.bf16.mxu1 %vm720_vm1, %v3970_v56 }
  0x72   :  { %3765 = vmatmul.mubr.msk.bf16.gmra.mrb[52].mxu0 %vm720_vm1, %v3969_v57  ;;  %3865 = vmatmul.mubr.msk.bf16.gmra.mrb[52].mxu1 %vm720_vm1, %v3971_v58 }
  0x73   :  { %3768 = vmatprep.mubr.msk.bf16.mxu0 %vm720_vm1, %v3972_v59  ;;  %3868 = vmatprep.mubr.msk.bf16.mxu1 %vm720_vm1, %v3974_v60 }
  0x7a   :  { %3769 = vmatmul.mubr.msk.bf16.gmra.mrb[56].mxu0 %vm720_vm1, %v3973_v61  ;;  %3869 = vmatmul.mubr.msk.bf16.gmra.mrb[56].mxu1 %vm720_vm1, %v3975_v62 }
  0x7b   :  { %3772 = vmatprep.mubr.msk.bf16.mxu0 %vm720_vm1, %v3976_v63  ;;  %3872 = vmatprep.mubr.msk.bf16.mxu1 %vm720_vm1, %v3978_v0 }
  0x82   :  { %3773 = vmatmul.mubr.msk.bf16.gmra.mrb[60].mxu0 %vm720_vm1, %v3977_v1  ;;  %3873 = vmatmul.mubr.msk.bf16.gmra.mrb[60].mxu1 %vm720_vm1, %v3979_v2 }
  0x83   :  { %3776 = vmatprep.mubr.msk.bf16.mxu0 %vm720_vm1, %v3980_v3  ;;  %3876 = vmatprep.mubr.msk.bf16.mxu1 %vm720_vm1, %v3982_v4 }
  0x8a   :  { %3777 = vmatmul.mubr.msk.bf16.gmra.mrb[64].mxu0 %vm720_vm1, %v3981_v5  ;;  %3877 = vmatmul.mubr.msk.bf16.gmra.mrb[64].mxu1 %vm720_vm1, %v3983_v6 }
  0x8b   :  { %3780 = vmatprep.mubr.msk.bf16.mxu0 %vm720_vm1, %v3984_v7  ;;  %3880 = vmatprep.mubr.msk.bf16.mxu1 %vm720_vm1, %v3986_v8 }
  0x92   :  { %3781 = vmatmul.mubr.msk.bf16.gmra.mrb[68].mxu0 %vm720_vm1, %v3985_v9  ;;  %3881 = vmatmul.mubr.msk.bf16.gmra.mrb[68].mxu1 %vm720_vm1, %v3987_v10 }
  0x93   :  { %3784 = vmatprep.mubr.msk.bf16.mxu0 %vm720_vm1, %v3988_v11  ;;  %3884 = vmatprep.mubr.msk.bf16.mxu1 %vm720_vm1, %v3990_v12 }
  0x9a   :  { %3785 = vmatmul.mubr.msk.bf16.gmra.mrb[72].mxu0 %vm720_vm1, %v3989_v13  ;;  %3885 = vmatmul.mubr.msk.bf16.gmra.mrb[72].mxu1 %vm720_vm1, %v3991_v14 }
  0x9b   :  { %3788 = vmatprep.mubr.msk.bf16.mxu0 %vm720_vm1, %v3992_v15  ;;  %3888 = vmatprep.mubr.msk.bf16.mxu1 %vm720_vm1, %v3994_v16 }
  0xa2   :  { %3789 = vmatmul.mubr.msk.bf16.gmra.mrb[76].mxu0 %vm720_vm1, %v3993_v17  ;;  %3889 = vmatmul.mubr.msk.bf16.gmra.mrb[76].mxu1 %vm720_vm1, %v3995_v18 }
  0xa3   :  { %3792 = vmatprep.mubr.msk.bf16.mxu0 %vm720_vm1, %v3996_v19  ;;  %3892 = vmatprep.mubr.msk.bf16.mxu1 %vm720_vm1, %v3998_v20 }
  0xaa   :  { %3793 = vmatmul.mubr.msk.bf16.gmra.mrb[80].mxu0 %vm720_vm1, %v3997_v21  ;;  %3893 = vmatmul.mubr.msk.bf16.gmra.mrb[80].mxu1 %vm720_vm1, %v3999_v22 }
  0xab   :  { %3796 = vmatprep.mubr.msk.bf16.mxu0 %vm720_vm1, %v4000_v23  ;;  %3896 = vmatprep.mubr.msk.bf16.mxu1 %vm720_vm1, %v4002_v24 }
  0xb2   :  { %3797 = vmatmul.mubr.msk.bf16.gmra.mrb[84].mxu0 %vm720_vm1, %v4001_v25  ;;  %3897 = vmatmul.mubr.msk.bf16.gmra.mrb[84].mxu1 %vm720_vm1, %v4003_v26 }
  0xb3   :  { %3800 = vmatprep.mubr.msk.bf16.mxu0 %vm720_vm1, %v4004_v27  ;;  %3900 = vmatprep.mubr.msk.bf16.mxu1 %vm720_vm1, %v4006_v28 }
  0xba   :  { %3801 = vmatmul.mubr.msk.bf16.gmra.mrb[88].mxu0 %vm720_vm1, %v4005_v29  ;;  %3901 = vmatmul.mubr.msk.bf16.gmra.mrb[88].mxu1 %vm720_vm1, %v4007_v30 }
  0xbb   :  { %3804 = vmatprep.mubr.msk.bf16.mxu0 %vm720_vm1, %v4008_v31  ;;  %3904 = vmatprep.mubr.msk.bf16.mxu1 %vm720_vm1, %v4010_v32 }
  0xc2   :  { %3805 = vmatmul.mubr.msk.bf16.gmra.mrb[92].mxu0 %vm720_vm1, %v4009_v33  ;;  %3905 = vmatmul.mubr.msk.bf16.gmra.mrb[92].mxu1 %vm720_vm1, %v4011_v34 }
  0xc3   :  { %3808 = vmatprep.mubr.msk.bf16.mxu0 %vm720_vm1, %v4012_v35 }
  0xca   :  { %3809 = vmatmul.mubr.msk.bf16.gmra.mrb[96].mxu0 %vm720_vm1, %v4013_v36 }
  0xdd   :  { %v3714_v38 = vpop.f32.mrb[0].mxu0  ;;  %v3814_v39 = vpop.f32.mrb[0].mxu1 }
  0xde   :  { %v1062_v40 = vadd.f32 %v3714_v38, %v4436_v37  ;;  %v1053_v41 = vpop.f32.mrb[1].mxu0  ;;  %v1462_v42 = vadd.f32 %v3814_v39, %v4436_v37  ;;  %v1453_v43 = vpop.f32.mrb[1].mxu1 }
  0xdf   :  { %v1054_v44 = vadd.f32 %v4436_v37, %v1053_v41  ;;  %v3715_v45 = vpop.f32.mrb[2].mxu0  ;;  %v1454_v46 = vadd.f32 %v4436_v37, %v1453_v43  ;;  %v3815_v47 = vpop.f32.mrb[2].mxu1 }
  0xe0   :  { %v1838_v48 = vmax.f32 %v1062_v40, 0.0  ;;  %v1065_v49 = vadd.f32 %v3715_v45, %v4436_v37  ;;  %v1056_v50 = vpop.f32.mrb[3].mxu0  ;;  %v1938_v51 = vmax.f32 %v1462_v42, 0.0  ;;  %v1465_v52 = vadd.f32 %v3815_v47, %v4436_v37  ;;  %v1456_v53 = vpop.f32.mrb[3].mxu1 }
  0xe1   :  { %v1836_v54 = vmax.f32 %v1054_v44, 0.0  ;;  %v1057_v55 = vadd.f32 %v4436_v37, %v1056_v50  ;;  %v1936_v56 = vmax.f32 %v1454_v46, 0.0  ;;  %v1457_v57 = vadd.f32 %v4436_v37, %v1456_v53 }
  0xe2   :  { %v3414_v58 = vpack.c.bf16 %v1838_v48, %v1838_v48  ;;  %v1839_v59 = vmax.f32 %v1065_v49, 0.0  ;;  %v3514_v60 = vpack.c.bf16 %v1938_v51, %v1938_v51  ;;  %v1939_v61 = vmax.f32 %v1465_v52, 0.0 }
  0xe3   :  { %v3412_v62 = vpack.c.bf16 %v1836_v54, %v1836_v54  ;;  %v1837_v63 = vmax.f32 %v1057_v55, 0.0  ;;  %v3512_v0 = vpack.c.bf16 %v1936_v56, %v1936_v56  ;;  %v1937_v1 = vmax.f32 %v1457_v57, 0.0 }
  0xe4   :  { %2819 = vst.msk [vmem:[%s5426_s3 + $0x8] sm:$0xf] %vm2816_vm2, %v3414_v58  ;;  %v3415_v2 = vpack.c.bf16 %v1839_v59, %v1839_v59  ;;  %2919 = vst.msk [vmem:[%s5426_s3 + $0x198] sm:$0xf] %vm2816_vm2, %v3514_v60  ;;  %v3515_v3 = vpack.c.bf16 %v1939_v61, %v1939_v61 }
  0xe5   :  { %2817 = vst.msk [vmem:[%s5426_s3] sm:$0xf] %vm2816_vm2, %v3412_v62  ;;  %v3413_v4 = vpack.c.bf16 %v1837_v63, %v1837_v63  ;;  %2917 = vst.msk [vmem:[%s5426_s3 + $0x190] sm:$0xf] %vm2816_vm2, %v3512_v0  ;;  %v3718_v5 = vpop.f32.mrb[4].mxu0  ;;  %v3513_v6 = vpack.c.bf16 %v1937_v1, %v1937_v1  ;;  %v3818_v7 = vpop.f32.mrb[4].mxu1 }
  0xe6   :  { %2820 = vst.msk [vmem:[%s5426_s3 + $0xc] sm:$0xf] %vm2816_vm2, %v3415_v2  ;;  %2920 = vst.msk [vmem:[%s5426_s3 + $0x19c] sm:$0xf] %vm2816_vm2, %v3515_v3  ;;  %v1078_v8 = vadd.f32 %v3718_v5, %v4436_v37  ;;  %v1069_v9 = vpop.f32.mrb[5].mxu0  ;;  %v1478_v10 = vadd.f32 %v3818_v7, %v4436_v37  ;;  %v1469_v11 = vpop.f32.mrb[5].mxu1 }
  0xe7   :  { %2818 = vst.msk [vmem:[%s5426_s3 + $0x4] sm:$0xf] %vm2816_vm2, %v3413_v4  ;;  %2918 = vst.msk [vmem:[%s5426_s3 + $0x194] sm:$0xf] %vm2816_vm2, %v3513_v6  ;;  %v1070_v12 = vadd.f32 %v4436_v37, %v1069_v9  ;;  %v3719_v13 = vpop.f32.mrb[6].mxu0  ;;  %v1470_v14 = vadd.f32 %v4436_v37, %v1469_v11  ;;  %v3819_v15 = vpop.f32.mrb[6].mxu1 }
  0xe8   :  { %v1842_v16 = vmax.f32 %v1078_v8, 0.0  ;;  %v1081_v17 = vadd.f32 %v3719_v13, %v4436_v37  ;;  %v1072_v18 = vpop.f32.mrb[7].mxu0  ;;  %v1942_v19 = vmax.f32 %v1478_v10, 0.0  ;;  %v1481_v20 = vadd.f32 %v3819_v15, %v4436_v37  ;;  %v1472_v21 = vpop.f32.mrb[7].mxu1 }
  0xe9   :  { %v1840_v22 = vmax.f32 %v1070_v12, 0.0  ;;  %v1073_v23 = vadd.f32 %v4436_v37, %v1072_v18  ;;  %v1940_v24 = vmax.f32 %v1470_v14, 0.0  ;;  %v1473_v25 = vadd.f32 %v4436_v37, %v1472_v21 }
  0xea   :  { %v3418_v26 = vpack.c.bf16 %v1842_v16, %v1842_v16  ;;  %v1843_v27 = vmax.f32 %v1081_v17, 0.0  ;;  %v3518_v28 = vpack.c.bf16 %v1942_v19, %v1942_v19  ;;  %v1943_v29 = vmax.f32 %v1481_v20, 0.0 }
  0xeb   :  { %v3416_v30 = vpack.c.bf16 %v1840_v22, %v1840_v22  ;;  %v1841_v31 = vmax.f32 %v1073_v23, 0.0  ;;  %v3516_v32 = vpack.c.bf16 %v1940_v24, %v1940_v24  ;;  %v1941_v33 = vmax.f32 %v1473_v25, 0.0 }
  0xec   :  { %2823 = vst.msk [vmem:[%s5426_s3 + $0x18] sm:$0xf] %vm2816_vm2, %v3418_v26  ;;  %v3419_v34 = vpack.c.bf16 %v1843_v27, %v1843_v27  ;;  %2923 = vst.msk [vmem:[%s5426_s3 + $0x1a8] sm:$0xf] %vm2816_vm2, %v3518_v28  ;;  %v3519_v35 = vpack.c.bf16 %v1943_v29, %v1943_v29 }
  0xed   :  { %2821 = vst.msk [vmem:[%s5426_s3 + $0x10] sm:$0xf] %vm2816_vm2, %v3416_v30  ;;  %v3417_v36 = vpack.c.bf16 %v1841_v31, %v1841_v31  ;;  %2921 = vst.msk [vmem:[%s5426_s3 + $0x1a0] sm:$0xf] %vm2816_vm2, %v3516_v32  ;;  %v3722_v38 = vpop.f32.mrb[8].mxu0  ;;  %v3517_v39 = vpack.c.bf16 %v1941_v33, %v1941_v33  ;;  %v3822_v40 = vpop.f32.mrb[8].mxu1 }
  0xee   :  { %2824 = vst.msk [vmem:[%s5426_s3 + $0x1c] sm:$0xf] %vm2816_vm2, %v3419_v34  ;;  %2924 = vst.msk [vmem:[%s5426_s3 + $0x1ac] sm:$0xf] %vm2816_vm2, %v3519_v35  ;;  %v1094_v41 = vadd.f32 %v3722_v38, %v4436_v37  ;;  %v1085_v42 = vpop.f32.mrb[9].mxu0  ;;  %v1494_v43 = vadd.f32 %v3822_v40, %v4436_v37  ;;  %v1485_v44 = vpop.f32.mrb[9].mxu1 }
  0xef   :  { %2822 = vst.msk [vmem:[%s5426_s3 + $0x14] sm:$0xf] %vm2816_vm2, %v3417_v36  ;;  %2922 = vst.msk [vmem:[%s5426_s3 + $0x1a4] sm:$0xf] %vm2816_vm2, %v3517_v39  ;;  %v1086_v45 = vadd.f32 %v4436_v37, %v1085_v42  ;;  %v3723_v46 = vpop.f32.mrb[10].mxu0  ;;  %v1486_v47 = vadd.f32 %v4436_v37, %v1485_v44  ;;  %v3823_v48 = vpop.f32.mrb[10].mxu1 }
  0xf0   :  { %v1846_v49 = vmax.f32 %v1094_v41, 0.0  ;;  %v1097_v50 = vadd.f32 %v3723_v46, %v4436_v37  ;;  %v1088_v51 = vpop.f32.mrb[11].mxu0  ;;  %v1946_v52 = vmax.f32 %v1494_v43, 0.0  ;;  %v1497_v53 = vadd.f32 %v3823_v48, %v4436_v37  ;;  %v1488_v54 = vpop.f32.mrb[11].mxu1 }
  0xf1   :  { %v1844_v55 = vmax.f32 %v1086_v45, 0.0  ;;  %v1089_v56 = vadd.f32 %v4436_v37, %v1088_v51  ;;  %v1944_v57 = vmax.f32 %v1486_v47, 0.0  ;;  %v1489_v58 = vadd.f32 %v4436_v37, %v1488_v54 }
  0xf2   :  { %v3422_v59 = vpack.c.bf16 %v1846_v49, %v1846_v49  ;;  %v1847_v60 = vmax.f32 %v1097_v50, 0.0  ;;  %v3522_v61 = vpack.c.bf16 %v1946_v52, %v1946_v52  ;;  %v1947_v62 = vmax.f32 %v1497_v53, 0.0 }
  0xf3   :  { %v3420_v63 = vpack.c.bf16 %v1844_v55, %v1844_v55  ;;  %v1845_v0 = vmax.f32 %v1089_v56, 0.0  ;;  %v3520_v1 = vpack.c.bf16 %v1944_v57, %v1944_v57  ;;  %v1945_v2 = vmax.f32 %v1489_v58, 0.0 }
  0xf4   :  { %2827 = vst.msk [vmem:[%s5426_s3 + $0x28] sm:$0xf] %vm2816_vm2, %v3422_v59  ;;  %v3423_v3 = vpack.c.bf16 %v1847_v60, %v1847_v60  ;;  %2927 = vst.msk [vmem:[%s5426_s3 + $0x1b8] sm:$0xf] %vm2816_vm2, %v3522_v61  ;;  %v3523_v4 = vpack.c.bf16 %v1947_v62, %v1947_v62 }
  0xf5   :  { %2825 = vst.msk [vmem:[%s5426_s3 + $0x20] sm:$0xf] %vm2816_vm2, %v3420_v63  ;;  %v3421_v5 = vpack.c.bf16 %v1845_v0, %v1845_v0  ;;  %2925 = vst.msk [vmem:[%s5426_s3 + $0x1b0] sm:$0xf] %vm2816_vm2, %v3520_v1  ;;  %v3726_v6 = vpop.f32.mrb[12].mxu0  ;;  %v3521_v7 = vpack.c.bf16 %v1945_v2, %v1945_v2  ;;  %v3826_v8 = vpop.f32.mrb[12].mxu1 }
  0xf6   :  { %2828 = vst.msk [vmem:[%s5426_s3 + $0x2c] sm:$0xf] %vm2816_vm2, %v3423_v3  ;;  %2928 = vst.msk [vmem:[%s5426_s3 + $0x1bc] sm:$0xf] %vm2816_vm2, %v3523_v4  ;;  %v1110_v9 = vadd.f32 %v3726_v6, %v4436_v37  ;;  %v1101_v10 = vpop.f32.mrb[13].mxu0  ;;  %v1510_v11 = vadd.f32 %v3826_v8, %v4436_v37  ;;  %v1501_v12 = vpop.f32.mrb[13].mxu1 }
  0xf7   :  { %2826 = vst.msk [vmem:[%s5426_s3 + $0x24] sm:$0xf] %vm2816_vm2, %v3421_v5  ;;  %2926 = vst.msk [vmem:[%s5426_s3 + $0x1b4] sm:$0xf] %vm2816_vm2, %v3521_v7  ;;  %v1102_v13 = vadd.f32 %v4436_v37, %v1101_v10  ;;  %v3727_v14 = vpop.f32.mrb[14].mxu0  ;;  %v1502_v15 = vadd.f32 %v4436_v37, %v1501_v12  ;;  %v3827_v16 = vpop.f32.mrb[14].mxu1 }
  0xf8   :  { %v1850_v17 = vmax.f32 %v1110_v9, 0.0  ;;  %v1113_v18 = vadd.f32 %v3727_v14, %v4436_v37  ;;  %v1104_v19 = vpop.f32.mrb[15].mxu0  ;;  %v1950_v20 = vmax.f32 %v1510_v11, 0.0  ;;  %v1513_v21 = vadd.f32 %v3827_v16, %v4436_v37  ;;  %v1504_v22 = vpop.f32.mrb[15].mxu1 }
  0xf9   :  { %v1848_v23 = vmax.f32 %v1102_v13, 0.0  ;;  %v1105_v24 = vadd.f32 %v4436_v37, %v1104_v19  ;;  %v1948_v25 = vmax.f32 %v1502_v15, 0.0  ;;  %v1505_v26 = vadd.f32 %v4436_v37, %v1504_v22 }
  0xfa   :  { %v3426_v27 = vpack.c.bf16 %v1850_v17, %v1850_v17  ;;  %v1851_v28 = vmax.f32 %v1113_v18, 0.0  ;;  %v3526_v29 = vpack.c.bf16 %v1950_v20, %v1950_v20  ;;  %v1951_v30 = vmax.f32 %v1513_v21, 0.0 }
  0xfb   :  { %v3424_v31 = vpack.c.bf16 %v1848_v23, %v1848_v23  ;;  %v1849_v32 = vmax.f32 %v1105_v24, 0.0  ;;  %v3524_v33 = vpack.c.bf16 %v1948_v25, %v1948_v25  ;;  %v1949_v34 = vmax.f32 %v1505_v26, 0.0 }
  0xfc   :  { %2831 = vst.msk [vmem:[%s5426_s3 + $0x38] sm:$0xf] %vm2816_vm2, %v3426_v27  ;;  %v3427_v35 = vpack.c.bf16 %v1851_v28, %v1851_v28  ;;  %2931 = vst.msk [vmem:[%s5426_s3 + $0x1c8] sm:$0xf] %vm2816_vm2, %v3526_v29  ;;  %v3527_v36 = vpack.c.bf16 %v1951_v30, %v1951_v30 }
  0xfd   :  { %2829 = vst.msk [vmem:[%s5426_s3 + $0x30] sm:$0xf] %vm2816_vm2, %v3424_v31  ;;  %v3425_v38 = vpack.c.bf16 %v1849_v32, %v1849_v32  ;;  %2929 = vst.msk [vmem:[%s5426_s3 + $0x1c0] sm:$0xf] %vm2816_vm2, %v3524_v33  ;;  %v3730_v39 = vpop.f32.mrb[16].mxu0  ;;  %v3525_v40 = vpack.c.bf16 %v1949_v34, %v1949_v34  ;;  %v3830_v41 = vpop.f32.mrb[16].mxu1 }
  0xfe   :  { %2832 = vst.msk [vmem:[%s5426_s3 + $0x3c] sm:$0xf] %vm2816_vm2, %v3427_v35  ;;  %2932 = vst.msk [vmem:[%s5426_s3 + $0x1cc] sm:$0xf] %vm2816_vm2, %v3527_v36  ;;  %v1126_v42 = vadd.f32 %v3730_v39, %v4436_v37  ;;  %v1117_v43 = vpop.f32.mrb[17].mxu0  ;;  %v1526_v44 = vadd.f32 %v3830_v41, %v4436_v37  ;;  %v1517_v45 = vpop.f32.mrb[17].mxu1 }
  0xff   :  { %2830 = vst.msk [vmem:[%s5426_s3 + $0x34] sm:$0xf] %vm2816_vm2, %v3425_v38  ;;  %2930 = vst.msk [vmem:[%s5426_s3 + $0x1c4] sm:$0xf] %vm2816_vm2, %v3525_v40  ;;  %v1118_v46 = vadd.f32 %v4436_v37, %v1117_v43  ;;  %v3731_v47 = vpop.f32.mrb[18].mxu0  ;;  %v1518_v48 = vadd.f32 %v4436_v37, %v1517_v45  ;;  %v3831_v49 = vpop.f32.mrb[18].mxu1 }
 0x100   :  { %v1854_v50 = vmax.f32 %v1126_v42, 0.0  ;;  %v1129_v51 = vadd.f32 %v3731_v47, %v4436_v37  ;;  %v1120_v52 = vpop.f32.mrb[19].mxu0  ;;  %v1954_v53 = vmax.f32 %v1526_v44, 0.0  ;;  %v1529_v54 = vadd.f32 %v3831_v49, %v4436_v37  ;;  %v1520_v55 = vpop.f32.mrb[19].mxu1 }
 0x101   :  { %v1852_v56 = vmax.f32 %v1118_v46, 0.0  ;;  %v1121_v57 = vadd.f32 %v4436_v37, %v1120_v52  ;;  %v1952_v58 = vmax.f32 %v1518_v48, 0.0  ;;  %v1521_v59 = vadd.f32 %v4436_v37, %v1520_v55 }
 0x102   :  { %v3430_v60 = vpack.c.bf16 %v1854_v50, %v1854_v50  ;;  %v1855_v61 = vmax.f32 %v1129_v51, 0.0  ;;  %v3530_v62 = vpack.c.bf16 %v1954_v53, %v1954_v53  ;;  %v1955_v63 = vmax.f32 %v1529_v54, 0.0 }
 0x103   :  { %v3428_v0 = vpack.c.bf16 %v1852_v56, %v1852_v56  ;;  %v1853_v1 = vmax.f32 %v1121_v57, 0.0  ;;  %v3528_v2 = vpack.c.bf16 %v1952_v58, %v1952_v58  ;;  %v1953_v3 = vmax.f32 %v1521_v59, 0.0 }
 0x104   :  { %2835 = vst.msk [vmem:[%s5426_s3 + $0x48] sm:$0xf] %vm2816_vm2, %v3430_v60  ;;  %v3431_v4 = vpack.c.bf16 %v1855_v61, %v1855_v61  ;;  %2935 = vst.msk [vmem:[%s5426_s3 + $0x1d8] sm:$0xf] %vm2816_vm2, %v3530_v62  ;;  %v3531_v5 = vpack.c.bf16 %v1955_v63, %v1955_v63 }
 0x105   :  { %2833 = vst.msk [vmem:[%s5426_s3 + $0x40] sm:$0xf] %vm2816_vm2, %v3428_v0  ;;  %v3429_v6 = vpack.c.bf16 %v1853_v1, %v1853_v1  ;;  %2933 = vst.msk [vmem:[%s5426_s3 + $0x1d0] sm:$0xf] %vm2816_vm2, %v3528_v2  ;;  %v3734_v7 = vpop.f32.mrb[20].mxu0  ;;  %v3529_v8 = vpack.c.bf16 %v1953_v3, %v1953_v3  ;;  %v3834_v9 = vpop.f32.mrb[20].mxu1 }
 0x106   :  { %2836 = vst.msk [vmem:[%s5426_s3 + $0x4c] sm:$0xf] %vm2816_vm2, %v3431_v4  ;;  %2936 = vst.msk [vmem:[%s5426_s3 + $0x1dc] sm:$0xf] %vm2816_vm2, %v3531_v5  ;;  %v1142_v10 = vadd.f32 %v3734_v7, %v4436_v37  ;;  %v1133_v11 = vpop.f32.mrb[21].mxu0  ;;  %v1542_v12 = vadd.f32 %v3834_v9, %v4436_v37  ;;  %v1533_v13 = vpop.f32.mrb[21].mxu1 }
 0x107   :  { %2834 = vst.msk [vmem:[%s5426_s3 + $0x44] sm:$0xf] %vm2816_vm2, %v3429_v6  ;;  %2934 = vst.msk [vmem:[%s5426_s3 + $0x1d4] sm:$0xf] %vm2816_vm2, %v3529_v8  ;;  %v1134_v14 = vadd.f32 %v4436_v37, %v1133_v11  ;;  %v3735_v15 = vpop.f32.mrb[22].mxu0  ;;  %v1534_v16 = vadd.f32 %v4436_v37, %v1533_v13  ;;  %v3835_v17 = vpop.f32.mrb[22].mxu1 }
 0x108   :  { %v1858_v18 = vmax.f32 %v1142_v10, 0.0  ;;  %v1145_v19 = vadd.f32 %v3735_v15, %v4436_v37  ;;  %v1136_v20 = vpop.f32.mrb[23].mxu0  ;;  %v1958_v21 = vmax.f32 %v1542_v12, 0.0  ;;  %v1545_v22 = vadd.f32 %v3835_v17, %v4436_v37  ;;  %v1536_v23 = vpop.f32.mrb[23].mxu1 }
 0x109   :  { %v1856_v24 = vmax.f32 %v1134_v14, 0.0  ;;  %v1137_v25 = vadd.f32 %v4436_v37, %v1136_v20  ;;  %v1956_v26 = vmax.f32 %v1534_v16, 0.0  ;;  %v1537_v27 = vadd.f32 %v4436_v37, %v1536_v23 }
 0x10a   :  { %v3434_v28 = vpack.c.bf16 %v1858_v18, %v1858_v18  ;;  %v1859_v29 = vmax.f32 %v1145_v19, 0.0  ;;  %v3534_v30 = vpack.c.bf16 %v1958_v21, %v1958_v21  ;;  %v1959_v31 = vmax.f32 %v1545_v22, 0.0 }
 0x10b   :  { %v3432_v32 = vpack.c.bf16 %v1856_v24, %v1856_v24  ;;  %v1857_v33 = vmax.f32 %v1137_v25, 0.0  ;;  %v3532_v34 = vpack.c.bf16 %v1956_v26, %v1956_v26  ;;  %v1957_v35 = vmax.f32 %v1537_v27, 0.0 }
 0x10c   :  { %2839 = vst.msk [vmem:[%s5426_s3 + $0x58] sm:$0xf] %vm2816_vm2, %v3434_v28  ;;  %v3435_v36 = vpack.c.bf16 %v1859_v29, %v1859_v29  ;;  %2939 = vst.msk [vmem:[%s5426_s3 + $0x1e8] sm:$0xf] %vm2816_vm2, %v3534_v30  ;;  %v3535_v38 = vpack.c.bf16 %v1959_v31, %v1959_v31 }
 0x10d   :  { %2837 = vst.msk [vmem:[%s5426_s3 + $0x50] sm:$0xf] %vm2816_vm2, %v3432_v32  ;;  %v3433_v39 = vpack.c.bf16 %v1857_v33, %v1857_v33  ;;  %2937 = vst.msk [vmem:[%s5426_s3 + $0x1e0] sm:$0xf] %vm2816_vm2, %v3532_v34  ;;  %v3738_v40 = vpop.f32.mrb[24].mxu0  ;;  %v3533_v41 = vpack.c.bf16 %v1957_v35, %v1957_v35  ;;  %v3838_v42 = vpop.f32.mrb[24].mxu1 }
 0x10e   :  { %2840 = vst.msk [vmem:[%s5426_s3 + $0x5c] sm:$0xf] %vm2816_vm2, %v3435_v36  ;;  %2940 = vst.msk [vmem:[%s5426_s3 + $0x1ec] sm:$0xf] %vm2816_vm2, %v3535_v38  ;;  %v1158_v43 = vadd.f32 %v3738_v40, %v4436_v37  ;;  %v1149_v44 = vpop.f32.mrb[25].mxu0  ;;  %v1558_v45 = vadd.f32 %v3838_v42, %v4436_v37  ;;  %v1549_v46 = vpop.f32.mrb[25].mxu1 }
 0x10f   :  { %2838 = vst.msk [vmem:[%s5426_s3 + $0x54] sm:$0xf] %vm2816_vm2, %v3433_v39  ;;  %2938 = vst.msk [vmem:[%s5426_s3 + $0x1e4] sm:$0xf] %vm2816_vm2, %v3533_v41  ;;  %v1150_v47 = vadd.f32 %v4436_v37, %v1149_v44  ;;  %v3739_v48 = vpop.f32.mrb[26].mxu0  ;;  %v1550_v49 = vadd.f32 %v4436_v37, %v1549_v46  ;;  %v3839_v50 = vpop.f32.mrb[26].mxu1 }
 0x110   :  { %v1862_v51 = vmax.f32 %v1158_v43, 0.0  ;;  %v1161_v52 = vadd.f32 %v3739_v48, %v4436_v37  ;;  %v1152_v53 = vpop.f32.mrb[27].mxu0  ;;  %v1962_v54 = vmax.f32 %v1558_v45, 0.0  ;;  %v1561_v55 = vadd.f32 %v3839_v50, %v4436_v37  ;;  %v1552_v56 = vpop.f32.mrb[27].mxu1 }
 0x111   :  { %v1860_v57 = vmax.f32 %v1150_v47, 0.0  ;;  %v1153_v58 = vadd.f32 %v4436_v37, %v1152_v53  ;;  %v1960_v59 = vmax.f32 %v1550_v49, 0.0  ;;  %v1553_v60 = vadd.f32 %v4436_v37, %v1552_v56 }
 0x112   :  { %v3438_v61 = vpack.c.bf16 %v1862_v51, %v1862_v51  ;;  %v1863_v62 = vmax.f32 %v1161_v52, 0.0  ;;  %v3538_v63 = vpack.c.bf16 %v1962_v54, %v1962_v54  ;;  %v1963_v0 = vmax.f32 %v1561_v55, 0.0 }
 0x113   :  { %v3436_v1 = vpack.c.bf16 %v1860_v57, %v1860_v57  ;;  %v1861_v2 = vmax.f32 %v1153_v58, 0.0  ;;  %v3536_v3 = vpack.c.bf16 %v1960_v59, %v1960_v59  ;;  %v1961_v4 = vmax.f32 %v1553_v60, 0.0 }
 0x114   :  { %2843 = vst.msk [vmem:[%s5426_s3 + $0x68] sm:$0xf] %vm2816_vm2, %v3438_v61  ;;  %v3439_v5 = vpack.c.bf16 %v1863_v62, %v1863_v62  ;;  %2943 = vst.msk [vmem:[%s5426_s3 + $0x1f8] sm:$0xf] %vm2816_vm2, %v3538_v63  ;;  %v3539_v6 = vpack.c.bf16 %v1963_v0, %v1963_v0 }
 0x115   :  { %2841 = vst.msk [vmem:[%s5426_s3 + $0x60] sm:$0xf] %vm2816_vm2, %v3436_v1  ;;  %v3437_v7 = vpack.c.bf16 %v1861_v2, %v1861_v2  ;;  %2941 = vst.msk [vmem:[%s5426_s3 + $0x1f0] sm:$0xf] %vm2816_vm2, %v3536_v3  ;;  %v3742_v8 = vpop.f32.mrb[28].mxu0  ;;  %v3537_v9 = vpack.c.bf16 %v1961_v4, %v1961_v4  ;;  %v3842_v10 = vpop.f32.mrb[28].mxu1 }
 0x116   :  { %2844 = vst.msk [vmem:[%s5426_s3 + $0x6c] sm:$0xf] %vm2816_vm2, %v3439_v5  ;;  %2944 = vst.msk [vmem:[%s5426_s3 + $0x1fc] sm:$0xf] %vm2816_vm2, %v3539_v6  ;;  %v1174_v11 = vadd.f32 %v3742_v8, %v4436_v37  ;;  %v1165_v12 = vpop.f32.mrb[29].mxu0  ;;  %v1574_v13 = vadd.f32 %v3842_v10, %v4436_v37  ;;  %v1565_v14 = vpop.f32.mrb[29].mxu1 }
 0x117   :  { %2842 = vst.msk [vmem:[%s5426_s3 + $0x64] sm:$0xf] %vm2816_vm2, %v3437_v7  ;;  %2942 = vst.msk [vmem:[%s5426_s3 + $0x1f4] sm:$0xf] %vm2816_vm2, %v3537_v9  ;;  %v1166_v15 = vadd.f32 %v4436_v37, %v1165_v12  ;;  %v3743_v16 = vpop.f32.mrb[30].mxu0  ;;  %v1566_v17 = vadd.f32 %v4436_v37, %v1565_v14  ;;  %v3843_v18 = vpop.f32.mrb[30].mxu1 }
 0x118   :  { %v1866_v19 = vmax.f32 %v1174_v11, 0.0  ;;  %v1177_v20 = vadd.f32 %v3743_v16, %v4436_v37  ;;  %v1168_v21 = vpop.f32.mrb[31].mxu0  ;;  %v1966_v22 = vmax.f32 %v1574_v13, 0.0  ;;  %v1577_v23 = vadd.f32 %v3843_v18, %v4436_v37  ;;  %v1568_v24 = vpop.f32.mrb[31].mxu1 }
 0x119   :  { %v1864_v25 = vmax.f32 %v1166_v15, 0.0  ;;  %v1169_v26 = vadd.f32 %v4436_v37, %v1168_v21  ;;  %v1964_v27 = vmax.f32 %v1566_v17, 0.0  ;;  %v1569_v28 = vadd.f32 %v4436_v37, %v1568_v24 }
 0x11a   :  { %v3442_v29 = vpack.c.bf16 %v1866_v19, %v1866_v19  ;;  %v1867_v30 = vmax.f32 %v1177_v20, 0.0  ;;  %v3542_v31 = vpack.c.bf16 %v1966_v22, %v1966_v22  ;;  %v1967_v32 = vmax.f32 %v1577_v23, 0.0 }
 0x11b   :  { %v3440_v33 = vpack.c.bf16 %v1864_v25, %v1864_v25  ;;  %v1865_v34 = vmax.f32 %v1169_v26, 0.0  ;;  %v3540_v35 = vpack.c.bf16 %v1964_v27, %v1964_v27  ;;  %v1965_v36 = vmax.f32 %v1569_v28, 0.0 }
 0x11c   :  { %2847 = vst.msk [vmem:[%s5426_s3 + $0x78] sm:$0xf] %vm2816_vm2, %v3442_v29  ;;  %v3443_v38 = vpack.c.bf16 %v1867_v30, %v1867_v30  ;;  %2947 = vst.msk [vmem:[%s5426_s3 + $0x208] sm:$0xf] %vm2816_vm2, %v3542_v31  ;;  %v3543_v39 = vpack.c.bf16 %v1967_v32, %v1967_v32 }
 0x11d   :  { %2845 = vst.msk [vmem:[%s5426_s3 + $0x70] sm:$0xf] %vm2816_vm2, %v3440_v33  ;;  %v3441_v40 = vpack.c.bf16 %v1865_v34, %v1865_v34  ;;  %2945 = vst.msk [vmem:[%s5426_s3 + $0x200] sm:$0xf] %vm2816_vm2, %v3540_v35  ;;  %v3746_v41 = vpop.f32.mrb[32].mxu0  ;;  %v3541_v42 = vpack.c.bf16 %v1965_v36, %v1965_v36  ;;  %v3846_v43 = vpop.f32.mrb[32].mxu1 }
 0x11e   :  { %2848 = vst.msk [vmem:[%s5426_s3 + $0x7c] sm:$0xf] %vm2816_vm2, %v3443_v38  ;;  %2948 = vst.msk [vmem:[%s5426_s3 + $0x20c] sm:$0xf] %vm2816_vm2, %v3543_v39  ;;  %v1190_v44 = vadd.f32 %v3746_v41, %v4436_v37  ;;  %v1181_v45 = vpop.f32.mrb[33].mxu0  ;;  %v1590_v46 = vadd.f32 %v3846_v43, %v4436_v37  ;;  %v1581_v47 = vpop.f32.mrb[33].mxu1 }
 0x11f   :  { %2846 = vst.msk [vmem:[%s5426_s3 + $0x74] sm:$0xf] %vm2816_vm2, %v3441_v40  ;;  %2946 = vst.msk [vmem:[%s5426_s3 + $0x204] sm:$0xf] %vm2816_vm2, %v3541_v42  ;;  %v1182_v48 = vadd.f32 %v4436_v37, %v1181_v45  ;;  %v3747_v49 = vpop.f32.mrb[34].mxu0  ;;  %v1582_v50 = vadd.f32 %v4436_v37, %v1581_v47  ;;  %v3847_v51 = vpop.f32.mrb[34].mxu1 }
 0x120   :  { %v1870_v52 = vmax.f32 %v1190_v44, 0.0  ;;  %v1193_v53 = vadd.f32 %v3747_v49, %v4436_v37  ;;  %v1184_v54 = vpop.f32.mrb[35].mxu0  ;;  %v1970_v55 = vmax.f32 %v1590_v46, 0.0  ;;  %v1593_v56 = vadd.f32 %v3847_v51, %v4436_v37  ;;  %v1584_v57 = vpop.f32.mrb[35].mxu1 }
 0x121   :  { %v1868_v58 = vmax.f32 %v1182_v48, 0.0  ;;  %v1185_v59 = vadd.f32 %v4436_v37, %v1184_v54  ;;  %v1968_v60 = vmax.f32 %v1582_v50, 0.0  ;;  %v1585_v61 = vadd.f32 %v4436_v37, %v1584_v57 }
 0x122   :  { %v3446_v62 = vpack.c.bf16 %v1870_v52, %v1870_v52  ;;  %v1871_v63 = vmax.f32 %v1193_v53, 0.0  ;;  %v3546_v0 = vpack.c.bf16 %v1970_v55, %v1970_v55  ;;  %v1971_v1 = vmax.f32 %v1593_v56, 0.0 }
 0x123   :  { %v3444_v2 = vpack.c.bf16 %v1868_v58, %v1868_v58  ;;  %v1869_v3 = vmax.f32 %v1185_v59, 0.0  ;;  %v3544_v4 = vpack.c.bf16 %v1968_v60, %v1968_v60  ;;  %v1969_v5 = vmax.f32 %v1585_v61, 0.0 }
 0x124   :  { %2851 = vst.msk [vmem:[%s5426_s3 + $0x88] sm:$0xf] %vm2816_vm2, %v3446_v62  ;;  %v3447_v6 = vpack.c.bf16 %v1871_v63, %v1871_v63  ;;  %2951 = vst.msk [vmem:[%s5426_s3 + $0x218] sm:$0xf] %vm2816_vm2, %v3546_v0  ;;  %v3547_v7 = vpack.c.bf16 %v1971_v1, %v1971_v1 }
 0x125   :  { %2849 = vst.msk [vmem:[%s5426_s3 + $0x80] sm:$0xf] %vm2816_vm2, %v3444_v2  ;;  %v3445_v8 = vpack.c.bf16 %v1869_v3, %v1869_v3  ;;  %2949 = vst.msk [vmem:[%s5426_s3 + $0x210] sm:$0xf] %vm2816_vm2, %v3544_v4  ;;  %v3750_v9 = vpop.f32.mrb[36].mxu0  ;;  %v3545_v10 = vpack.c.bf16 %v1969_v5, %v1969_v5  ;;  %v3850_v11 = vpop.f32.mrb[36].mxu1 }
 0x126   :  { %2852 = vst.msk [vmem:[%s5426_s3 + $0x8c] sm:$0xf] %vm2816_vm2, %v3447_v6  ;;  %2952 = vst.msk [vmem:[%s5426_s3 + $0x21c] sm:$0xf] %vm2816_vm2, %v3547_v7  ;;  %v1206_v12 = vadd.f32 %v3750_v9, %v4436_v37  ;;  %v1197_v13 = vpop.f32.mrb[37].mxu0  ;;  %v1606_v14 = vadd.f32 %v3850_v11, %v4436_v37  ;;  %v1597_v15 = vpop.f32.mrb[37].mxu1 }
 0x127   :  { %2850 = vst.msk [vmem:[%s5426_s3 + $0x84] sm:$0xf] %vm2816_vm2, %v3445_v8  ;;  %2950 = vst.msk [vmem:[%s5426_s3 + $0x214] sm:$0xf] %vm2816_vm2, %v3545_v10  ;;  %v1198_v16 = vadd.f32 %v4436_v37, %v1197_v13  ;;  %v3751_v17 = vpop.f32.mrb[38].mxu0  ;;  %v1598_v18 = vadd.f32 %v4436_v37, %v1597_v15  ;;  %v3851_v19 = vpop.f32.mrb[38].mxu1 }
 0x128   :  { %v1874_v20 = vmax.f32 %v1206_v12, 0.0  ;;  %v1209_v21 = vadd.f32 %v3751_v17, %v4436_v37  ;;  %v1200_v22 = vpop.f32.mrb[39].mxu0  ;;  %v1974_v23 = vmax.f32 %v1606_v14, 0.0  ;;  %v1609_v24 = vadd.f32 %v3851_v19, %v4436_v37  ;;  %v1600_v25 = vpop.f32.mrb[39].mxu1 }
 0x129   :  { %v1872_v26 = vmax.f32 %v1198_v16, 0.0  ;;  %v1201_v27 = vadd.f32 %v4436_v37, %v1200_v22  ;;  %v1972_v28 = vmax.f32 %v1598_v18, 0.0  ;;  %v1601_v29 = vadd.f32 %v4436_v37, %v1600_v25 }
 0x12a   :  { %v3450_v30 = vpack.c.bf16 %v1874_v20, %v1874_v20  ;;  %v1875_v31 = vmax.f32 %v1209_v21, 0.0  ;;  %v3550_v32 = vpack.c.bf16 %v1974_v23, %v1974_v23  ;;  %v1975_v33 = vmax.f32 %v1609_v24, 0.0 }
 0x12b   :  { %v3448_v34 = vpack.c.bf16 %v1872_v26, %v1872_v26  ;;  %v1873_v35 = vmax.f32 %v1201_v27, 0.0  ;;  %v3548_v36 = vpack.c.bf16 %v1972_v28, %v1972_v28  ;;  %v1973_v38 = vmax.f32 %v1601_v29, 0.0 }
 0x12c   :  { %2855 = vst.msk [vmem:[%s5426_s3 + $0x98] sm:$0xf] %vm2816_vm2, %v3450_v30  ;;  %v3451_v39 = vpack.c.bf16 %v1875_v31, %v1875_v31  ;;  %2955 = vst.msk [vmem:[%s5426_s3 + $0x228] sm:$0xf] %vm2816_vm2, %v3550_v32  ;;  %v3551_v40 = vpack.c.bf16 %v1975_v33, %v1975_v33 }
 0x12d   :  { %2853 = vst.msk [vmem:[%s5426_s3 + $0x90] sm:$0xf] %vm2816_vm2, %v3448_v34  ;;  %v3449_v41 = vpack.c.bf16 %v1873_v35, %v1873_v35  ;;  %2953 = vst.msk [vmem:[%s5426_s3 + $0x220] sm:$0xf] %vm2816_vm2, %v3548_v36  ;;  %v3754_v42 = vpop.f32.mrb[40].mxu0  ;;  %v3549_v43 = vpack.c.bf16 %v1973_v38, %v1973_v38  ;;  %v3854_v44 = vpop.f32.mrb[40].mxu1 }
 0x12e   :  { %2856 = vst.msk [vmem:[%s5426_s3 + $0x9c] sm:$0xf] %vm2816_vm2, %v3451_v39  ;;  %2956 = vst.msk [vmem:[%s5426_s3 + $0x22c] sm:$0xf] %vm2816_vm2, %v3551_v40  ;;  %v1222_v45 = vadd.f32 %v3754_v42, %v4436_v37  ;;  %v1213_v46 = vpop.f32.mrb[41].mxu0  ;;  %v1622_v47 = vadd.f32 %v3854_v44, %v4436_v37  ;;  %v1613_v48 = vpop.f32.mrb[41].mxu1 }
 0x12f   :  { %2854 = vst.msk [vmem:[%s5426_s3 + $0x94] sm:$0xf] %vm2816_vm2, %v3449_v41  ;;  %2954 = vst.msk [vmem:[%s5426_s3 + $0x224] sm:$0xf] %vm2816_vm2, %v3549_v43  ;;  %v1214_v49 = vadd.f32 %v4436_v37, %v1213_v46  ;;  %v3755_v50 = vpop.f32.mrb[42].mxu0  ;;  %v1614_v51 = vadd.f32 %v4436_v37, %v1613_v48  ;;  %v3855_v52 = vpop.f32.mrb[42].mxu1 }
 0x130   :  { %v1878_v53 = vmax.f32 %v1222_v45, 0.0  ;;  %v1225_v54 = vadd.f32 %v3755_v50, %v4436_v37  ;;  %v1216_v55 = vpop.f32.mrb[43].mxu0  ;;  %v1978_v56 = vmax.f32 %v1622_v47, 0.0  ;;  %v1625_v57 = vadd.f32 %v3855_v52, %v4436_v37  ;;  %v1616_v58 = vpop.f32.mrb[43].mxu1 }
 0x131   :  { %v1876_v59 = vmax.f32 %v1214_v49, 0.0  ;;  %v1217_v60 = vadd.f32 %v4436_v37, %v1216_v55  ;;  %v1976_v61 = vmax.f32 %v1614_v51, 0.0  ;;  %v1617_v62 = vadd.f32 %v4436_v37, %v1616_v58 }
 0x132   :  { %v3454_v63 = vpack.c.bf16 %v1878_v53, %v1878_v53  ;;  %v1879_v0 = vmax.f32 %v1225_v54, 0.0  ;;  %v3554_v1 = vpack.c.bf16 %v1978_v56, %v1978_v56  ;;  %v1979_v2 = vmax.f32 %v1625_v57, 0.0 }
 0x133   :  { %v3452_v3 = vpack.c.bf16 %v1876_v59, %v1876_v59  ;;  %v1877_v4 = vmax.f32 %v1217_v60, 0.0  ;;  %v3552_v5 = vpack.c.bf16 %v1976_v61, %v1976_v61  ;;  %v1977_v6 = vmax.f32 %v1617_v62, 0.0 }
 0x134   :  { %2859 = vst.msk [vmem:[%s5426_s3 + $0xa8] sm:$0xf] %vm2816_vm2, %v3454_v63  ;;  %v3455_v7 = vpack.c.bf16 %v1879_v0, %v1879_v0  ;;  %2959 = vst.msk [vmem:[%s5426_s3 + $0x238] sm:$0xf] %vm2816_vm2, %v3554_v1  ;;  %v3555_v8 = vpack.c.bf16 %v1979_v2, %v1979_v2 }
 0x135   :  { %2857 = vst.msk [vmem:[%s5426_s3 + $0xa0] sm:$0xf] %vm2816_vm2, %v3452_v3  ;;  %v3453_v9 = vpack.c.bf16 %v1877_v4, %v1877_v4  ;;  %2957 = vst.msk [vmem:[%s5426_s3 + $0x230] sm:$0xf] %vm2816_vm2, %v3552_v5  ;;  %v3758_v10 = vpop.f32.mrb[44].mxu0  ;;  %v3553_v11 = vpack.c.bf16 %v1977_v6, %v1977_v6  ;;  %v3858_v12 = vpop.f32.mrb[44].mxu1 }
 0x136   :  { %2860 = vst.msk [vmem:[%s5426_s3 + $0xac] sm:$0xf] %vm2816_vm2, %v3455_v7  ;;  %2960 = vst.msk [vmem:[%s5426_s3 + $0x23c] sm:$0xf] %vm2816_vm2, %v3555_v8  ;;  %v1238_v13 = vadd.f32 %v3758_v10, %v4436_v37  ;;  %v1229_v14 = vpop.f32.mrb[45].mxu0  ;;  %v1638_v15 = vadd.f32 %v3858_v12, %v4436_v37  ;;  %v1629_v16 = vpop.f32.mrb[45].mxu1 }
 0x137   :  { %2858 = vst.msk [vmem:[%s5426_s3 + $0xa4] sm:$0xf] %vm2816_vm2, %v3453_v9  ;;  %2958 = vst.msk [vmem:[%s5426_s3 + $0x234] sm:$0xf] %vm2816_vm2, %v3553_v11  ;;  %v1230_v17 = vadd.f32 %v4436_v37, %v1229_v14  ;;  %v3759_v18 = vpop.f32.mrb[46].mxu0  ;;  %v1630_v19 = vadd.f32 %v4436_v37, %v1629_v16  ;;  %v3859_v20 = vpop.f32.mrb[46].mxu1 }
 0x138   :  { %v1882_v21 = vmax.f32 %v1238_v13, 0.0  ;;  %v1241_v22 = vadd.f32 %v3759_v18, %v4436_v37  ;;  %v1232_v23 = vpop.f32.mrb[47].mxu0  ;;  %v1982_v24 = vmax.f32 %v1638_v15, 0.0  ;;  %v1641_v25 = vadd.f32 %v3859_v20, %v4436_v37  ;;  %v1632_v26 = vpop.f32.mrb[47].mxu1  ;;  %v4953_v13 = vld [vmem:[%s5425_s2] ss:$0 sm:$0xff] }
 0x139   :  { %v1880_v27 = vmax.f32 %v1230_v17, 0.0  ;;  %v1233_v28 = vadd.f32 %v4436_v37, %v1232_v23  ;;  %v1980_v29 = vmax.f32 %v1630_v19, 0.0  ;;  %v1633_v30 = vadd.f32 %v4436_v37, %v1632_v26 }
 0x13a   :  { %v3458_v31 = vpack.c.bf16 %v1882_v21, %v1882_v21  ;;  %v1883_v32 = vmax.f32 %v1241_v22, 0.0  ;;  %v3558_v33 = vpack.c.bf16 %v1982_v24, %v1982_v24  ;;  %v1983_v34 = vmax.f32 %v1641_v25, 0.0 }
 0x13b   :  { %v3456_v35 = vpack.c.bf16 %v1880_v27, %v1880_v27  ;;  %v1881_v36 = vmax.f32 %v1233_v28, 0.0  ;;  %v3556_v38 = vpack.c.bf16 %v1980_v29, %v1980_v29  ;;  %v1981_v39 = vmax.f32 %v1633_v30, 0.0 }
 0x13c   :  { %2863 = vst.msk [vmem:[%s5426_s3 + $0xb8] sm:$0xf] %vm2816_vm2, %v3458_v31  ;;  %v3459_v40 = vpack.c.bf16 %v1883_v32, %v1883_v32  ;;  %2963 = vst.msk [vmem:[%s5426_s3 + $0x248] sm:$0xf] %vm2816_vm2, %v3558_v33  ;;  %v3559_v41 = vpack.c.bf16 %v1983_v34, %v1983_v34 }
 0x13d   :  { %2861 = vst.msk [vmem:[%s5426_s3 + $0xb0] sm:$0xf] %vm2816_vm2, %v3456_v35  ;;  %v3457_v42 = vpack.c.bf16 %v1881_v36, %v1881_v36  ;;  %2961 = vst.msk [vmem:[%s5426_s3 + $0x240] sm:$0xf] %vm2816_vm2, %v3556_v38  ;;  %v3762_v43 = vpop.f32.mrb[48].mxu0  ;;  %v3557_v44 = vpack.c.bf16 %v1981_v39, %v1981_v39  ;;  %v3862_v45 = vpop.f32.mrb[48].mxu1 }
 0x13e   :  { %2864 = vst.msk [vmem:[%s5426_s3 + $0xbc] sm:$0xf] %vm2816_vm2, %v3459_v40  ;;  %2964 = vst.msk [vmem:[%s5426_s3 + $0x24c] sm:$0xf] %vm2816_vm2, %v3559_v41  ;;  %v1254_v46 = vadd.f32 %v3762_v43, %v4436_v37  ;;  %v1245_v47 = vpop.f32.mrb[49].mxu0  ;;  %v1654_v48 = vadd.f32 %v3862_v45, %v4436_v37  ;;  %v1645_v49 = vpop.f32.mrb[49].mxu1 }
 0x13f   :  { %2862 = vst.msk [vmem:[%s5426_s3 + $0xb4] sm:$0xf] %vm2816_vm2, %v3457_v42  ;;  %2962 = vst.msk [vmem:[%s5426_s3 + $0x244] sm:$0xf] %vm2816_vm2, %v3557_v44  ;;  %v1246_v50 = vadd.f32 %v4436_v37, %v1245_v47  ;;  %v3763_v51 = vpop.f32.mrb[50].mxu0  ;;  %v1646_v52 = vadd.f32 %v4436_v37, %v1645_v49  ;;  %v3863_v53 = vpop.f32.mrb[50].mxu1 }
 0x140   :  { %v1886_v54 = vmax.f32 %v1254_v46, 0.0  ;;  %v1257_v55 = vadd.f32 %v3763_v51, %v4436_v37  ;;  %v1248_v56 = vpop.f32.mrb[51].mxu0  ;;  %v1986_v57 = vmax.f32 %v1654_v48, 0.0  ;;  %v1657_v58 = vadd.f32 %v3863_v53, %v4436_v37  ;;  %v1648_v59 = vpop.f32.mrb[51].mxu1 }
 0x141   :  { %v1884_v60 = vmax.f32 %v1246_v50, 0.0  ;;  %v1249_v61 = vadd.f32 %v4436_v37, %v1248_v56  ;;  %v1984_v62 = vmax.f32 %v1646_v52, 0.0  ;;  %v1649_v63 = vadd.f32 %v4436_v37, %v1648_v59 }
 0x142   :  { %v3462_v0 = vpack.c.bf16 %v1886_v54, %v1886_v54  ;;  %v1887_v1 = vmax.f32 %v1257_v55, 0.0  ;;  %v3562_v2 = vpack.c.bf16 %v1986_v57, %v1986_v57  ;;  %v1987_v3 = vmax.f32 %v1657_v58, 0.0 }
 0x143   :  { %v3460_v4 = vpack.c.bf16 %v1884_v60, %v1884_v60  ;;  %v1885_v5 = vmax.f32 %v1249_v61, 0.0  ;;  %v3560_v6 = vpack.c.bf16 %v1984_v62, %v1984_v62  ;;  %v1985_v7 = vmax.f32 %v1649_v63, 0.0 }
 0x144   :  { %2867 = vst.msk [vmem:[%s5426_s3 + $0xc8] sm:$0xf] %vm2816_vm2, %v3462_v0  ;;  %v3463_v8 = vpack.c.bf16 %v1887_v1, %v1887_v1  ;;  %2967 = vst.msk [vmem:[%s5426_s3 + $0x258] sm:$0xf] %vm2816_vm2, %v3562_v2  ;;  %v3563_v37 = vpack.c.bf16 %v1987_v3, %v1987_v3 }
 0x145   :  { %2865 = vst.msk [vmem:[%s5426_s3 + $0xc0] sm:$0xf] %vm2816_vm2, %v3460_v4  ;;  %v3461_v9 = vpack.c.bf16 %v1885_v5, %v1885_v5  ;;  %2965 = vst.msk [vmem:[%s5426_s3 + $0x250] sm:$0xf] %vm2816_vm2, %v3560_v6  ;;  %v3766_v10 = vpop.f32.mrb[52].mxu0  ;;  %v3561_v11 = vpack.c.bf16 %v1985_v7, %v1985_v7  ;;  %v3866_v12 = vpop.f32.mrb[52].mxu1 }
 0x146   :  { %2868 = vst.msk [vmem:[%s5426_s3 + $0xcc] sm:$0xf] %vm2816_vm2, %v3463_v8  ;;  %2968 = vst.msk [vmem:[%s5426_s3 + $0x25c] sm:$0xf] %vm2816_vm2, %v3563_v37  ;;  %v1270_v14 = vadd.f32 %v4953_v13, %v3766_v10  ;;  %v1261_v15 = vpop.f32.mrb[53].mxu0  ;;  %v1670_v16 = vadd.f32 %v4953_v13, %v3866_v12  ;;  %v1661_v17 = vpop.f32.mrb[53].mxu1 }
 0x147   :  { %2866 = vst.msk [vmem:[%s5426_s3 + $0xc4] sm:$0xf] %vm2816_vm2, %v3461_v9  ;;  %2966 = vst.msk [vmem:[%s5426_s3 + $0x254] sm:$0xf] %vm2816_vm2, %v3561_v11  ;;  %v1262_v18 = vadd.f32 %v4953_v13, %v1261_v15  ;;  %v3767_v19 = vpop.f32.mrb[54].mxu0  ;;  %v1662_v20 = vadd.f32 %v4953_v13, %v1661_v17  ;;  %v3867_v21 = vpop.f32.mrb[54].mxu1 }
 0x148   :  { %v1890_v22 = vmax.f32 %v1270_v14, 0.0  ;;  %v1273_v23 = vadd.f32 %v4953_v13, %v3767_v19  ;;  %v1264_v24 = vpop.f32.mrb[55].mxu0  ;;  %v1990_v25 = vmax.f32 %v1670_v16, 0.0  ;;  %v1673_v26 = vadd.f32 %v4953_v13, %v3867_v21  ;;  %v1664_v27 = vpop.f32.mrb[55].mxu1 }
 0x149   :  { %v1888_v28 = vmax.f32 %v1262_v18, 0.0  ;;  %v1265_v29 = vadd.f32 %v4953_v13, %v1264_v24  ;;  %v1988_v30 = vmax.f32 %v1662_v20, 0.0  ;;  %v1665_v31 = vadd.f32 %v4953_v13, %v1664_v27 }
 0x14a   :  { %v3466_v32 = vpack.c.bf16 %v1890_v22, %v1890_v22  ;;  %v1891_v33 = vmax.f32 %v1273_v23, 0.0  ;;  %v3566_v34 = vpack.c.bf16 %v1990_v25, %v1990_v25  ;;  %v1991_v35 = vmax.f32 %v1673_v26, 0.0 }
 0x14b   :  { %v3464_v36 = vpack.c.bf16 %v1888_v28, %v1888_v28  ;;  %v1889_v38 = vmax.f32 %v1265_v29, 0.0  ;;  %v3564_v39 = vpack.c.bf16 %v1988_v30, %v1988_v30  ;;  %v1989_v40 = vmax.f32 %v1665_v31, 0.0 }
 0x14c   :  { %2871 = vst.msk [vmem:[%s5426_s3 + $0xd8] sm:$0xf] %vm2816_vm2, %v3466_v32  ;;  %v3467_v41 = vpack.c.bf16 %v1891_v33, %v1891_v33  ;;  %2971 = vst.msk [vmem:[%s5426_s3 + $0x268] sm:$0xf] %vm2816_vm2, %v3566_v34  ;;  %v3567_v42 = vpack.c.bf16 %v1991_v35, %v1991_v35 }
 0x14d   :  { %2869 = vst.msk [vmem:[%s5426_s3 + $0xd0] sm:$0xf] %vm2816_vm2, %v3464_v36  ;;  %v3465_v43 = vpack.c.bf16 %v1889_v38, %v1889_v38  ;;  %2969 = vst.msk [vmem:[%s5426_s3 + $0x260] sm:$0xf] %vm2816_vm2, %v3564_v39  ;;  %v3770_v44 = vpop.f32.mrb[56].mxu0  ;;  %v3565_v45 = vpack.c.bf16 %v1989_v40, %v1989_v40  ;;  %v3870_v46 = vpop.f32.mrb[56].mxu1 }
 0x14e   :  { %2872 = vst.msk [vmem:[%s5426_s3 + $0xdc] sm:$0xf] %vm2816_vm2, %v3467_v41  ;;  %2972 = vst.msk [vmem:[%s5426_s3 + $0x26c] sm:$0xf] %vm2816_vm2, %v3567_v42  ;;  %v1286_v47 = vadd.f32 %v4953_v13, %v3770_v44  ;;  %v1277_v48 = vpop.f32.mrb[57].mxu0  ;;  %v1686_v49 = vadd.f32 %v4953_v13, %v3870_v46  ;;  %v1677_v50 = vpop.f32.mrb[57].mxu1 }
 0x14f   :  { %2870 = vst.msk [vmem:[%s5426_s3 + $0xd4] sm:$0xf] %vm2816_vm2, %v3465_v43  ;;  %2970 = vst.msk [vmem:[%s5426_s3 + $0x264] sm:$0xf] %vm2816_vm2, %v3565_v45  ;;  %v1278_v51 = vadd.f32 %v4953_v13, %v1277_v48  ;;  %v3771_v52 = vpop.f32.mrb[58].mxu0  ;;  %v1678_v53 = vadd.f32 %v4953_v13, %v1677_v50  ;;  %v3871_v54 = vpop.f32.mrb[58].mxu1 }
 0x150   :  { %v1894_v55 = vmax.f32 %v1286_v47, 0.0  ;;  %v1289_v56 = vadd.f32 %v4953_v13, %v3771_v52  ;;  %v1280_v57 = vpop.f32.mrb[59].mxu0  ;;  %v1994_v58 = vmax.f32 %v1686_v49, 0.0  ;;  %v1689_v59 = vadd.f32 %v4953_v13, %v3871_v54  ;;  %v1680_v60 = vpop.f32.mrb[59].mxu1 }
 0x151   :  { %v1892_v61 = vmax.f32 %v1278_v51, 0.0  ;;  %v1281_v62 = vadd.f32 %v4953_v13, %v1280_v57  ;;  %v1992_v63 = vmax.f32 %v1678_v53, 0.0  ;;  %v1681_v0 = vadd.f32 %v4953_v13, %v1680_v60 }
 0x152   :  { %v3470_v1 = vpack.c.bf16 %v1894_v55, %v1894_v55  ;;  %v1895_v2 = vmax.f32 %v1289_v56, 0.0  ;;  %v3570_v3 = vpack.c.bf16 %v1994_v58, %v1994_v58  ;;  %v1995_v4 = vmax.f32 %v1689_v59, 0.0 }
 0x153   :  { %v3468_v5 = vpack.c.bf16 %v1892_v61, %v1892_v61  ;;  %v1893_v6 = vmax.f32 %v1281_v62, 0.0  ;;  %v3568_v7 = vpack.c.bf16 %v1992_v63, %v1992_v63  ;;  %v1993_v8 = vmax.f32 %v1681_v0, 0.0 }
 0x154   :  { %2875 = vst.msk [vmem:[%s5426_s3 + $0xe8] sm:$0xf] %vm2816_vm2, %v3470_v1  ;;  %v3471_v37 = vpack.c.bf16 %v1895_v2, %v1895_v2  ;;  %2975 = vst.msk [vmem:[%s5426_s3 + $0x278] sm:$0xf] %vm2816_vm2, %v3570_v3  ;;  %v3571_v9 = vpack.c.bf16 %v1995_v4, %v1995_v4 }
 0x155   :  { %2873 = vst.msk [vmem:[%s5426_s3 + $0xe0] sm:$0xf] %vm2816_vm2, %v3468_v5  ;;  %v3469_v10 = vpack.c.bf16 %v1893_v6, %v1893_v6  ;;  %2973 = vst.msk [vmem:[%s5426_s3 + $0x270] sm:$0xf] %vm2816_vm2, %v3568_v7  ;;  %v3774_v11 = vpop.f32.mrb[60].mxu0  ;;  %v3569_v12 = vpack.c.bf16 %v1993_v8, %v1993_v8  ;;  %v3874_v14 = vpop.f32.mrb[60].mxu1 }
 0x156   :  { %2876 = vst.msk [vmem:[%s5426_s3 + $0xec] sm:$0xf] %vm2816_vm2, %v3471_v37  ;;  %2976 = vst.msk [vmem:[%s5426_s3 + $0x27c] sm:$0xf] %vm2816_vm2, %v3571_v9  ;;  %v1302_v15 = vadd.f32 %v4953_v13, %v3774_v11  ;;  %v1293_v16 = vpop.f32.mrb[61].mxu0  ;;  %v1702_v17 = vadd.f32 %v4953_v13, %v3874_v14  ;;  %v1693_v18 = vpop.f32.mrb[61].mxu1 }
 0x157   :  { %2874 = vst.msk [vmem:[%s5426_s3 + $0xe4] sm:$0xf] %vm2816_vm2, %v3469_v10  ;;  %2974 = vst.msk [vmem:[%s5426_s3 + $0x274] sm:$0xf] %vm2816_vm2, %v3569_v12  ;;  %v1294_v19 = vadd.f32 %v4953_v13, %v1293_v16  ;;  %v3775_v20 = vpop.f32.mrb[62].mxu0  ;;  %v1694_v21 = vadd.f32 %v4953_v13, %v1693_v18  ;;  %v3875_v22 = vpop.f32.mrb[62].mxu1 }
 0x158   :  { %v1898_v23 = vmax.f32 %v1302_v15, 0.0  ;;  %v1305_v24 = vadd.f32 %v4953_v13, %v3775_v20  ;;  %v1296_v25 = vpop.f32.mrb[63].mxu0  ;;  %v1998_v26 = vmax.f32 %v1702_v17, 0.0  ;;  %v1705_v27 = vadd.f32 %v4953_v13, %v3875_v22  ;;  %v1696_v28 = vpop.f32.mrb[63].mxu1 }
 0x159   :  { %v1896_v29 = vmax.f32 %v1294_v19, 0.0  ;;  %v1297_v30 = vadd.f32 %v4953_v13, %v1296_v25  ;;  %v1996_v31 = vmax.f32 %v1694_v21, 0.0  ;;  %v1697_v32 = vadd.f32 %v4953_v13, %v1696_v28 }
 0x15a   :  { %v3474_v33 = vpack.c.bf16 %v1898_v23, %v1898_v23  ;;  %v1899_v34 = vmax.f32 %v1305_v24, 0.0  ;;  %v3574_v35 = vpack.c.bf16 %v1998_v26, %v1998_v26  ;;  %v1999_v36 = vmax.f32 %v1705_v27, 0.0 }
 0x15b   :  { %v3472_v38 = vpack.c.bf16 %v1896_v29, %v1896_v29  ;;  %v1897_v39 = vmax.f32 %v1297_v30, 0.0  ;;  %v3572_v40 = vpack.c.bf16 %v1996_v31, %v1996_v31  ;;  %v1997_v41 = vmax.f32 %v1697_v32, 0.0 }
 0x15c   :  { %2879 = vst.msk [vmem:[%s5426_s3 + $0xf8] sm:$0xf] %vm2816_vm2, %v3474_v33  ;;  %v3475_v42 = vpack.c.bf16 %v1899_v34, %v1899_v34  ;;  %2979 = vst.msk [vmem:[%s5426_s3 + $0x288] sm:$0xf] %vm2816_vm2, %v3574_v35  ;;  %v3575_v43 = vpack.c.bf16 %v1999_v36, %v1999_v36 }
 0x15d   :  { %2877 = vst.msk [vmem:[%s5426_s3 + $0xf0] sm:$0xf] %vm2816_vm2, %v3472_v38  ;;  %v3473_v44 = vpack.c.bf16 %v1897_v39, %v1897_v39  ;;  %2977 = vst.msk [vmem:[%s5426_s3 + $0x280] sm:$0xf] %vm2816_vm2, %v3572_v40  ;;  %v3778_v45 = vpop.f32.mrb[64].mxu0  ;;  %v3573_v46 = vpack.c.bf16 %v1997_v41, %v1997_v41  ;;  %v3878_v47 = vpop.f32.mrb[64].mxu1 }
 0x15e   :  { %2880 = vst.msk [vmem:[%s5426_s3 + $0xfc] sm:$0xf] %vm2816_vm2, %v3475_v42  ;;  %2980 = vst.msk [vmem:[%s5426_s3 + $0x28c] sm:$0xf] %vm2816_vm2, %v3575_v43  ;;  %v1318_v48 = vadd.f32 %v4953_v13, %v3778_v45  ;;  %v1309_v49 = vpop.f32.mrb[65].mxu0  ;;  %v1718_v50 = vadd.f32 %v4953_v13, %v3878_v47  ;;  %v1709_v51 = vpop.f32.mrb[65].mxu1 }
 0x15f   :  { %2878 = vst.msk [vmem:[%s5426_s3 + $0xf4] sm:$0xf] %vm2816_vm2, %v3473_v44  ;;  %2978 = vst.msk [vmem:[%s5426_s3 + $0x284] sm:$0xf] %vm2816_vm2, %v3573_v46  ;;  %v1310_v52 = vadd.f32 %v4953_v13, %v1309_v49  ;;  %v3779_v53 = vpop.f32.mrb[66].mxu0  ;;  %v1710_v54 = vadd.f32 %v4953_v13, %v1709_v51  ;;  %v3879_v55 = vpop.f32.mrb[66].mxu1 }
 0x160   :  { %v1902_v56 = vmax.f32 %v1318_v48, 0.0  ;;  %v1321_v57 = vadd.f32 %v4953_v13, %v3779_v53  ;;  %v1312_v58 = vpop.f32.mrb[67].mxu0  ;;  %v2002_v59 = vmax.f32 %v1718_v50, 0.0  ;;  %v1721_v60 = vadd.f32 %v4953_v13, %v3879_v55  ;;  %v1712_v61 = vpop.f32.mrb[67].mxu1 }
 0x161   :  { %v1900_v62 = vmax.f32 %v1310_v52, 0.0  ;;  %v1313_v63 = vadd.f32 %v4953_v13, %v1312_v58  ;;  %v2000_v0 = vmax.f32 %v1710_v54, 0.0  ;;  %v1713_v1 = vadd.f32 %v4953_v13, %v1712_v61 }
 0x162   :  { %v3478_v2 = vpack.c.bf16 %v1902_v56, %v1902_v56  ;;  %v1903_v3 = vmax.f32 %v1321_v57, 0.0  ;;  %v3578_v4 = vpack.c.bf16 %v2002_v59, %v2002_v59  ;;  %v2003_v5 = vmax.f32 %v1721_v60, 0.0 }
 0x163   :  { %v3476_v6 = vpack.c.bf16 %v1900_v62, %v1900_v62  ;;  %v1901_v7 = vmax.f32 %v1313_v63, 0.0  ;;  %v3576_v8 = vpack.c.bf16 %v2000_v0, %v2000_v0  ;;  %v2001_v37 = vmax.f32 %v1713_v1, 0.0 }
 0x164   :  { %2883 = vst.msk [vmem:[%s5426_s3 + $0x108] sm:$0xf] %vm2816_vm2, %v3478_v2  ;;  %v3479_v9 = vpack.c.bf16 %v1903_v3, %v1903_v3  ;;  %2983 = vst.msk [vmem:[%s5426_s3 + $0x298] sm:$0xf] %vm2816_vm2, %v3578_v4  ;;  %v3579_v10 = vpack.c.bf16 %v2003_v5, %v2003_v5 }
 0x165   :  { %2881 = vst.msk [vmem:[%s5426_s3 + $0x100] sm:$0xf] %vm2816_vm2, %v3476_v6  ;;  %v3477_v11 = vpack.c.bf16 %v1901_v7, %v1901_v7  ;;  %2981 = vst.msk [vmem:[%s5426_s3 + $0x290] sm:$0xf] %vm2816_vm2, %v3576_v8  ;;  %v3782_v12 = vpop.f32.mrb[68].mxu0  ;;  %v3577_v14 = vpack.c.bf16 %v2001_v37, %v2001_v37  ;;  %v3882_v15 = vpop.f32.mrb[68].mxu1 }
 0x166   :  { %2884 = vst.msk [vmem:[%s5426_s3 + $0x10c] sm:$0xf] %vm2816_vm2, %v3479_v9  ;;  %2984 = vst.msk [vmem:[%s5426_s3 + $0x29c] sm:$0xf] %vm2816_vm2, %v3579_v10  ;;  %v1334_v16 = vadd.f32 %v4953_v13, %v3782_v12  ;;  %v1325_v17 = vpop.f32.mrb[69].mxu0  ;;  %v1734_v18 = vadd.f32 %v4953_v13, %v3882_v15  ;;  %v1725_v19 = vpop.f32.mrb[69].mxu1 }
 0x167   :  { %2882 = vst.msk [vmem:[%s5426_s3 + $0x104] sm:$0xf] %vm2816_vm2, %v3477_v11  ;;  %2982 = vst.msk [vmem:[%s5426_s3 + $0x294] sm:$0xf] %vm2816_vm2, %v3577_v14  ;;  %v1326_v20 = vadd.f32 %v4953_v13, %v1325_v17  ;;  %v3783_v21 = vpop.f32.mrb[70].mxu0  ;;  %v1726_v22 = vadd.f32 %v4953_v13, %v1725_v19  ;;  %v3883_v23 = vpop.f32.mrb[70].mxu1 }
 0x168   :  { %v1906_v24 = vmax.f32 %v1334_v16, 0.0  ;;  %v1337_v25 = vadd.f32 %v4953_v13, %v3783_v21  ;;  %v1328_v26 = vpop.f32.mrb[71].mxu0  ;;  %v2006_v27 = vmax.f32 %v1734_v18, 0.0  ;;  %v1737_v28 = vadd.f32 %v4953_v13, %v3883_v23  ;;  %v1728_v29 = vpop.f32.mrb[71].mxu1 }
 0x169   :  { %v1904_v30 = vmax.f32 %v1326_v20, 0.0  ;;  %v1329_v31 = vadd.f32 %v4953_v13, %v1328_v26  ;;  %v2004_v32 = vmax.f32 %v1726_v22, 0.0  ;;  %v1729_v33 = vadd.f32 %v4953_v13, %v1728_v29 }
 0x16a   :  { %v3482_v34 = vpack.c.bf16 %v1906_v24, %v1906_v24  ;;  %v1907_v35 = vmax.f32 %v1337_v25, 0.0  ;;  %v3582_v36 = vpack.c.bf16 %v2006_v27, %v2006_v27  ;;  %v2007_v38 = vmax.f32 %v1737_v28, 0.0 }
 0x16b   :  { %v3480_v39 = vpack.c.bf16 %v1904_v30, %v1904_v30  ;;  %v1905_v40 = vmax.f32 %v1329_v31, 0.0  ;;  %v3580_v41 = vpack.c.bf16 %v2004_v32, %v2004_v32  ;;  %v2005_v42 = vmax.f32 %v1729_v33, 0.0 }
 0x16c   :  { %2887 = vst.msk [vmem:[%s5426_s3 + $0x118] sm:$0xf] %vm2816_vm2, %v3482_v34  ;;  %v3483_v43 = vpack.c.bf16 %v1907_v35, %v1907_v35  ;;  %2987 = vst.msk [vmem:[%s5426_s3 + $0x2a8] sm:$0xf] %vm2816_vm2, %v3582_v36  ;;  %v3583_v44 = vpack.c.bf16 %v2007_v38, %v2007_v38 }
 0x16d   :  { %2885 = vst.msk [vmem:[%s5426_s3 + $0x110] sm:$0xf] %vm2816_vm2, %v3480_v39  ;;  %v3481_v45 = vpack.c.bf16 %v1905_v40, %v1905_v40  ;;  %2985 = vst.msk [vmem:[%s5426_s3 + $0x2a0] sm:$0xf] %vm2816_vm2, %v3580_v41  ;;  %v3786_v46 = vpop.f32.mrb[72].mxu0  ;;  %v3581_v47 = vpack.c.bf16 %v2005_v42, %v2005_v42  ;;  %v3886_v48 = vpop.f32.mrb[72].mxu1 }
 0x16e   :  { %2888 = vst.msk [vmem:[%s5426_s3 + $0x11c] sm:$0xf] %vm2816_vm2, %v3483_v43  ;;  %2988 = vst.msk [vmem:[%s5426_s3 + $0x2ac] sm:$0xf] %vm2816_vm2, %v3583_v44  ;;  %v1350_v49 = vadd.f32 %v4953_v13, %v3786_v46  ;;  %v1341_v50 = vpop.f32.mrb[73].mxu0  ;;  %v1750_v51 = vadd.f32 %v4953_v13, %v3886_v48  ;;  %v1741_v52 = vpop.f32.mrb[73].mxu1 }
 0x16f   :  { %2886 = vst.msk [vmem:[%s5426_s3 + $0x114] sm:$0xf] %vm2816_vm2, %v3481_v45  ;;  %2986 = vst.msk [vmem:[%s5426_s3 + $0x2a4] sm:$0xf] %vm2816_vm2, %v3581_v47  ;;  %v1342_v53 = vadd.f32 %v4953_v13, %v1341_v50  ;;  %v3787_v54 = vpop.f32.mrb[74].mxu0  ;;  %v1742_v55 = vadd.f32 %v4953_v13, %v1741_v52  ;;  %v3887_v56 = vpop.f32.mrb[74].mxu1 }
 0x170   :  { %v1910_v57 = vmax.f32 %v1350_v49, 0.0  ;;  %v1353_v58 = vadd.f32 %v4953_v13, %v3787_v54  ;;  %v1344_v59 = vpop.f32.mrb[75].mxu0  ;;  %v2010_v60 = vmax.f32 %v1750_v51, 0.0  ;;  %v1753_v61 = vadd.f32 %v4953_v13, %v3887_v56  ;;  %v1744_v62 = vpop.f32.mrb[75].mxu1 }
 0x171   :  { %v1908_v63 = vmax.f32 %v1342_v53, 0.0  ;;  %v1345_v0 = vadd.f32 %v4953_v13, %v1344_v59  ;;  %v2008_v1 = vmax.f32 %v1742_v55, 0.0  ;;  %v1745_v2 = vadd.f32 %v4953_v13, %v1744_v62 }
 0x172   :  { %v3486_v3 = vpack.c.bf16 %v1910_v57, %v1910_v57  ;;  %v1911_v4 = vmax.f32 %v1353_v58, 0.0  ;;  %v3586_v5 = vpack.c.bf16 %v2010_v60, %v2010_v60  ;;  %v2011_v6 = vmax.f32 %v1753_v61, 0.0 }
 0x173   :  { %v3484_v7 = vpack.c.bf16 %v1908_v63, %v1908_v63  ;;  %v1909_v8 = vmax.f32 %v1345_v0, 0.0  ;;  %v3584_v37 = vpack.c.bf16 %v2008_v1, %v2008_v1  ;;  %v2009_v9 = vmax.f32 %v1745_v2, 0.0 }
 0x174   :  { %2891 = vst.msk [vmem:[%s5426_s3 + $0x128] sm:$0xf] %vm2816_vm2, %v3486_v3  ;;  %v3487_v10 = vpack.c.bf16 %v1911_v4, %v1911_v4  ;;  %2991 = vst.msk [vmem:[%s5426_s3 + $0x2b8] sm:$0xf] %vm2816_vm2, %v3586_v5  ;;  %v3587_v11 = vpack.c.bf16 %v2011_v6, %v2011_v6 }
 0x175   :  { %2889 = vst.msk [vmem:[%s5426_s3 + $0x120] sm:$0xf] %vm2816_vm2, %v3484_v7  ;;  %v3485_v12 = vpack.c.bf16 %v1909_v8, %v1909_v8  ;;  %2989 = vst.msk [vmem:[%s5426_s3 + $0x2b0] sm:$0xf] %vm2816_vm2, %v3584_v37  ;;  %v3790_v14 = vpop.f32.mrb[76].mxu0  ;;  %v3585_v15 = vpack.c.bf16 %v2009_v9, %v2009_v9  ;;  %v3890_v16 = vpop.f32.mrb[76].mxu1 }
 0x176   :  { %2892 = vst.msk [vmem:[%s5426_s3 + $0x12c] sm:$0xf] %vm2816_vm2, %v3487_v10  ;;  %2992 = vst.msk [vmem:[%s5426_s3 + $0x2bc] sm:$0xf] %vm2816_vm2, %v3587_v11  ;;  %v1366_v17 = vadd.f32 %v4953_v13, %v3790_v14  ;;  %v1357_v18 = vpop.f32.mrb[77].mxu0  ;;  %v1766_v19 = vadd.f32 %v4953_v13, %v3890_v16  ;;  %v1757_v20 = vpop.f32.mrb[77].mxu1 }
 0x177   :  { %2890 = vst.msk [vmem:[%s5426_s3 + $0x124] sm:$0xf] %vm2816_vm2, %v3485_v12  ;;  %2990 = vst.msk [vmem:[%s5426_s3 + $0x2b4] sm:$0xf] %vm2816_vm2, %v3585_v15  ;;  %v1358_v21 = vadd.f32 %v4953_v13, %v1357_v18  ;;  %v3791_v22 = vpop.f32.mrb[78].mxu0  ;;  %v1758_v23 = vadd.f32 %v4953_v13, %v1757_v20  ;;  %v3891_v24 = vpop.f32.mrb[78].mxu1 }
 0x178   :  { %v1914_v25 = vmax.f32 %v1366_v17, 0.0  ;;  %v1369_v26 = vadd.f32 %v4953_v13, %v3791_v22  ;;  %v1360_v27 = vpop.f32.mrb[79].mxu0  ;;  %v2014_v28 = vmax.f32 %v1766_v19, 0.0  ;;  %v1769_v29 = vadd.f32 %v4953_v13, %v3891_v24  ;;  %v1760_v30 = vpop.f32.mrb[79].mxu1 }
 0x179   :  { %v1912_v31 = vmax.f32 %v1358_v21, 0.0  ;;  %v1361_v32 = vadd.f32 %v4953_v13, %v1360_v27  ;;  %v2012_v33 = vmax.f32 %v1758_v23, 0.0  ;;  %v1761_v34 = vadd.f32 %v4953_v13, %v1760_v30 }
 0x17a   :  { %v3490_v35 = vpack.c.bf16 %v1914_v25, %v1914_v25  ;;  %v1915_v36 = vmax.f32 %v1369_v26, 0.0  ;;  %v3590_v38 = vpack.c.bf16 %v2014_v28, %v2014_v28  ;;  %v2015_v39 = vmax.f32 %v1769_v29, 0.0 }
 0x17b   :  { %v3488_v40 = vpack.c.bf16 %v1912_v31, %v1912_v31  ;;  %v1913_v41 = vmax.f32 %v1361_v32, 0.0  ;;  %v3588_v42 = vpack.c.bf16 %v2012_v33, %v2012_v33  ;;  %v2013_v43 = vmax.f32 %v1761_v34, 0.0 }
 0x17c   :  { %2895 = vst.msk [vmem:[%s5426_s3 + $0x138] sm:$0xf] %vm2816_vm2, %v3490_v35  ;;  %v3491_v44 = vpack.c.bf16 %v1915_v36, %v1915_v36  ;;  %2995 = vst.msk [vmem:[%s5426_s3 + $0x2c8] sm:$0xf] %vm2816_vm2, %v3590_v38  ;;  %v3591_v45 = vpack.c.bf16 %v2015_v39, %v2015_v39 }
 0x17d   :  { %2893 = vst.msk [vmem:[%s5426_s3 + $0x130] sm:$0xf] %vm2816_vm2, %v3488_v40  ;;  %v3489_v46 = vpack.c.bf16 %v1913_v41, %v1913_v41  ;;  %2993 = vst.msk [vmem:[%s5426_s3 + $0x2c0] sm:$0xf] %vm2816_vm2, %v3588_v42  ;;  %v3794_v47 = vpop.f32.mrb[80].mxu0  ;;  %v3589_v48 = vpack.c.bf16 %v2013_v43, %v2013_v43  ;;  %v3894_v49 = vpop.f32.mrb[80].mxu1 }
 0x17e   :  { %2896 = vst.msk [vmem:[%s5426_s3 + $0x13c] sm:$0xf] %vm2816_vm2, %v3491_v44  ;;  %2996 = vst.msk [vmem:[%s5426_s3 + $0x2cc] sm:$0xf] %vm2816_vm2, %v3591_v45  ;;  %v1382_v50 = vadd.f32 %v4953_v13, %v3794_v47  ;;  %v1373_v51 = vpop.f32.mrb[81].mxu0  ;;  %v1782_v52 = vadd.f32 %v4953_v13, %v3894_v49  ;;  %v1773_v53 = vpop.f32.mrb[81].mxu1 }
 0x17f   :  { %2894 = vst.msk [vmem:[%s5426_s3 + $0x134] sm:$0xf] %vm2816_vm2, %v3489_v46  ;;  %2994 = vst.msk [vmem:[%s5426_s3 + $0x2c4] sm:$0xf] %vm2816_vm2, %v3589_v48  ;;  %v1374_v54 = vadd.f32 %v4953_v13, %v1373_v51  ;;  %v3795_v55 = vpop.f32.mrb[82].mxu0  ;;  %v1774_v56 = vadd.f32 %v4953_v13, %v1773_v53  ;;  %v3895_v57 = vpop.f32.mrb[82].mxu1 }
 0x180   :  { %v1918_v58 = vmax.f32 %v1382_v50, 0.0  ;;  %v1385_v59 = vadd.f32 %v4953_v13, %v3795_v55  ;;  %v1376_v60 = vpop.f32.mrb[83].mxu0  ;;  %v2018_v61 = vmax.f32 %v1782_v52, 0.0  ;;  %v1785_v62 = vadd.f32 %v4953_v13, %v3895_v57  ;;  %v1776_v63 = vpop.f32.mrb[83].mxu1 }
 0x181   :  { %v1916_v0 = vmax.f32 %v1374_v54, 0.0  ;;  %v1377_v1 = vadd.f32 %v4953_v13, %v1376_v60  ;;  %v2016_v2 = vmax.f32 %v1774_v56, 0.0  ;;  %v1777_v3 = vadd.f32 %v4953_v13, %v1776_v63 }
 0x182   :  { %v3494_v4 = vpack.c.bf16 %v1918_v58, %v1918_v58  ;;  %v1919_v5 = vmax.f32 %v1385_v59, 0.0  ;;  %v3594_v6 = vpack.c.bf16 %v2018_v61, %v2018_v61  ;;  %v2019_v7 = vmax.f32 %v1785_v62, 0.0 }
 0x183   :  { %v3492_v8 = vpack.c.bf16 %v1916_v0, %v1916_v0  ;;  %v1917_v37 = vmax.f32 %v1377_v1, 0.0  ;;  %v3592_v9 = vpack.c.bf16 %v2016_v2, %v2016_v2  ;;  %v2017_v10 = vmax.f32 %v1777_v3, 0.0 }
 0x184   :  { %2899 = vst.msk [vmem:[%s5426_s3 + $0x148] sm:$0xf] %vm2816_vm2, %v3494_v4  ;;  %v3495_v11 = vpack.c.bf16 %v1919_v5, %v1919_v5  ;;  %2999 = vst.msk [vmem:[%s5426_s3 + $0x2d8] sm:$0xf] %vm2816_vm2, %v3594_v6  ;;  %v3595_v12 = vpack.c.bf16 %v2019_v7, %v2019_v7 }
 0x185   :  { %2897 = vst.msk [vmem:[%s5426_s3 + $0x140] sm:$0xf] %vm2816_vm2, %v3492_v8  ;;  %v3493_v14 = vpack.c.bf16 %v1917_v37, %v1917_v37  ;;  %2997 = vst.msk [vmem:[%s5426_s3 + $0x2d0] sm:$0xf] %vm2816_vm2, %v3592_v9  ;;  %v3798_v15 = vpop.f32.mrb[84].mxu0  ;;  %v3593_v16 = vpack.c.bf16 %v2017_v10, %v2017_v10  ;;  %v3898_v17 = vpop.f32.mrb[84].mxu1 }
 0x186   :  { %2900 = vst.msk [vmem:[%s5426_s3 + $0x14c] sm:$0xf] %vm2816_vm2, %v3495_v11  ;;  %3000 = vst.msk [vmem:[%s5426_s3 + $0x2dc] sm:$0xf] %vm2816_vm2, %v3595_v12  ;;  %v1398_v18 = vadd.f32 %v4953_v13, %v3798_v15  ;;  %v1389_v19 = vpop.f32.mrb[85].mxu0  ;;  %v1798_v20 = vadd.f32 %v4953_v13, %v3898_v17  ;;  %v1789_v21 = vpop.f32.mrb[85].mxu1 }
 0x187   :  { %2898 = vst.msk [vmem:[%s5426_s3 + $0x144] sm:$0xf] %vm2816_vm2, %v3493_v14  ;;  %2998 = vst.msk [vmem:[%s5426_s3 + $0x2d4] sm:$0xf] %vm2816_vm2, %v3593_v16  ;;  %v1390_v22 = vadd.f32 %v4953_v13, %v1389_v19  ;;  %v3799_v23 = vpop.f32.mrb[86].mxu0  ;;  %v1790_v24 = vadd.f32 %v4953_v13, %v1789_v21  ;;  %v3899_v25 = vpop.f32.mrb[86].mxu1 }
 0x188   :  { %v1922_v26 = vmax.f32 %v1398_v18, 0.0  ;;  %v1401_v27 = vadd.f32 %v4953_v13, %v3799_v23  ;;  %v1392_v28 = vpop.f32.mrb[87].mxu0  ;;  %v2022_v29 = vmax.f32 %v1798_v20, 0.0  ;;  %v1801_v30 = vadd.f32 %v4953_v13, %v3899_v25  ;;  %v1792_v31 = vpop.f32.mrb[87].mxu1 }
 0x189   :  { %v1920_v32 = vmax.f32 %v1390_v22, 0.0  ;;  %v1393_v33 = vadd.f32 %v4953_v13, %v1392_v28  ;;  %v2020_v34 = vmax.f32 %v1790_v24, 0.0  ;;  %v1793_v35 = vadd.f32 %v4953_v13, %v1792_v31 }
 0x18a   :  { %v3498_v36 = vpack.c.bf16 %v1922_v26, %v1922_v26  ;;  %v1923_v38 = vmax.f32 %v1401_v27, 0.0  ;;  %v3598_v39 = vpack.c.bf16 %v2022_v29, %v2022_v29  ;;  %v2023_v40 = vmax.f32 %v1801_v30, 0.0 }
 0x18b   :  { %v3496_v41 = vpack.c.bf16 %v1920_v32, %v1920_v32  ;;  %v1921_v42 = vmax.f32 %v1393_v33, 0.0  ;;  %v3596_v43 = vpack.c.bf16 %v2020_v34, %v2020_v34  ;;  %v2021_v44 = vmax.f32 %v1793_v35, 0.0 }
 0x18c   :  { %2903 = vst.msk [vmem:[%s5426_s3 + $0x158] sm:$0xf] %vm2816_vm2, %v3498_v36  ;;  %v3499_v45 = vpack.c.bf16 %v1923_v38, %v1923_v38  ;;  %3003 = vst.msk [vmem:[%s5426_s3 + $0x2e8] sm:$0xf] %vm2816_vm2, %v3598_v39  ;;  %v3599_v46 = vpack.c.bf16 %v2023_v40, %v2023_v40 }
 0x18d   :  { %2901 = vst.msk [vmem:[%s5426_s3 + $0x150] sm:$0xf] %vm2816_vm2, %v3496_v41  ;;  %v3497_v47 = vpack.c.bf16 %v1921_v42, %v1921_v42  ;;  %3001 = vst.msk [vmem:[%s5426_s3 + $0x2e0] sm:$0xf] %vm2816_vm2, %v3596_v43  ;;  %v3802_v48 = vpop.f32.mrb[88].mxu0  ;;  %v3597_v49 = vpack.c.bf16 %v2021_v44, %v2021_v44  ;;  %v3902_v50 = vpop.f32.mrb[88].mxu1 }
 0x18e   :  { %2904 = vst.msk [vmem:[%s5426_s3 + $0x15c] sm:$0xf] %vm2816_vm2, %v3499_v45  ;;  %3004 = vst.msk [vmem:[%s5426_s3 + $0x2ec] sm:$0xf] %vm2816_vm2, %v3599_v46  ;;  %v1414_v51 = vadd.f32 %v4953_v13, %v3802_v48  ;;  %v1405_v52 = vpop.f32.mrb[89].mxu0  ;;  %v1814_v53 = vadd.f32 %v4953_v13, %v3902_v50  ;;  %v1805_v54 = vpop.f32.mrb[89].mxu1 }
 0x18f   :  { %2902 = vst.msk [vmem:[%s5426_s3 + $0x154] sm:$0xf] %vm2816_vm2, %v3497_v47  ;;  %3002 = vst.msk [vmem:[%s5426_s3 + $0x2e4] sm:$0xf] %vm2816_vm2, %v3597_v49  ;;  %v1406_v55 = vadd.f32 %v4953_v13, %v1405_v52  ;;  %v3803_v56 = vpop.f32.mrb[90].mxu0  ;;  %v1806_v57 = vadd.f32 %v4953_v13, %v1805_v54  ;;  %v3903_v58 = vpop.f32.mrb[90].mxu1 }
 0x190   :  { %v1926_v59 = vmax.f32 %v1414_v51, 0.0  ;;  %v1417_v60 = vadd.f32 %v4953_v13, %v3803_v56  ;;  %v1408_v61 = vpop.f32.mrb[91].mxu0  ;;  %v2026_v62 = vmax.f32 %v1814_v53, 0.0  ;;  %v1817_v63 = vadd.f32 %v4953_v13, %v3903_v58  ;;  %v1808_v0 = vpop.f32.mrb[91].mxu1 }
 0x191   :  { %v1924_v1 = vmax.f32 %v1406_v55, 0.0  ;;  %v1409_v2 = vadd.f32 %v4953_v13, %v1408_v61  ;;  %v2024_v3 = vmax.f32 %v1806_v57, 0.0  ;;  %v1809_v4 = vadd.f32 %v4953_v13, %v1808_v0 }
 0x192   :  { %v3502_v5 = vpack.c.bf16 %v1926_v59, %v1926_v59  ;;  %v1927_v6 = vmax.f32 %v1417_v60, 0.0  ;;  %v3602_v7 = vpack.c.bf16 %v2026_v62, %v2026_v62  ;;  %v2027_v8 = vmax.f32 %v1817_v63, 0.0 }
 0x193   :  { %v3500_v37 = vpack.c.bf16 %v1924_v1, %v1924_v1  ;;  %v1925_v9 = vmax.f32 %v1409_v2, 0.0  ;;  %v3600_v10 = vpack.c.bf16 %v2024_v3, %v2024_v3  ;;  %v2025_v11 = vmax.f32 %v1809_v4, 0.0 }
 0x194   :  { %2907 = vst.msk [vmem:[%s5426_s3 + $0x168] sm:$0xf] %vm2816_vm2, %v3502_v5  ;;  %v3503_v12 = vpack.c.bf16 %v1927_v6, %v1927_v6  ;;  %3007 = vst.msk [vmem:[%s5426_s3 + $0x2f8] sm:$0xf] %vm2816_vm2, %v3602_v7  ;;  %v3603_v14 = vpack.c.bf16 %v2027_v8, %v2027_v8 }
 0x195   :  { %2905 = vst.msk [vmem:[%s5426_s3 + $0x160] sm:$0xf] %vm2816_vm2, %v3500_v37  ;;  %v3501_v15 = vpack.c.bf16 %v1925_v9, %v1925_v9  ;;  %3005 = vst.msk [vmem:[%s5426_s3 + $0x2f0] sm:$0xf] %vm2816_vm2, %v3600_v10  ;;  %v3806_v16 = vpop.f32.mrb[92].mxu0  ;;  %v3601_v17 = vpack.c.bf16 %v2025_v11, %v2025_v11  ;;  %v3906_v18 = vpop.f32.mrb[92].mxu1 }
 0x196   :  { %2908 = vst.msk [vmem:[%s5426_s3 + $0x16c] sm:$0xf] %vm2816_vm2, %v3503_v12  ;;  %3008 = vst.msk [vmem:[%s5426_s3 + $0x2fc] sm:$0xf] %vm2816_vm2, %v3603_v14  ;;  %v1430_v19 = vadd.f32 %v4953_v13, %v3806_v16  ;;  %v1421_v20 = vpop.f32.mrb[93].mxu0  ;;  %v1830_v21 = vadd.f32 %v4953_v13, %v3906_v18  ;;  %v1821_v22 = vpop.f32.mrb[93].mxu1 }
 0x197   :  { %2906 = vst.msk [vmem:[%s5426_s3 + $0x164] sm:$0xf] %vm2816_vm2, %v3501_v15  ;;  %3006 = vst.msk [vmem:[%s5426_s3 + $0x2f4] sm:$0xf] %vm2816_vm2, %v3601_v17  ;;  %v1422_v23 = vadd.f32 %v4953_v13, %v1421_v20  ;;  %v3807_v24 = vpop.f32.mrb[94].mxu0  ;;  %v1822_v25 = vadd.f32 %v4953_v13, %v1821_v22  ;;  %v3907_v26 = vpop.f32.mrb[94].mxu1 }
 0x198   :  { %v1930_v27 = vmax.f32 %v1430_v19, 0.0  ;;  %v1433_v28 = vadd.f32 %v4953_v13, %v3807_v24  ;;  %v1424_v29 = vpop.f32.mrb[95].mxu0  ;;  %v2030_v30 = vmax.f32 %v1830_v21, 0.0  ;;  %v1833_v31 = vadd.f32 %v4953_v13, %v3907_v26  ;;  %v1824_v32 = vpop.f32.mrb[95].mxu1 }
 0x199   :  { %v1928_v33 = vmax.f32 %v1422_v23, 0.0  ;;  %v1425_v34 = vadd.f32 %v4953_v13, %v1424_v29  ;;  %v2028_v35 = vmax.f32 %v1822_v25, 0.0  ;;  %v1825_v36 = vadd.f32 %v4953_v13, %v1824_v32 }
 0x19a   :  { %v3506_v38 = vpack.c.bf16 %v1930_v27, %v1930_v27  ;;  %v1931_v39 = vmax.f32 %v1433_v28, 0.0  ;;  %v3606_v40 = vpack.c.bf16 %v2030_v30, %v2030_v30  ;;  %v2031_v41 = vmax.f32 %v1833_v31, 0.0 }
 0x19b   :  { %v3504_v42 = vpack.c.bf16 %v1928_v33, %v1928_v33  ;;  %v1929_v43 = vmax.f32 %v1425_v34, 0.0  ;;  %v3604_v44 = vpack.c.bf16 %v2028_v35, %v2028_v35  ;;  %v2029_v45 = vmax.f32 %v1825_v36, 0.0 }
 0x19c   :  { %2911 = vst.msk [vmem:[%s5426_s3 + $0x178] sm:$0xf] %vm2816_vm2, %v3506_v38  ;;  %v3507_v46 = vpack.c.bf16 %v1931_v39, %v1931_v39  ;;  %3011 = vst.msk [vmem:[%s5426_s3 + $0x308] sm:$0xf] %vm2816_vm2, %v3606_v40  ;;  %v3607_v47 = vpack.c.bf16 %v2031_v41, %v2031_v41 }
 0x19d   :  { %2909 = vst.msk [vmem:[%s5426_s3 + $0x170] sm:$0xf] %vm2816_vm2, %v3504_v42  ;;  %v3505_v48 = vpack.c.bf16 %v1929_v43, %v1929_v43  ;;  %3009 = vst.msk [vmem:[%s5426_s3 + $0x300] sm:$0xf] %vm2816_vm2, %v3604_v44  ;;  %v3810_v49 = vpop.f32.mrb[96].mxu0  ;;  %v3605_v50 = vpack.c.bf16 %v2029_v45, %v2029_v45 }
 0x19e   :  { %2912 = vst.msk [vmem:[%s5426_s3 + $0x17c] sm:$0xf] %vm2816_vm2, %v3507_v46  ;;  %3012 = vst.msk [vmem:[%s5426_s3 + $0x30c] sm:$0xf] %vm2816_vm2, %v3607_v47  ;;  %v1446_v51 = vadd.f32 %v4953_v13, %v3810_v49  ;;  %v1437_v52 = vpop.f32.mrb[97].mxu0 }
 0x19f   :  { %2910 = vst.msk [vmem:[%s5426_s3 + $0x174] sm:$0xf] %vm2816_vm2, %v3505_v48  ;;  %3010 = vst.msk [vmem:[%s5426_s3 + $0x304] sm:$0xf] %vm2816_vm2, %v3605_v50  ;;  %v1438_v53 = vadd.f32 %v4953_v13, %v1437_v52  ;;  %v3811_v54 = vpop.f32.mrb[98].mxu0 }
 0x1a0   :  { %v1934_v55 = vmax.f32 %v1446_v51, 0.0  ;;  %v1449_v56 = vadd.f32 %v4953_v13, %v3811_v54  ;;  %v1440_v57 = vpop.f32.mrb[99].mxu0 }
 0x1a1   :  { %v1932_v58 = vmax.f32 %v1438_v53, 0.0  ;;  %v1441_v59 = vadd.f32 %v4953_v13, %v1440_v57 }
 0x1a2   :  { %v3510_v60 = vpack.c.bf16 %v1934_v55, %v1934_v55  ;;  %v1935_v61 = vmax.f32 %v1449_v56, 0.0 }
 0x1a3   :  { %v3508_v62 = vpack.c.bf16 %v1932_v58, %v1932_v58  ;;  %v1933_v63 = vmax.f32 %v1441_v59, 0.0 }
 0x1a4   :  { %2915 = vst.msk [vmem:[%s5426_s3 + $0x188] sm:$0xf] %vm2816_vm2, %v3510_v60  ;;  %v3511_v0 = vpack.c.bf16 %v1935_v61, %v1935_v61 }
 0x1a5   :  { %2913 = vst.msk [vmem:[%s5426_s3 + $0x180] sm:$0xf] %vm2816_vm2, %v3508_v62  ;;  %v3509_v1 = vpack.c.bf16 %v1933_v63, %v1933_v63 }
 0x1a6   :  { %2916 = vst.msk [vmem:[%s5426_s3 + $0x18c] sm:$0xf] %vm2816_vm2, %v3511_v0 }
 0x1a7   :  { %2914 = vst.msk [vmem:[%s5426_s3 + $0x184] sm:$0xf] %vm2816_vm2, %v3509_v1 }

// kernel: cnn_encoder_forward.4
= control target key start
LH: loop header
LB: loop body
LE: loop exit
PB: predicated region body
PF: predicated region fallthrough
CT: control target
= control target key end

     0   :  { %v2040_v0 = vmov 0   ;;  %v2041_v2 = vmov 0.0   ;;  %vm2042_vm0 = vmmov 0   ;;  %vm634_vm1 = vcmask 261120   ;;  %s2814_s1 = inlined_call_operand.vmem [shape: bf16[288,64], index: 1, kind: input, shape index: {}]   ;;  %s2815_s0 = inlined_call_operand.vmem [shape: bf16[392,288], index: 0, kind: input, shape index: {}]   ;;  %s2816_s2 = inlined_call_operand.vmem [shape: f32[1,64], index: 2, kind: input, shape index: {}]   ;;  %s2817_s3 = inlined_call_operand.vmem [shape: bf16[392,64], index: 3, kind: output, shape index: {}]  }
   0x1   :  { %710 = vmatprep.subr.bf16.mxu1 %v2040_v0  ;;  %v1923_v1 = vld [vmem:[%s2814_s1] sm:$0xff]   ;;  %1718 = vmatprep.subr.bf16.mxu0 %v2041_v2  ;;  %v1924_v3 = vld [vmem:[%s2814_s1 + $0x8] sm:$0xff]   ;;  %v1925_v4 = vld [vmem:[%s2814_s1 + $0x10] sm:$0xff]   ;;  %vm1420_vm2 = vcmask 519168  }
   0x2   :  { %1722 = vmatprep.mubr.msk.bf16.mxu0 %vm2042_vm0, %v2041_v2  ;;  %711 = vmatpush1.bf16.msra.mxu1 %v1923_v1  ;;  %v1926_v5 = vld [vmem:[%s2814_s1 + $0x18] sm:$0xff]   ;;  %v1927_v6 = vld [vmem:[%s2814_s1 + $0x20] sm:$0xff]   ;;  %v1939_v8 = vld [vmem:[%s2814_s1 + $0x88] sm:$0xff]  }
   0x3   :  { %712 = vmatprep.subr.bf16.mxu1 %v2040_v0  ;;  %v1937_v7 = vld [vmem:[%s2814_s1 + $0x80] sm:$0xff]   ;;  %v1928_v9 = vld [vmem:[%s2814_s1 + $0x28] sm:$0xff]   ;;  %v1929_v12 = vld [vmem:[%s2814_s1 + $0x30] sm:$0xff]  }
   0x4   :  { %1719 = vmatpush3.bf16.msra.mxu0 %v1937_v7  ;;  %v1943_v10 = vld [vmem:[%s2815_s0 + $0x4] ss:$12 sps:$4 sm:$0xff]   ;;  %v1944_v11 = vld [vmem:[%s2815_s0 + $0x8] ss:$12 sps:$4 sm:$0xff]   ;;  %v1930_v13 = vld [vmem:[%s2814_s1 + $0x38] sm:$0xff]  }
   0x5   :  { %1720 = vmatprep.subr.bf16.mxu0 %v2041_v2  ;;  %742 = vmatprep.mubr.bf16.mxu1 %v1943_v10  ;;  %v1947_v14 = vld [vmem:[%s2815_s0 + $0x20] ss:$12 sps:$4 sm:$0xff]   ;;  %v1951_v17 = vld [vmem:[%s2815_s0 + $0x38] ss:$12 sps:$4 sm:$0xff]   ;;  %v1933_v18 = vld [vmem:[%s2814_s1 + $0x50] sm:$0xff]  }
   0x6   :  { %713 = vmatpush1.bf16.msra.mxu1 %v1924_v3  ;;  %v1931_v15 = vld [vmem:[%s2814_s1 + $0x40] sm:$0xff]   ;;  %v1932_v16 = vld [vmem:[%s2814_s1 + $0x48] sm:$0xff]   ;;  %v1934_v19 = vld [vmem:[%s2814_s1 + $0x58] sm:$0xff]  }
   0x7   :  { %714 = vmatprep.subr.bf16.mxu1 %v2040_v0  ;;  %v1955_v20 = vld [vmem:[%s2815_s0 + $0x50] ss:$12 sps:$4 sm:$0xff]   ;;  %v1935_v21 = vld [vmem:[%s2814_s1 + $0x60] sm:$0xff]   ;;  %v1936_v22 = vld [vmem:[%s2814_s1 + $0x68] sm:$0xff]  }
   0x8   :  { %1721 = vmatpush3.bf16.msra.mxu0 %v1939_v8  ;;  %v1959_v23 = vld [vmem:[%s2815_s0 + $0x68] ss:$12 sps:$4 sm:$0xff]   ;;  %v1940_v25 = vld [vmem:[%s2814_s1 + $0x78] sm:$0xff]   ;;  %v1963_v26 = vld [vmem:[%s2815_s0 + $0x80] ss:$12 sps:$4 sm:$0xff]  }
   0x9   :  { %v1938_v24 = vld [vmem:[%s2814_s1 + $0x70] sm:$0xff]   ;;  %v1941_v27 = vld [vmem:[%s2815_s0] ss:$12 sps:$4 sm:$0xff]   ;;  %v1945_v28 = vld [vmem:[%s2815_s0 + $0x1c] ss:$12 sps:$4 sm:$0xff]  }
   0xa   :  { %715 = vmatpush1.bf16.msra.mxu1 %v1925_v4  ;;  %v1967_v29 = vld [vmem:[%s2815_s0 + $0x98] ss:$12 sps:$4 sm:$0xff]   ;;  %v1949_v31 = vld [vmem:[%s2815_s0 + $0x34] ss:$12 sps:$4 sm:$0xff]   ;;  %v1971_v32 = vld [vmem:[%s2815_s0 + $0xb0] ss:$12 sps:$4 sm:$0xff]  }
   0xb   :  { %716 = vmatprep.subr.bf16.mxu1 %v2040_v0  ;;  %1723 = vmatmul.mubr.msk.bf16.vlgmr.msra.gmra.mrb[0].mxu0 %vm634_vm1, %v1944_v11  ;;  %v1948_v30 = vld [vmem:[%s2815_s0 + $0x18] ss:$12 sps:$4 sm:$0xff]   ;;  %v1952_v33 = vld [vmem:[%s2815_s0 + $0x30] ss:$12 sps:$4 sm:$0xff]   ;;  %v1975_v35 = vld [vmem:[%s2815_s0 + $0xc8] ss:$12 sps:$4 sm:$0xff]  }
   0xc   :  { %1726 = vmatprep.mubr.msk.bf16.mxu0 %vm2042_vm0, %v2041_v2  ;;  %v1953_v34 = vld [vmem:[%s2815_s0 + $0x4c] ss:$12 sps:$4 sm:$0xff]   ;;  %v1956_v36 = vld [vmem:[%s2815_s0 + $0x48] ss:$12 sps:$4 sm:$0xff]   ;;  %v1957_v37 = vld [vmem:[%s2815_s0 + $0x64] ss:$12 sps:$4 sm:$0xff]  }
   0xd   :  { %v1979_v38 = vld [vmem:[%s2815_s0 + $0xe0] ss:$12 sps:$4 sm:$0xff]   ;;  %v1961_v40 = vld [vmem:[%s2815_s0 + $0x7c] ss:$12 sps:$4 sm:$0xff]   ;;  %v1983_v41 = vld [vmem:[%s2815_s0 + $0xf8] ss:$12 sps:$4 sm:$0xff]  }
   0xe   :  { %717 = vmatpush1.bf16.msra.mxu1 %v1926_v5  ;;  %v1960_v39 = vld [vmem:[%s2815_s0 + $0x60] ss:$12 sps:$4 sm:$0xff]   ;;  %v1964_v42 = vld [vmem:[%s2815_s0 + $0x78] ss:$12 sps:$4 sm:$0xff]   ;;  %v1987_v44 = vld [vmem:[%s2815_s0 + $0x110] ss:$12 sps:$4 sm:$0xff]  }
   0xf   :  { %718 = vmatprep.subr.bf16.mxu1 %v2040_v0  ;;  %v1965_v43 = vld [vmem:[%s2815_s0 + $0x94] ss:$12 sps:$4 sm:$0xff]   ;;  %v1968_v45 = vld [vmem:[%s2815_s0 + $0x90] ss:$12 sps:$4 sm:$0xff]   ;;  %v1969_v46 = vld [vmem:[%s2815_s0 + $0xac] ss:$12 sps:$4 sm:$0xff]  }
  0x10   :  { %v1991_v47 = vld [vmem:[%s2815_s0 + $0x128] ss:$12 sps:$4 sm:$0xff]   ;;  %v1973_v49 = vld [vmem:[%s2815_s0 + $0xc4] ss:$12 sps:$4 sm:$0xff]   ;;  %v1995_v50 = vld [vmem:[%s2815_s0 + $0x140] ss:$12 sps:$4 sm:$0xff]  }
  0x11   :  { %v1972_v48 = vld [vmem:[%s2815_s0 + $0xa8] ss:$12 sps:$4 sm:$0xff]   ;;  %v1976_v51 = vld [vmem:[%s2815_s0 + $0xc0] ss:$12 sps:$4 sm:$0xff]   ;;  %v1999_v53 = vld [vmem:[%s2815_s0 + $0x158] ss:$12 sps:$4 sm:$0xff]  }
  0x12   :  { %719 = vmatpush1.bf16.msra.mxu1 %v1927_v6  ;;  %v1977_v52 = vld [vmem:[%s2815_s0 + $0xdc] ss:$12 sps:$4 sm:$0xff]   ;;  %v1980_v54 = vld [vmem:[%s2815_s0 + $0xd8] ss:$12 sps:$4 sm:$0xff]   ;;  %v1981_v55 = vld [vmem:[%s2815_s0 + $0xf4] ss:$12 sps:$4 sm:$0xff]  }
  0x13   :  { %720 = vmatprep.subr.bf16.mxu1 %v2040_v0  ;;  %1727 = vmatmul.mubr.msk.bf16.gmra.mrb[4].mxu0 %vm634_vm1, %v1947_v14  ;;  %v2003_v56 = vld [vmem:[%s2815_s0 + $0x170] ss:$12 sps:$4 sm:$0xff]   ;;  %v1985_v58 = vld [vmem:[%s2815_s0 + $0x10c] ss:$12 sps:$4 sm:$0xff]   ;;  %v2007_v59 = vld [vmem:[%s2815_s0 + $0x188] ss:$12 sps:$4 sm:$0xff]  }
  0x14   :  { %1730 = vmatprep.mubr.msk.bf16.mxu0 %vm2042_vm0, %v2041_v2  ;;  %v1984_v57 = vld [vmem:[%s2815_s0 + $0xf0] ss:$12 sps:$4 sm:$0xff]   ;;  %v1988_v60 = vld [vmem:[%s2815_s0 + $0x108] ss:$12 sps:$4 sm:$0xff]   ;;  %v2011_v62 = vld [vmem:[%s2815_s0 + $0x1a0] ss:$12 sps:$4 sm:$0xff]  }
  0x15   :  { %v1989_v61 = vld [vmem:[%s2815_s0 + $0x124] ss:$12 sps:$4 sm:$0xff]   ;;  %v1992_v63 = vld [vmem:[%s2815_s0 + $0x120] ss:$12 sps:$4 sm:$0xff]   ;;  %v2023_v8 = vld [vmem:[%s2815_s0 + $0x1e8] ss:$12 sps:$4 sm:$0xff]  }
  0x16   :  { %721 = vmatpush1.bf16.msra.mxu1 %v1928_v9  ;;  %v2015_v1 = vld [vmem:[%s2815_s0 + $0x1b8] ss:$12 sps:$4 sm:$0xff]   ;;  %v1997_v4 = vld [vmem:[%s2815_s0 + $0x154] ss:$12 sps:$4 sm:$0xff]   ;;  %v2019_v5 = vld [vmem:[%s2815_s0 + $0x1d0] ss:$12 sps:$4 sm:$0xff]  }
  0x17   :  { %722 = vmatprep.subr.bf16.mxu1 %v2040_v0  ;;  %v1996_v3 = vld [vmem:[%s2815_s0 + $0x138] ss:$12 sps:$4 sm:$0xff]   ;;  %v2000_v6 = vld [vmem:[%s2815_s0 + $0x150] ss:$12 sps:$4 sm:$0xff]   ;;  %v2004_v9 = vld [vmem:[%s2815_s0 + $0x168] ss:$12 sps:$4 sm:$0xff]  }
  0x18   :  { %v2001_v7 = vld [vmem:[%s2815_s0 + $0x16c] ss:$12 sps:$4 sm:$0xff]   ;;  %v2005_v10 = vld [vmem:[%s2815_s0 + $0x184] ss:$12 sps:$4 sm:$0xff]  }
  0x19   :  { %v2027_v11 = vld [vmem:[%s2815_s0 + $0x200] ss:$12 sps:$4 sm:$0xff]   ;;  %v2031_v14 = vld [vmem:[%s2815_s0 + $0x218] ss:$12 sps:$4 sm:$0xff]  }
  0x1a   :  { %723 = vmatpush1.bf16.msra.mxu1 %v1929_v12  ;;  %v2008_v12 = vld [vmem:[%s2815_s0 + $0x180] ss:$12 sps:$4 sm:$0xff]  }
  0x1b   :  { %724 = vmatprep.subr.bf16.mxu1 %v2040_v0  ;;  %1731 = vmatmul.mubr.msk.bf16.gmra.mrb[8].mxu0 %vm634_vm1, %v1951_v17  ;;  %v2035_v17 = vld [vmem:[%s2815_s0 + $0x230] ss:$12 sps:$4 sm:$0xff]  }
  0x1c   :  { %1734 = vmatprep.mubr.msk.bf16.mxu0 %vm2042_vm0, %v2041_v2 }
  0x1e   :  { %725 = vmatpush1.bf16.msra.mxu1 %v1930_v13  ;;  %v2009_v13 = vld [vmem:[%s2815_s0 + $0x19c] ss:$12 sps:$4 sm:$0xff]  }
  0x1f   :  { %726 = vmatprep.subr.bf16.mxu1 %v2040_v0 }
  0x22   :  { %727 = vmatpush1.bf16.msra.mxu1 %v1931_v15  ;;  %v2012_v15 = vld [vmem:[%s2815_s0 + $0x198] ss:$12 sps:$4 sm:$0xff]  }
  0x23   :  { %728 = vmatprep.subr.bf16.mxu1 %v2040_v0  ;;  %1735 = vmatmul.mubr.msk.bf16.gmra.mrb[12].mxu0 %vm634_vm1, %v1955_v20  ;;  %v2038_v20 = vld [vmem:[%s2815_s0 + $0x248] ss:$0 sps:$4 sm:$0xff]  }
  0x24   :  { %1738 = vmatprep.mubr.msk.bf16.mxu0 %vm2042_vm0, %v2041_v2 }
  0x26   :  { %729 = vmatpush1.bf16.msra.mxu1 %v1932_v16  ;;  %v2013_v16 = vld [vmem:[%s2815_s0 + $0x1b4] ss:$12 sps:$4 sm:$0xff]  }
  0x27   :  { %730 = vmatprep.subr.bf16.mxu1 %v2040_v0 }
  0x2a   :  { %731 = vmatpush1.bf16.msra.mxu1 %v1933_v18  ;;  %v2016_v18 = vld [vmem:[%s2815_s0 + $0x1b0] ss:$12 sps:$4 sm:$0xff]  }
  0x2b   :  { %732 = vmatprep.subr.bf16.mxu1 %v2040_v0  ;;  %1739 = vmatmul.mubr.msk.bf16.gmra.mrb[16].mxu0 %vm634_vm1, %v1959_v23  ;;  %v2025_v23 = vld [vmem:[%s2815_s0 + $0x1fc] ss:$12 sps:$4 sm:$0xff]  }
  0x2c   :  { %1742 = vmatprep.mubr.msk.bf16.mxu0 %vm2042_vm0, %v2041_v2 }
  0x2e   :  { %733 = vmatpush1.bf16.msra.mxu1 %v1934_v19  ;;  %v2017_v19 = vld [vmem:[%s2815_s0 + $0x1cc] ss:$12 sps:$4 sm:$0xff]  }
  0x2f   :  { %734 = vmatprep.subr.bf16.mxu1 %v2040_v0 }
  0x32   :  { %735 = vmatpush1.bf16.msra.mxu1 %v1935_v21  ;;  %v2020_v21 = vld [vmem:[%s2815_s0 + $0x1c8] ss:$12 sps:$4 sm:$0xff]  }
  0x33   :  { %736 = vmatprep.subr.bf16.mxu1 %v2040_v0  ;;  %1743 = vmatmul.mubr.msk.bf16.gmra.mrb[20].mxu0 %vm634_vm1, %v1963_v26 }
  0x34   :  { %1746 = vmatprep.mubr.msk.bf16.mxu0 %vm2042_vm0, %v2041_v2 }
  0x36   :  { %737 = vmatpush1.bf16.msra.mxu1 %v1936_v22  ;;  %v2021_v22 = vld [vmem:[%s2815_s0 + $0x1e4] ss:$12 sps:$4 sm:$0xff]  }
  0x37   :  { %738 = vmatprep.subr.bf16.mxu1 %v2040_v0 }
  0x3a   :  { %739 = vmatpush1.bf16.msra.mxu1 %v1938_v24  ;;  %v2028_v24 = vld [vmem:[%s2815_s0 + $0x1f8] ss:$12 sps:$4 sm:$0xff]  }
  0x3b   :  { %740 = vmatprep.subr.bf16.mxu1 %v2040_v0  ;;  %1747 = vmatmul.mubr.msk.bf16.gmra.mrb[24].mxu0 %vm634_vm1, %v1967_v29  ;;  %v1993_v0 = vld [vmem:[%s2815_s0 + $0x13c] ss:$12 sps:$4 sm:$0xff]  }
  0x3c   :  { %1750 = vmatprep.mubr.msk.bf16.mxu0 %vm2042_vm0, %v2041_v2  ;;  %v2032_v29 = vld [vmem:[%s2815_s0 + $0x210] ss:$12 sps:$4 sm:$0xff]  }
  0x3e   :  { %741 = vmatpush1.bf16.msra.mxu1 %v1940_v25  ;;  %v2029_v25 = vld [vmem:[%s2815_s0 + $0x214] ss:$12 sps:$4 sm:$0xff]  }
  0x41   :  { %743 = vmatmul.mubr.bf16.vlgmr.msra.gmra.mrb[0].mxu1 %v1941_v27 }
  0x42   :  { %750 = vmatprep.mubr.bf16.mxu1 %v1945_v28 }
  0x43   :  { %1751 = vmatmul.mubr.msk.bf16.gmra.mrb[28].mxu0 %vm634_vm1, %v1971_v32 }
  0x44   :  { %1754 = vmatprep.mubr.msk.bf16.mxu0 %vm2042_vm0, %v2041_v2 }
  0x49   :  { %751 = vmatmul.mubr.bf16.gmra.mrb[4].mxu1 %v1948_v30 }
  0x4a   :  { %758 = vmatprep.mubr.bf16.mxu1 %v1949_v31  ;;  %v2033_v31 = vld [vmem:[%s2815_s0 + $0x22c] ss:$12 sps:$4 sm:$0xff]  }
  0x4b   :  { %1755 = vmatmul.mubr.msk.bf16.gmra.mrb[32].mxu0 %vm634_vm1, %v1975_v35 }
  0x4c   :  { %1758 = vmatprep.mubr.msk.bf16.mxu0 %vm2042_vm0, %v2041_v2 }
  0x51   :  { %759 = vmatmul.mubr.bf16.gmra.mrb[8].mxu1 %v1952_v33  ;;  %v111_v33 = vld [vmem:[%s2815_s0 + $0x240] sm:$0xff] }
  0x52   :  { %766 = vmatprep.mubr.bf16.mxu1 %v1953_v34 }
  0x53   :  { %1759 = vmatmul.mubr.msk.bf16.gmra.mrb[36].mxu0 %vm634_vm1, %v1979_v38  ;;  %v1548_v38 = vcombine.high %v111_v33, %v111_v33 }
  0x54   :  { %1762 = vmatprep.mubr.msk.bf16.mxu0 %vm2042_vm0, %v2041_v2 }
  0x59   :  { %767 = vmatmul.mubr.bf16.gmra.mrb[12].mxu1 %v1956_v36  ;;  %v2036_v36 = vld [vmem:[%s2815_s0 + $0x228] ss:$12 sps:$4 sm:$0xff]  }
  0x5a   :  { %774 = vmatprep.mubr.bf16.mxu1 %v1957_v37 }
  0x5b   :  { %1763 = vmatmul.mubr.msk.bf16.gmra.mrb[40].mxu0 %vm634_vm1, %v1983_v41 }
  0x5c   :  { %1766 = vmatprep.mubr.msk.bf16.mxu0 %vm2042_vm0, %v2041_v2 }
  0x61   :  { %775 = vmatmul.mubr.bf16.gmra.mrb[16].mxu1 %v1960_v39 }
  0x62   :  { %782 = vmatprep.mubr.bf16.mxu1 %v1961_v40 }
  0x63   :  { %1767 = vmatmul.mubr.msk.bf16.gmra.mrb[44].mxu0 %vm634_vm1, %v1987_v44 }
  0x64   :  { %1770 = vmatprep.mubr.msk.bf16.mxu0 %vm2042_vm0, %v2041_v2 }
  0x69   :  { %783 = vmatmul.mubr.bf16.gmra.mrb[20].mxu1 %v1964_v42  ;;  %v1547_v42 = vcombine.low %v111_v33, %v111_v33 }
  0x6a   :  { %790 = vmatprep.mubr.bf16.mxu1 %v1965_v43 }
  0x6b   :  { %1771 = vmatmul.mubr.msk.bf16.gmra.mrb[48].mxu0 %vm634_vm1, %v1991_v47 }
  0x6c   :  { %1774 = vmatprep.mubr.msk.bf16.mxu0 %vm2042_vm0, %v2041_v2 }
  0x71   :  { %791 = vmatmul.mubr.bf16.gmra.mrb[24].mxu1 %v1968_v45 }
  0x72   :  { %798 = vmatprep.mubr.bf16.mxu1 %v1969_v46 }
  0x73   :  { %1775 = vmatmul.mubr.msk.bf16.gmra.mrb[52].mxu0 %vm634_vm1, %v1995_v50 }
  0x74   :  { %1778 = vmatprep.mubr.msk.bf16.mxu0 %vm2042_vm0, %v2041_v2 }
  0x79   :  { %799 = vmatmul.mubr.bf16.gmra.mrb[28].mxu1 %v1972_v48 }
  0x7a   :  { %806 = vmatprep.mubr.bf16.mxu1 %v1973_v49 }
  0x7b   :  { %1779 = vmatmul.mubr.msk.bf16.gmra.mrb[56].mxu0 %vm634_vm1, %v1999_v53 }
  0x7c   :  { %1782 = vmatprep.mubr.msk.bf16.mxu0 %vm2042_vm0, %v2041_v2 }
  0x81   :  { %807 = vmatmul.mubr.bf16.gmra.mrb[32].mxu1 %v1976_v51 }
  0x82   :  { %814 = vmatprep.mubr.bf16.mxu1 %v1977_v52  ;;  %v2445_v52 = vld [vmem:[%s2816_s2] ss:$0 sm:$0xff] }
  0x83   :  { %1783 = vmatmul.mubr.msk.bf16.gmra.mrb[60].mxu0 %vm634_vm1, %v2003_v56 }
  0x84   :  { %1786 = vmatprep.mubr.msk.bf16.mxu0 %vm2042_vm0, %v2041_v2 }
  0x89   :  { %815 = vmatmul.mubr.bf16.gmra.mrb[36].mxu1 %v1980_v54 }
  0x8a   :  { %822 = vmatprep.mubr.bf16.mxu1 %v1981_v55 }
  0x8b   :  { %1787 = vmatmul.mubr.msk.bf16.gmra.mrb[64].mxu0 %vm634_vm1, %v2007_v59 }
  0x8c   :  { %1790 = vmatprep.mubr.msk.bf16.mxu0 %vm2042_vm0, %v2041_v2 }
  0x91   :  { %823 = vmatmul.mubr.bf16.gmra.mrb[40].mxu1 %v1984_v57 }
  0x92   :  { %830 = vmatprep.mubr.bf16.mxu1 %v1985_v58 }
  0x93   :  { %1791 = vmatmul.mubr.msk.bf16.gmra.mrb[68].mxu0 %vm634_vm1, %v2011_v62 }
  0x94   :  { %1794 = vmatprep.mubr.msk.bf16.mxu0 %vm2042_vm0, %v2041_v2 }
  0x99   :  { %831 = vmatmul.mubr.bf16.gmra.mrb[44].mxu1 %v1988_v60 }
  0x9a   :  { %838 = vmatprep.mubr.bf16.mxu1 %v1989_v61 }
  0x9b   :  { %1795 = vmatmul.mubr.msk.bf16.gmra.mrb[72].mxu0 %vm634_vm1, %v2015_v1 }
  0x9c   :  { %1798 = vmatprep.mubr.msk.bf16.mxu0 %vm2042_vm0, %v2041_v2 }
  0xa1   :  { %839 = vmatmul.mubr.bf16.gmra.mrb[48].mxu1 %v1992_v63 }
  0xa2   :  { %846 = vmatprep.mubr.bf16.mxu1 %v1993_v0 }
  0xa3   :  { %1799 = vmatmul.mubr.msk.bf16.gmra.mrb[76].mxu0 %vm634_vm1, %v2019_v5 }
  0xa4   :  { %1802 = vmatprep.mubr.msk.bf16.mxu0 %vm2042_vm0, %v2041_v2 }
  0xa9   :  { %847 = vmatmul.mubr.bf16.gmra.mrb[52].mxu1 %v1996_v3 }
  0xaa   :  { %854 = vmatprep.mubr.bf16.mxu1 %v1997_v4 }
  0xab   :  { %1803 = vmatmul.mubr.msk.bf16.gmra.mrb[80].mxu0 %vm634_vm1, %v2023_v8 }
  0xac   :  { %1806 = vmatprep.mubr.msk.bf16.mxu0 %vm2042_vm0, %v2041_v2 }
  0xb1   :  { %855 = vmatmul.mubr.bf16.gmra.mrb[56].mxu1 %v2000_v6 }
  0xb2   :  { %862 = vmatprep.mubr.bf16.mxu1 %v2001_v7 }
  0xb3   :  { %1807 = vmatmul.mubr.msk.bf16.gmra.mrb[84].mxu0 %vm634_vm1, %v2027_v11 }
  0xb4   :  { %1810 = vmatprep.mubr.msk.bf16.mxu0 %vm2042_vm0, %v2041_v2 }
  0xb9   :  { %863 = vmatmul.mubr.bf16.gmra.mrb[60].mxu1 %v2004_v9 }
  0xba   :  { %870 = vmatprep.mubr.bf16.mxu1 %v2005_v10 }
  0xbb   :  { %1811 = vmatmul.mubr.msk.bf16.gmra.mrb[88].mxu0 %vm634_vm1, %v2031_v14 }
  0xbc   :  { %1814 = vmatprep.mubr.msk.bf16.mxu0 %vm2042_vm0, %v2041_v2 }
  0xc1   :  { %871 = vmatmul.mubr.bf16.gmra.mrb[64].mxu1 %v2008_v12 }
  0xc2   :  { %878 = vmatprep.mubr.bf16.mxu1 %v2009_v13 }
  0xc3   :  { %1815 = vmatmul.mubr.msk.bf16.gmra.mrb[92].mxu0 %vm634_vm1, %v2035_v17 }
  0xc4   :  { %1818 = vmatprep.mubr.msk.bf16.mxu0 %vm2042_vm0, %v2041_v2  ;;  %v2024_v2 = vld [vmem:[%s2815_s0 + $0x1e0] ss:$12 sps:$4 sm:$0xff]  }
  0xc9   :  { %879 = vmatmul.mubr.bf16.gmra.mrb[68].mxu1 %v2012_v15 }
  0xca   :  { %886 = vmatprep.mubr.bf16.mxu1 %v2013_v16 }
  0xcb   :  { %1819 = vmatmul.mubr.msk.bf16.gmra.mrb[96].mxu0 %vm634_vm1, %v2038_v20 }
  0xd1   :  { %887 = vmatmul.mubr.bf16.gmra.mrb[72].mxu1 %v2016_v18 }
  0xd2   :  { %894 = vmatprep.mubr.bf16.mxu1 %v2017_v19 }
  0xd9   :  { %895 = vmatmul.mubr.bf16.gmra.mrb[76].mxu1 %v2020_v21 }
  0xda   :  { %902 = vmatprep.mubr.bf16.mxu1 %v2021_v22 }
  0xde   :  { %v976_v26 = vpop.f32.mrb[0].mxu0 }
  0xdf   :  { %v1724_v27 = vpop.f32.mrb[1].mxu0 }
  0xe0   :  { %v979_v28 = vpop.f32.mrb[2].mxu0 }
  0xe1   :  { %903 = vmatmul.mubr.bf16.gmra.mrb[80].mxu1 %v2024_v2  ;;  %v1725_v30 = vpop.f32.mrb[3].mxu0 }
  0xe2   :  { %910 = vmatprep.mubr.bf16.mxu1 %v2025_v23 }
  0xe6   :  { %v984_v32 = vpop.f32.mrb[4].mxu0 }
  0xe7   :  { %v1728_v34 = vpop.f32.mrb[5].mxu0 }
  0xe8   :  { %v987_v35 = vpop.f32.mrb[6].mxu0 }
  0xe9   :  { %911 = vmatmul.mubr.bf16.gmra.mrb[84].mxu1 %v2028_v24  ;;  %v1729_v37 = vpop.f32.mrb[7].mxu0 }
  0xea   :  { %918 = vmatprep.mubr.bf16.mxu1 %v2029_v25 }
  0xee   :  { %v992_v39 = vpop.f32.mrb[8].mxu0 }
  0xef   :  { %v1732_v40 = vpop.f32.mrb[9].mxu0 }
  0xf0   :  { %v2432_v41 = vpop.f32.mrb[10].mxu0 }
  0xf1   :  { %919 = vmatmul.mubr.bf16.gmra.mrb[88].mxu1 %v2032_v29  ;;  %v1733_v43 = vpop.f32.mrb[11].mxu0 }
  0xf2   :  { %926 = vmatprep.mubr.bf16.mxu1 %v2033_v31 }
  0xf6   :  { %v2434_v44 = vpop.f32.mrb[12].mxu0 }
  0xf7   :  { %v1736_v45 = vpop.f32.mrb[13].mxu0 }
  0xf8   :  { %v2436_v46 = vpop.f32.mrb[14].mxu0 }
  0xf9   :  { %927 = vmatmul.mubr.bf16.gmra.mrb[92].mxu1 %v2036_v36  ;;  %v1737_v47 = vpop.f32.mrb[15].mxu0 }
  0xfa   :  { %934 = vmatprep.mubr.bf16.mxu1 %v1548_v38 }
  0xfe   :  { %v2438_v48 = vpop.f32.mrb[16].mxu0 }
  0xff   :  { %v1740_v49 = vpop.f32.mrb[17].mxu0 }
 0x100   :  { %v2440_v50 = vpop.f32.mrb[18].mxu0 }
 0x101   :  { %935 = vmatmul.mubr.bf16.gmra.mrb[96].mxu1 %v1547_v42  ;;  %v1741_v51 = vpop.f32.mrb[19].mxu0 }
 0x106   :  { %v2447_v53 = vpop.f32.mrb[20].mxu0 }
 0x107   :  { %v1744_v54 = vpop.f32.mrb[21].mxu0 }
 0x108   :  { %v2449_v56 = vpop.f32.mrb[22].mxu0 }
 0x109   :  { %v1745_v59 = vpop.f32.mrb[23].mxu0 }
 0x10e   :  { %v2453_v3 = vpop.f32.mrb[24].mxu0 }
 0x10f   :  { %v1748_v6 = vpop.f32.mrb[25].mxu0 }
 0x110   :  { %v2455_v8 = vpop.f32.mrb[26].mxu0 }
 0x111   :  { %v1749_v12 = vpop.f32.mrb[27].mxu0 }
 0x114   :  { %v744_v55 = vpop.f32.mrb[0].mxu1 }
 0x115   :  { %v745_v57 = vadd.f32 %v2445_v52, %v744_v55  ;;  %v746_v58 = vpop.f32.mrb[1].mxu1 }
 0x116   :  { %v747_v60 = vpop.f32.mrb[2].mxu1  ;;  %v2467_v19 = vpop.f32.mrb[28].mxu0 }
 0x117   :  { %v977_v61 = vadd.f32 %v976_v26, %v745_v57  ;;  %v748_v62 = vadd.f32 %v2445_v52, %v747_v60  ;;  %v749_v63 = vpop.f32.mrb[3].mxu1  ;;  %v1752_v22 = vpop.f32.mrb[29].mxu0 }
 0x118   :  { %v2469_v23 = vpop.f32.mrb[30].mxu0 }
 0x119   :  { %v1174_v0 = vmax.f32 %v977_v61, 0.0  ;;  %v980_v1 = vadd.f32 %v979_v28, %v748_v62  ;;  %v1753_v27 = vpop.f32.mrb[31].mxu0 }
 0x11b   :  { %v1642_v4 = vpack.c.bf16 %v1174_v0, %v1174_v0  ;;  %v1175_v5 = vmax.f32 %v980_v1, 0.0 }
 0x11c   :  { %v752_v7 = vpop.f32.mrb[4].mxu1 }
 0x11d   :  { %1421 = vst.msk [vmem:[%s2817_s3] sm:$0xf] %vm1420_vm2, %v1642_v4  ;;  %v1643_v9 = vpack.c.bf16 %v1175_v5, %v1175_v5  ;;  %v753_v10 = vadd.f32 %v2445_v52, %v752_v7  ;;  %v754_v11 = vpop.f32.mrb[5].mxu1 }
 0x11e   :  { %v755_v13 = vpop.f32.mrb[6].mxu1  ;;  %v2482_v34 = vpop.f32.mrb[32].mxu0 }
 0x11f   :  { %1422 = vst.msk [vmem:[%s2817_s3 + $0x4] sm:$0xf] %vm1420_vm2, %v1643_v9  ;;  %v985_v14 = vadd.f32 %v984_v32, %v753_v10  ;;  %v756_v15 = vadd.f32 %v2445_v52, %v755_v13  ;;  %v757_v16 = vpop.f32.mrb[7].mxu1  ;;  %v1756_v37 = vpop.f32.mrb[33].mxu0 }
 0x120   :  { %v2484_v40 = vpop.f32.mrb[34].mxu0 }
 0x121   :  { %v1176_v17 = vmax.f32 %v985_v14, 0.0  ;;  %v988_v18 = vadd.f32 %v987_v35, %v756_v15  ;;  %v1757_v45 = vpop.f32.mrb[35].mxu0 }
 0x123   :  { %v1644_v20 = vpack.c.bf16 %v1176_v17, %v1176_v17  ;;  %v1177_v21 = vmax.f32 %v988_v18, 0.0 }
 0x124   :  { %v760_v2 = vpop.f32.mrb[8].mxu1 }
 0x125   :  { %1423 = vst.msk [vmem:[%s2817_s3 + $0x8] sm:$0xf] %vm1420_vm2, %v1644_v20  ;;  %v1645_v24 = vpack.c.bf16 %v1177_v21, %v1177_v21  ;;  %v761_v25 = vadd.f32 %v2445_v52, %v760_v2  ;;  %v762_v26 = vpop.f32.mrb[9].mxu1 }
 0x126   :  { %v763_v28 = vpop.f32.mrb[10].mxu1  ;;  %v2498_v57 = vpop.f32.mrb[36].mxu0 }
 0x127   :  { %1424 = vst.msk [vmem:[%s2817_s3 + $0xc] sm:$0xf] %vm1420_vm2, %v1645_v24  ;;  %v993_v29 = vadd.f32 %v992_v39, %v761_v25  ;;  %v764_v30 = vadd.f32 %v2445_v52, %v763_v28  ;;  %v765_v31 = vpop.f32.mrb[11].mxu1  ;;  %v1760_v60 = vpop.f32.mrb[37].mxu0 }
 0x128   :  { %v2500_v62 = vpop.f32.mrb[38].mxu0 }
 0x129   :  { %v1178_v32 = vmax.f32 %v993_v29, 0.0  ;;  %v996_v33 = vadd.f32 %v2432_v41, %v764_v30  ;;  %v1761_v1 = vpop.f32.mrb[39].mxu0 }
 0x12b   :  { %v1646_v35 = vpack.c.bf16 %v1178_v32, %v1178_v32  ;;  %v1179_v36 = vmax.f32 %v996_v33, 0.0 }
 0x12c   :  { %v768_v38 = vpop.f32.mrb[12].mxu1 }
 0x12d   :  { %1425 = vst.msk [vmem:[%s2817_s3 + $0x10] sm:$0xf] %vm1420_vm2, %v1646_v35  ;;  %v1647_v39 = vpack.c.bf16 %v1179_v36, %v1179_v36  ;;  %v769_v42 = vadd.f32 %v2445_v52, %v768_v38  ;;  %v770_v43 = vpop.f32.mrb[13].mxu1 }
 0x12e   :  { %v771_v47 = vpop.f32.mrb[14].mxu1  ;;  %v2514_v10 = vpop.f32.mrb[40].mxu0 }
 0x12f   :  { %1426 = vst.msk [vmem:[%s2817_s3 + $0x14] sm:$0xf] %vm1420_vm2, %v1647_v39  ;;  %v1001_v41 = vadd.f32 %v2434_v44, %v769_v42  ;;  %v772_v49 = vadd.f32 %v2445_v52, %v771_v47  ;;  %v773_v51 = vpop.f32.mrb[15].mxu1  ;;  %v1764_v13 = vpop.f32.mrb[41].mxu0 }
 0x130   :  { %v2516_v15 = vpop.f32.mrb[42].mxu0 }
 0x131   :  { %v1180_v54 = vmax.f32 %v1001_v41, 0.0  ;;  %v1004_v55 = vadd.f32 %v2436_v46, %v772_v49  ;;  %v1765_v18 = vpop.f32.mrb[43].mxu0 }
 0x133   :  { %v1648_v58 = vpack.c.bf16 %v1180_v54, %v1180_v54  ;;  %v1181_v59 = vmax.f32 %v1004_v55, 0.0 }
 0x134   :  { %v776_v61 = vpop.f32.mrb[16].mxu1 }
 0x135   :  { %1427 = vst.msk [vmem:[%s2817_s3 + $0x18] sm:$0xf] %vm1420_vm2, %v1648_v58  ;;  %v1649_v44 = vpack.c.bf16 %v1181_v59, %v1181_v59  ;;  %v777_v63 = vadd.f32 %v2445_v52, %v776_v61  ;;  %v778_v0 = vpop.f32.mrb[17].mxu1 }
 0x136   :  { %v779_v4 = vpop.f32.mrb[18].mxu1  ;;  %v2530_v25 = vpop.f32.mrb[44].mxu0 }
 0x137   :  { %1428 = vst.msk [vmem:[%s2817_s3 + $0x1c] sm:$0xf] %vm1420_vm2, %v1649_v44  ;;  %v1009_v46 = vadd.f32 %v2438_v48, %v777_v63  ;;  %v780_v5 = vadd.f32 %v2445_v52, %v779_v4  ;;  %v781_v6 = vpop.f32.mrb[19].mxu1  ;;  %v1768_v28 = vpop.f32.mrb[45].mxu0 }
 0x138   :  { %v2532_v30 = vpop.f32.mrb[46].mxu0 }
 0x139   :  { %v1182_v7 = vmax.f32 %v1009_v46, 0.0  ;;  %v1012_v9 = vadd.f32 %v2440_v50, %v780_v5  ;;  %v1769_v33 = vpop.f32.mrb[47].mxu0 }
 0x13b   :  { %v1650_v11 = vpack.c.bf16 %v1182_v7, %v1182_v7  ;;  %v1183_v12 = vmax.f32 %v1012_v9, 0.0 }
 0x13c   :  { %v784_v14 = vpop.f32.mrb[20].mxu1 }
 0x13d   :  { %1429 = vst.msk [vmem:[%s2817_s3 + $0x20] sm:$0xf] %vm1420_vm2, %v1650_v11  ;;  %v1651_v48 = vpack.c.bf16 %v1183_v12, %v1183_v12  ;;  %v785_v16 = vadd.f32 %v2445_v52, %v784_v14  ;;  %v786_v17 = vpop.f32.mrb[21].mxu1 }
 0x13e   :  { %v787_v20 = vpop.f32.mrb[22].mxu1  ;;  %v2546_v42 = vpop.f32.mrb[48].mxu0 }
 0x13f   :  { %1430 = vst.msk [vmem:[%s2817_s3 + $0x24] sm:$0xf] %vm1420_vm2, %v1651_v48  ;;  %v1017_v50 = vadd.f32 %v2447_v53, %v785_v16  ;;  %v788_v21 = vadd.f32 %v2445_v52, %v787_v20  ;;  %v789_v22 = vpop.f32.mrb[23].mxu1  ;;  %v1772_v47 = vpop.f32.mrb[49].mxu0 }
 0x140   :  { %v2548_v49 = vpop.f32.mrb[50].mxu0 }
 0x141   :  { %v1184_v2 = vmax.f32 %v1017_v50, 0.0  ;;  %v1020_v24 = vadd.f32 %v2449_v56, %v788_v21  ;;  %v1773_v55 = vpop.f32.mrb[51].mxu0 }
 0x143   :  { %v1652_v26 = vpack.c.bf16 %v1184_v2, %v1184_v2  ;;  %v1185_v27 = vmax.f32 %v1020_v24, 0.0 }
 0x144   :  { %v792_v29 = vpop.f32.mrb[24].mxu1 }
 0x145   :  { %1431 = vst.msk [vmem:[%s2817_s3 + $0x28] sm:$0xf] %vm1420_vm2, %v1652_v26  ;;  %v1653_v53 = vpack.c.bf16 %v1185_v27, %v1185_v27  ;;  %v793_v31 = vadd.f32 %v2445_v52, %v792_v29  ;;  %v794_v32 = vpop.f32.mrb[25].mxu1 }
 0x146   :  { %v795_v35 = vpop.f32.mrb[26].mxu1  ;;  %v2562_v63 = vpop.f32.mrb[52].mxu0 }
 0x147   :  { %1432 = vst.msk [vmem:[%s2817_s3 + $0x2c] sm:$0xf] %vm1420_vm2, %v1653_v53  ;;  %v1025_v56 = vadd.f32 %v2453_v3, %v793_v31  ;;  %v796_v36 = vadd.f32 %v2445_v52, %v795_v35  ;;  %v797_v37 = vpop.f32.mrb[27].mxu1  ;;  %v1776_v4 = vpop.f32.mrb[53].mxu0 }
 0x148   :  { %v2564_v5 = vpop.f32.mrb[54].mxu0 }
 0x149   :  { %v1186_v38 = vmax.f32 %v1025_v56, 0.0  ;;  %v1028_v39 = vadd.f32 %v2455_v8, %v796_v36  ;;  %v1777_v9 = vpop.f32.mrb[55].mxu0 }
 0x14b   :  { %v1654_v43 = vpack.c.bf16 %v1186_v38, %v1186_v38  ;;  %v1187_v45 = vmax.f32 %v1028_v39, 0.0 }
 0x14c   :  { %v800_v41 = vpop.f32.mrb[28].mxu1 }
 0x14d   :  { %1433 = vst.msk [vmem:[%s2817_s3 + $0x30] sm:$0xf] %vm1420_vm2, %v1654_v43  ;;  %v1655_v3 = vpack.c.bf16 %v1187_v45, %v1187_v45  ;;  %v801_v51 = vadd.f32 %v2445_v52, %v800_v41  ;;  %v802_v54 = vpop.f32.mrb[29].mxu1 }
 0x14e   :  { %v803_v58 = vpop.f32.mrb[30].mxu1  ;;  %v2578_v16 = vpop.f32.mrb[56].mxu0 }
 0x14f   :  { %1434 = vst.msk [vmem:[%s2817_s3 + $0x34] sm:$0xf] %vm1420_vm2, %v1655_v3  ;;  %v1033_v8 = vadd.f32 %v2467_v19, %v801_v51  ;;  %v804_v59 = vadd.f32 %v2445_v52, %v803_v58  ;;  %v805_v60 = vpop.f32.mrb[31].mxu1  ;;  %v1780_v20 = vpop.f32.mrb[57].mxu0 }
 0x150   :  { %v2580_v21 = vpop.f32.mrb[58].mxu0 }
 0x151   :  { %v1188_v61 = vmax.f32 %v1033_v8, 0.0  ;;  %v1036_v44 = vadd.f32 %v2469_v23, %v804_v59  ;;  %v1781_v24 = vpop.f32.mrb[59].mxu0 }
 0x153   :  { %v1656_v0 = vpack.c.bf16 %v1188_v61, %v1188_v61  ;;  %v1189_v1 = vmax.f32 %v1036_v44, 0.0 }
 0x154   :  { %v808_v46 = vpop.f32.mrb[32].mxu1 }
 0x155   :  { %1435 = vst.msk [vmem:[%s2817_s3 + $0x38] sm:$0xf] %vm1420_vm2, %v1656_v0  ;;  %v1657_v19 = vpack.c.bf16 %v1189_v1, %v1189_v1  ;;  %v809_v6 = vadd.f32 %v2445_v52, %v808_v46  ;;  %v810_v7 = vpop.f32.mrb[33].mxu1 }
 0x156   :  { %v811_v11 = vpop.f32.mrb[34].mxu1  ;;  %v2594_v31 = vpop.f32.mrb[60].mxu0 }
 0x157   :  { %1436 = vst.msk [vmem:[%s2817_s3 + $0x3c] sm:$0xf] %vm1420_vm2, %v1657_v19  ;;  %v1041_v23 = vadd.f32 %v2482_v34, %v809_v6  ;;  %v812_v12 = vadd.f32 %v2445_v52, %v811_v11  ;;  %v813_v13 = vpop.f32.mrb[35].mxu1  ;;  %v1784_v35 = vpop.f32.mrb[61].mxu0 }
 0x158   :  { %v2596_v36 = vpop.f32.mrb[62].mxu0 }
 0x159   :  { %v1190_v14 = vmax.f32 %v1041_v23, 0.0  ;;  %v1044_v48 = vadd.f32 %v2484_v40, %v812_v12  ;;  %v1785_v39 = vpop.f32.mrb[63].mxu0 }
 0x15b   :  { %v1658_v17 = vpack.c.bf16 %v1190_v14, %v1190_v14  ;;  %v1191_v18 = vmax.f32 %v1044_v48, 0.0 }
 0x15c   :  { %v816_v50 = vpop.f32.mrb[36].mxu1 }
 0x15d   :  { %1437 = vst.msk [vmem:[%s2817_s3 + $0x40] sm:$0xf] %vm1420_vm2, %v1658_v17  ;;  %v1659_v34 = vpack.c.bf16 %v1191_v18, %v1191_v18  ;;  %v817_v22 = vadd.f32 %v2445_v52, %v816_v50  ;;  %v818_v2 = vpop.f32.mrb[37].mxu1 }
 0x15e   :  { %v819_v26 = vpop.f32.mrb[38].mxu1  ;;  %v2610_v51 = vpop.f32.mrb[64].mxu0 }
 0x15f   :  { %1438 = vst.msk [vmem:[%s2817_s3 + $0x44] sm:$0xf] %vm1420_vm2, %v1659_v34  ;;  %v1049_v40 = vadd.f32 %v2498_v57, %v817_v22  ;;  %v820_v27 = vadd.f32 %v2445_v52, %v819_v26  ;;  %v821_v28 = vpop.f32.mrb[39].mxu1  ;;  %v1788_v58 = vpop.f32.mrb[65].mxu0 }
 0x160   :  { %v2612_v59 = vpop.f32.mrb[66].mxu0 }
 0x161   :  { %v1192_v29 = vmax.f32 %v1049_v40, 0.0  ;;  %v1052_v53 = vadd.f32 %v2500_v62, %v820_v27  ;;  %v1789_v44 = vpop.f32.mrb[67].mxu0 }
 0x163   :  { %v1660_v32 = vpack.c.bf16 %v1192_v29, %v1192_v29  ;;  %v1193_v33 = vmax.f32 %v1052_v53, 0.0 }
 0x164   :  { %v824_v56 = vpop.f32.mrb[40].mxu1 }
 0x165   :  { %1439 = vst.msk [vmem:[%s2817_s3 + $0x48] sm:$0xf] %vm1420_vm2, %v1660_v32  ;;  %v1661_v57 = vpack.c.bf16 %v1193_v33, %v1193_v33  ;;  %v825_v37 = vadd.f32 %v2445_v52, %v824_v56  ;;  %v826_v38 = vpop.f32.mrb[41].mxu1 }
 0x166   :  { %v827_v43 = vpop.f32.mrb[42].mxu1  ;;  %v2626_v6 = vpop.f32.mrb[68].mxu0 }
 0x167   :  { %1440 = vst.msk [vmem:[%s2817_s3 + $0x4c] sm:$0xf] %vm1420_vm2, %v1661_v57  ;;  %v1057_v62 = vadd.f32 %v2514_v10, %v825_v37  ;;  %v828_v45 = vadd.f32 %v2445_v52, %v827_v43  ;;  %v829_v47 = vpop.f32.mrb[43].mxu1  ;;  %v1792_v11 = vpop.f32.mrb[69].mxu0 }
 0x168   :  { %v2628_v12 = vpop.f32.mrb[70].mxu0 }
 0x169   :  { %v1194_v41 = vmax.f32 %v1057_v62, 0.0  ;;  %v1060_v3 = vadd.f32 %v2516_v15, %v828_v45  ;;  %v1793_v48 = vpop.f32.mrb[71].mxu0 }
 0x16b   :  { %v1662_v54 = vpack.c.bf16 %v1194_v41, %v1194_v41  ;;  %v1195_v55 = vmax.f32 %v1060_v3, 0.0 }
 0x16c   :  { %v832_v8 = vpop.f32.mrb[44].mxu1 }
 0x16d   :  { %1441 = vst.msk [vmem:[%s2817_s3 + $0x50] sm:$0xf] %vm1420_vm2, %v1662_v54  ;;  %v1663_v10 = vpack.c.bf16 %v1195_v55, %v1195_v55  ;;  %v833_v60 = vadd.f32 %v2445_v52, %v832_v8  ;;  %v834_v61 = vpop.f32.mrb[45].mxu1 }
 0x16e   :  { %v835_v0 = vpop.f32.mrb[46].mxu1  ;;  %v2642_v22 = vpop.f32.mrb[72].mxu0 }
 0x16f   :  { %1442 = vst.msk [vmem:[%s2817_s3 + $0x54] sm:$0xf] %vm1420_vm2, %v1663_v10  ;;  %v1065_v15 = vadd.f32 %v2530_v25, %v833_v60  ;;  %v836_v1 = vadd.f32 %v2445_v52, %v835_v0  ;;  %v837_v4 = vpop.f32.mrb[47].mxu1  ;;  %v1796_v26 = vpop.f32.mrb[73].mxu0 }
 0x170   :  { %v2644_v27 = vpop.f32.mrb[74].mxu0 }
 0x171   :  { %v1196_v46 = vmax.f32 %v1065_v15, 0.0  ;;  %v1068_v19 = vadd.f32 %v2532_v30, %v836_v1  ;;  %v1797_v53 = vpop.f32.mrb[75].mxu0 }
 0x173   :  { %v1664_v7 = vpack.c.bf16 %v1196_v46, %v1196_v46  ;;  %v1197_v9 = vmax.f32 %v1068_v19, 0.0 }
 0x174   :  { %v840_v23 = vpop.f32.mrb[48].mxu1 }
 0x175   :  { %1443 = vst.msk [vmem:[%s2817_s3 + $0x58] sm:$0xf] %vm1420_vm2, %v1664_v7  ;;  %v1665_v25 = vpack.c.bf16 %v1197_v9, %v1197_v9  ;;  %v841_v13 = vadd.f32 %v2445_v52, %v840_v23  ;;  %v842_v14 = vpop.f32.mrb[49].mxu1 }
 0x176   :  { %v843_v17 = vpop.f32.mrb[50].mxu1  ;;  %v2658_v37 = vpop.f32.mrb[76].mxu0 }
 0x177   :  { %1444 = vst.msk [vmem:[%s2817_s3 + $0x5c] sm:$0xf] %vm1420_vm2, %v1665_v25  ;;  %v1073_v30 = vadd.f32 %v2546_v42, %v841_v13  ;;  %v844_v18 = vadd.f32 %v2445_v52, %v843_v17  ;;  %v845_v20 = vpop.f32.mrb[51].mxu1  ;;  %v1800_v43 = vpop.f32.mrb[77].mxu0 }
 0x178   :  { %v2660_v45 = vpop.f32.mrb[78].mxu0 }
 0x179   :  { %v1198_v50 = vmax.f32 %v1073_v30, 0.0  ;;  %v1076_v34 = vadd.f32 %v2548_v49, %v844_v18  ;;  %v1801_v3 = vpop.f32.mrb[79].mxu0 }
 0x17b   :  { %v1666_v2 = vpack.c.bf16 %v1198_v50, %v1198_v50  ;;  %v1199_v24 = vmax.f32 %v1076_v34, 0.0 }
 0x17c   :  { %v848_v40 = vpop.f32.mrb[52].mxu1 }
 0x17d   :  { %1445 = vst.msk [vmem:[%s2817_s3 + $0x60] sm:$0xf] %vm1420_vm2, %v1666_v2  ;;  %v1667_v42 = vpack.c.bf16 %v1199_v24, %v1199_v24  ;;  %v849_v28 = vadd.f32 %v2445_v52, %v848_v40  ;;  %v850_v29 = vpop.f32.mrb[53].mxu1 }
 0x17e   :  { %v851_v32 = vpop.f32.mrb[54].mxu1  ;;  %v2674_v60 = vpop.f32.mrb[80].mxu0 }
 0x17f   :  { %1446 = vst.msk [vmem:[%s2817_s3 + $0x64] sm:$0xf] %vm1420_vm2, %v1667_v42  ;;  %v1081_v49 = vadd.f32 %v2562_v63, %v849_v28  ;;  %v852_v33 = vadd.f32 %v2445_v52, %v851_v32  ;;  %v853_v35 = vpop.f32.mrb[55].mxu1  ;;  %v1804_v0 = vpop.f32.mrb[81].mxu0 }
 0x180   :  { %v2676_v1 = vpop.f32.mrb[82].mxu0 }
 0x181   :  { %v1200_v56 = vmax.f32 %v1081_v49, 0.0  ;;  %v1084_v57 = vadd.f32 %v2564_v5, %v852_v33  ;;  %v1805_v19 = vpop.f32.mrb[83].mxu0 }
 0x183   :  { %v1668_v38 = vpack.c.bf16 %v1200_v56, %v1200_v56  ;;  %v1201_v39 = vmax.f32 %v1084_v57, 0.0 }
 0x184   :  { %v856_v62 = vpop.f32.mrb[56].mxu1 }
 0x185   :  { %1447 = vst.msk [vmem:[%s2817_s3 + $0x68] sm:$0xf] %vm1420_vm2, %v1668_v38  ;;  %v1669_v63 = vpack.c.bf16 %v1201_v39, %v1201_v39  ;;  %v857_v47 = vadd.f32 %v2445_v52, %v856_v62  ;;  %v858_v41 = vpop.f32.mrb[57].mxu1 }
 0x186   :  { %v859_v54 = vpop.f32.mrb[58].mxu1  ;;  %v2690_v13 = vpop.f32.mrb[84].mxu0 }
 0x187   :  { %1448 = vst.msk [vmem:[%s2817_s3 + $0x6c] sm:$0xf] %vm1420_vm2, %v1669_v63  ;;  %v1089_v5 = vadd.f32 %v2578_v16, %v857_v47  ;;  %v860_v55 = vadd.f32 %v2445_v52, %v859_v54  ;;  %v861_v58 = vpop.f32.mrb[59].mxu1  ;;  %v1808_v17 = vpop.f32.mrb[85].mxu0 }
 0x188   :  { %v2692_v18 = vpop.f32.mrb[86].mxu0 }
 0x189   :  { %v1202_v8 = vmax.f32 %v1089_v5, 0.0  ;;  %v1092_v10 = vadd.f32 %v2580_v21, %v860_v55  ;;  %v1809_v34 = vpop.f32.mrb[87].mxu0 }
 0x18b   :  { %v1670_v61 = vpack.c.bf16 %v1202_v8, %v1202_v8  ;;  %v1203_v44 = vmax.f32 %v1092_v10, 0.0 }
 0x18c   :  { %v864_v15 = vpop.f32.mrb[60].mxu1 }
 0x18d   :  { %1449 = vst.msk [vmem:[%s2817_s3 + $0x70] sm:$0xf] %vm1420_vm2, %v1670_v61  ;;  %v1671_v16 = vpack.c.bf16 %v1203_v44, %v1203_v44  ;;  %v865_v4 = vadd.f32 %v2445_v52, %v864_v15  ;;  %v866_v46 = vpop.f32.mrb[61].mxu1 }
 0x18e   :  { %v867_v7 = vpop.f32.mrb[62].mxu1  ;;  %v2706_v28 = vpop.f32.mrb[88].mxu0 }
 0x18f   :  { %1450 = vst.msk [vmem:[%s2817_s3 + $0x74] sm:$0xf] %vm1420_vm2, %v1671_v16  ;;  %v1097_v21 = vadd.f32 %v2594_v31, %v865_v4  ;;  %v868_v9 = vadd.f32 %v2445_v52, %v867_v7  ;;  %v869_v11 = vpop.f32.mrb[63].mxu1  ;;  %v1812_v32 = vpop.f32.mrb[89].mxu0 }
 0x190   :  { %v2708_v33 = vpop.f32.mrb[90].mxu0 }
 0x191   :  { %v1204_v23 = vmax.f32 %v1097_v21, 0.0  ;;  %v1100_v25 = vadd.f32 %v2596_v36, %v868_v9  ;;  %v1813_v57 = vpop.f32.mrb[91].mxu0 }
 0x193   :  { %v1672_v14 = vpack.c.bf16 %v1204_v23, %v1204_v23  ;;  %v1205_v48 = vmax.f32 %v1100_v25, 0.0 }
 0x194   :  { %v872_v30 = vpop.f32.mrb[64].mxu1 }
 0x195   :  { %1451 = vst.msk [vmem:[%s2817_s3 + $0x78] sm:$0xf] %vm1420_vm2, %v1672_v14  ;;  %v1673_v31 = vpack.c.bf16 %v1205_v48, %v1205_v48  ;;  %v873_v20 = vadd.f32 %v2445_v52, %v872_v30  ;;  %v874_v50 = vpop.f32.mrb[65].mxu1 }
 0x196   :  { %v875_v2 = vpop.f32.mrb[66].mxu1  ;;  %v2722_v47 = vpop.f32.mrb[92].mxu0 }
 0x197   :  { %1452 = vst.msk [vmem:[%s2817_s3 + $0x7c] sm:$0xf] %vm1420_vm2, %v1673_v31  ;;  %v1105_v36 = vadd.f32 %v2610_v51, %v873_v20  ;;  %v876_v24 = vadd.f32 %v2445_v52, %v875_v2  ;;  %v877_v26 = vpop.f32.mrb[67].mxu1  ;;  %v1816_v54 = vpop.f32.mrb[93].mxu0 }
 0x198   :  { %v2724_v55 = vpop.f32.mrb[94].mxu0 }
 0x199   :  { %v1206_v40 = vmax.f32 %v1105_v36, 0.0  ;;  %v1108_v42 = vadd.f32 %v2612_v59, %v876_v24  ;;  %v1817_v10 = vpop.f32.mrb[95].mxu0 }
 0x19b   :  { %v1674_v29 = vpack.c.bf16 %v1206_v40, %v1206_v40  ;;  %v1207_v53 = vmax.f32 %v1108_v42, 0.0 }
 0x19c   :  { %v880_v49 = vpop.f32.mrb[68].mxu1 }
 0x19d   :  { %1453 = vst.msk [vmem:[%s2817_s3 + $0x80] sm:$0xf] %vm1420_vm2, %v1674_v29  ;;  %v1675_v51 = vpack.c.bf16 %v1207_v53, %v1207_v53  ;;  %v881_v35 = vadd.f32 %v2445_v52, %v880_v49  ;;  %v882_v56 = vpop.f32.mrb[69].mxu1 }
 0x19e   :  { %v883_v38 = vpop.f32.mrb[70].mxu1  ;;  %v2738_v4 = vpop.f32.mrb[96].mxu0 }
 0x19f   :  { %1454 = vst.msk [vmem:[%s2817_s3 + $0x84] sm:$0xf] %vm1420_vm2, %v1675_v51  ;;  %v1113_v59 = vadd.f32 %v2626_v6, %v881_v35  ;;  %v884_v39 = vadd.f32 %v2445_v52, %v883_v38  ;;  %v885_v43 = vpop.f32.mrb[71].mxu1  ;;  %v1820_v7 = vpop.f32.mrb[97].mxu0 }
 0x1a0   :  { %v1171_v9 = vpop.f32.mrb[98].mxu0 }
 0x1a1   :  { %v1208_v62 = vmax.f32 %v1113_v59, 0.0  ;;  %v1116_v63 = vadd.f32 %v2628_v12, %v884_v39  ;;  %v1821_v25 = vpop.f32.mrb[99].mxu0 }
 0x1a3   :  { %v1676_v41 = vpack.c.bf16 %v1208_v62, %v1208_v62  ;;  %v1209_v3 = vmax.f32 %v1116_v63, 0.0 }
 0x1a4   :  { %v888_v5 = vpop.f32.mrb[72].mxu1 }
 0x1a5   :  { %1455 = vst.msk [vmem:[%s2817_s3 + $0x88] sm:$0xf] %vm1420_vm2, %v1676_v41  ;;  %v1677_v6 = vpack.c.bf16 %v1209_v3, %v1209_v3  ;;  %v889_v58 = vadd.f32 %v2445_v52, %v888_v5  ;;  %v890_v8 = vpop.f32.mrb[73].mxu1 }
 0x1a6   :  { %v891_v61 = vpop.f32.mrb[74].mxu1 }
 0x1a7   :  { %1456 = vst.msk [vmem:[%s2817_s3 + $0x8c] sm:$0xf] %vm1420_vm2, %v1677_v6  ;;  %v1121_v12 = vadd.f32 %v2642_v22, %v889_v58  ;;  %v892_v44 = vadd.f32 %v2445_v52, %v891_v61  ;;  %v893_v0 = vpop.f32.mrb[75].mxu1 }
 0x1a9   :  { %v1210_v15 = vmax.f32 %v1121_v12, 0.0  ;;  %v1124_v16 = vadd.f32 %v2644_v27, %v892_v44 }
 0x1ab   :  { %v1678_v46 = vpack.c.bf16 %v1210_v15, %v1210_v15  ;;  %v1211_v19 = vmax.f32 %v1124_v16, 0.0 }
 0x1ac   :  { %v896_v21 = vpop.f32.mrb[76].mxu1 }
 0x1ad   :  { %1457 = vst.msk [vmem:[%s2817_s3 + $0x90] sm:$0xf] %vm1420_vm2, %v1678_v46  ;;  %v1679_v11 = vpack.c.bf16 %v1211_v19, %v1211_v19  ;;  %v897_v22 = vadd.f32 %v2445_v52, %v896_v21  ;;  %v898_v23 = vpop.f32.mrb[77].mxu1 }
 0x1ae   :  { %v899_v14 = vpop.f32.mrb[78].mxu1 }
 0x1af   :  { %1458 = vst.msk [vmem:[%s2817_s3 + $0x94] sm:$0xf] %vm1420_vm2, %v1679_v11  ;;  %v1129_v27 = vadd.f32 %v2658_v37, %v897_v22  ;;  %v900_v48 = vadd.f32 %v2445_v52, %v899_v14  ;;  %v901_v17 = vpop.f32.mrb[79].mxu1 }
 0x1b1   :  { %v1212_v30 = vmax.f32 %v1129_v27, 0.0  ;;  %v1132_v31 = vadd.f32 %v2660_v45, %v900_v48 }
 0x1b3   :  { %v1680_v20 = vpack.c.bf16 %v1212_v30, %v1212_v30  ;;  %v1213_v50 = vmax.f32 %v1132_v31, 0.0 }
 0x1b4   :  { %v904_v34 = vpop.f32.mrb[80].mxu1 }
 0x1b5   :  { %1459 = vst.msk [vmem:[%s2817_s3 + $0x98] sm:$0xf] %vm1420_vm2, %v1680_v20  ;;  %v1681_v2 = vpack.c.bf16 %v1213_v50, %v1213_v50  ;;  %v905_v36 = vadd.f32 %v2445_v52, %v904_v34  ;;  %v906_v24 = vpop.f32.mrb[81].mxu1 }
 0x1b6   :  { %v907_v26 = vpop.f32.mrb[82].mxu1 }
 0x1b7   :  { %1460 = vst.msk [vmem:[%s2817_s3 + $0x9c] sm:$0xf] %vm1420_vm2, %v1681_v2  ;;  %v1137_v37 = vadd.f32 %v2674_v60, %v905_v36  ;;  %v908_v45 = vadd.f32 %v2445_v52, %v907_v26  ;;  %v909_v40 = vpop.f32.mrb[83].mxu1 }
 0x1b9   :  { %v1214_v42 = vmax.f32 %v1137_v37, 0.0  ;;  %v1140_v29 = vadd.f32 %v2676_v1, %v908_v45 }
 0x1bb   :  { %v1682_v53 = vpack.c.bf16 %v1214_v42, %v1214_v42  ;;  %v1215_v32 = vmax.f32 %v1140_v29, 0.0 }
 0x1bc   :  { %v912_v49 = vpop.f32.mrb[84].mxu1 }
 0x1bd   :  { %1461 = vst.msk [vmem:[%s2817_s3 + $0xa0] sm:$0xf] %vm1420_vm2, %v1682_v53  ;;  %v1683_v51 = vpack.c.bf16 %v1215_v32, %v1215_v32  ;;  %v913_v35 = vadd.f32 %v2445_v52, %v912_v49  ;;  %v914_v56 = vpop.f32.mrb[85].mxu1 }
 0x1be   :  { %v915_v57 = vpop.f32.mrb[86].mxu1 }
 0x1bf   :  { %1462 = vst.msk [vmem:[%s2817_s3 + $0xa4] sm:$0xf] %vm1420_vm2, %v1683_v51  ;;  %v1145_v60 = vadd.f32 %v2690_v13, %v913_v35  ;;  %v916_v1 = vadd.f32 %v2445_v52, %v915_v57  ;;  %v917_v38 = vpop.f32.mrb[87].mxu1 }
 0x1c1   :  { %v1216_v59 = vmax.f32 %v1145_v60, 0.0  ;;  %v1148_v39 = vadd.f32 %v2692_v18, %v916_v1 }
 0x1c3   :  { %v1684_v43 = vpack.c.bf16 %v1216_v59, %v1216_v59  ;;  %v1217_v62 = vmax.f32 %v1148_v39, 0.0 }
 0x1c4   :  { %v920_v63 = vpop.f32.mrb[88].mxu1 }
 0x1c5   :  { %1463 = vst.msk [vmem:[%s2817_s3 + $0xa8] sm:$0xf] %vm1420_vm2, %v1684_v43  ;;  %v1685_v41 = vpack.c.bf16 %v1217_v62, %v1217_v62  ;;  %v921_v3 = vadd.f32 %v2445_v52, %v920_v63  ;;  %v922_v54 = vpop.f32.mrb[89].mxu1 }
 0x1c6   :  { %v923_v5 = vpop.f32.mrb[90].mxu1 }
 0x1c7   :  { %1464 = vst.msk [vmem:[%s2817_s3 + $0xac] sm:$0xf] %vm1420_vm2, %v1685_v41  ;;  %v1153_v13 = vadd.f32 %v2706_v28, %v921_v3  ;;  %v924_v18 = vadd.f32 %v2445_v52, %v923_v5  ;;  %v925_v6 = vpop.f32.mrb[91].mxu1 }
 0x1c9   :  { %v1218_v58 = vmax.f32 %v1153_v13, 0.0  ;;  %v1156_v8 = vadd.f32 %v2708_v33, %v924_v18 }
 0x1cb   :  { %v1686_v10 = vpack.c.bf16 %v1218_v58, %v1218_v58  ;;  %v1219_v61 = vmax.f32 %v1156_v8, 0.0 }
 0x1cc   :  { %v928_v12 = vpop.f32.mrb[92].mxu1 }
 0x1cd   :  { %1465 = vst.msk [vmem:[%s2817_s3 + $0xb0] sm:$0xf] %vm1420_vm2, %v1686_v10  ;;  %v1687_v44 = vpack.c.bf16 %v1219_v61, %v1219_v61  ;;  %v929_v0 = vadd.f32 %v2445_v52, %v928_v12  ;;  %v930_v15 = vpop.f32.mrb[93].mxu1 }
 0x1ce   :  { %v931_v16 = vpop.f32.mrb[94].mxu1 }
 0x1cf   :  { %1466 = vst.msk [vmem:[%s2817_s3 + $0xb4] sm:$0xf] %vm1420_vm2, %v1687_v44  ;;  %v1161_v28 = vadd.f32 %v2722_v47, %v929_v0  ;;  %v932_v33 = vadd.f32 %v2445_v52, %v931_v16  ;;  %v933_v46 = vpop.f32.mrb[95].mxu1 }
 0x1d1   :  { %v1220_v19 = vmax.f32 %v1161_v28, 0.0  ;;  %v1164_v7 = vadd.f32 %v2724_v55, %v932_v33 }
 0x1d3   :  { %v1688_v21 = vpack.c.bf16 %v1220_v19, %v1220_v19  ;;  %v1221_v9 = vmax.f32 %v1164_v7, 0.0 }
 0x1d4   :  { %v936_v11 = vpop.f32.mrb[96].mxu1 }
 0x1d5   :  { %1467 = vst.msk [vmem:[%s2817_s3 + $0xb8] sm:$0xf] %vm1420_vm2, %v1688_v21  ;;  %v1689_v22 = vpack.c.bf16 %v1221_v9, %v1221_v9  ;;  %v937_v23 = vadd.f32 %v2445_v52, %v936_v11  ;;  %v938_v25 = vpop.f32.mrb[97].mxu1 }
 0x1d6   :  { %v939_v14 = vpop.f32.mrb[98].mxu1 }
 0x1d7   :  { %1468 = vst.msk [vmem:[%s2817_s3 + $0xbc] sm:$0xf] %vm1420_vm2, %v1689_v22  ;;  %v1169_v47 = vadd.f32 %v2738_v4, %v937_v23  ;;  %v940_v55 = vpop.f32.mrb[99].mxu1 }
 0x1d9   :  { %v1222_v27 = vmax.f32 %v1169_v47, 0.0 }
 0x1db   :  { %v1690_v48 = vpack.c.bf16 %v1222_v27, %v1222_v27 }
 0x1dd   :  { %1469 = vst.msk [vmem:[%s2817_s3 + $0xc0] sm:$0xf] %vm1420_vm2, %v1690_v48 }

// kernel: cnn_encoder_forward.5
= control target key start
LH: loop header
LB: loop body
LE: loop exit
PB: predicated region body
PF: predicated region fallthrough
CT: control target
= control target key end

     0   :  { %vm2485_vm0 = vcmask 523264   ;;  %s5704_s1 = inlined_call_operand.vmem [shape: bf16[3136,256], index: 1, kind: input, shape index: {}]   ;;  %s5705_s0 = inlined_call_operand.vmem [shape: bf16[8,3136], index: 0, kind: input, shape index: {}]   ;;  %s5706_s3 = inlined_call_operand.vmem [shape: bf16[256,128], index: 3, kind: input, shape index: {}]   ;;  %s5707_s2 = inlined_call_operand.vmem [shape: f32[1,256], index: 2, kind: input, shape index: {}]   ;;  %s5708_s4 = inlined_call_operand.vmem [shape: f32[1,128], index: 4, kind: input, shape index: {}]   ;;  %s5709_s5 = inlined_call_operand.vmem [shape: f32[8,128], index: 5, kind: output, shape index: {}]  }
   0x1   :  { %v3712_v0 = vld [vmem:[%s5704_s1 + $0x4] ss:$8 sps:$4 sm:$0xff]   ;;  %v3716_v2 = vld [vmem:[%s5704_s1] ss:$8 sps:$4 sm:$0xff]   ;;  %v3718_v4 = vld [vmem:[%s5704_s1 + $0x14] ss:$8 sps:$4 sm:$0xff]  }
   0x2   :  { %v3714_v1 = vld [vmem:[%s5704_s1 + $0x604] ss:$8 sps:$4 sm:$0xff]   ;;  %2489 = vmatprep.subr.bf16.mxu1 %v3712_v0  ;;  %v3717_v3 = vld [vmem:[%s5704_s1 + $0x600] ss:$8 sps:$4 sm:$0xff]   ;;  %v3720_v5 = vld [vmem:[%s5704_s1 + $0x614] ss:$8 sps:$4 sm:$0xff]  }
   0x3   :  { %2735 = vmatprep.subr.bf16.mxu0 %v3714_v1  ;;  %2490 = vmatpush1.bf16.msra.mxu1 %v3716_v2  ;;  %v3722_v6 = vld [vmem:[%s5704_s1 + $0x10] ss:$8 sps:$4 sm:$0xff]   ;;  %v3724_v8 = vld [vmem:[%s5704_s1 + $0x24] ss:$8 sps:$4 sm:$0xff]   ;;  %v3728_v10 = vld [vmem:[%s5704_s1 + $0x20] ss:$8 sps:$4 sm:$0xff]  }
   0x4   :  { %2736 = vmatpush1.bf16.msra.mxu0 %v3717_v3  ;;  %2491 = vmatprep.subr.bf16.mxu1 %v3718_v4  ;;  %v3723_v7 = vld [vmem:[%s5704_s1 + $0x610] ss:$8 sps:$4 sm:$0xff]   ;;  %v3726_v9 = vld [vmem:[%s5704_s1 + $0x624] ss:$8 sps:$4 sm:$0xff]   ;;  %v3729_v11 = vld [vmem:[%s5704_s1 + $0x620] ss:$8 sps:$4 sm:$0xff]  }
   0x5   :  { %2737 = vmatprep.subr.bf16.mxu0 %v3720_v5  ;;  %v3730_v12 = vld [vmem:[%s5704_s1 + $0x34] ss:$8 sps:$4 sm:$0xff]   ;;  %v3734_v14 = vld [vmem:[%s5704_s1 + $0x30] ss:$8 sps:$4 sm:$0xff]   ;;  %v3736_v16 = vld [vmem:[%s5704_s1 + $0x44] ss:$8 sps:$4 sm:$0xff]  }
   0x6   :  { %v3732_v13 = vld [vmem:[%s5704_s1 + $0x634] ss:$8 sps:$4 sm:$0xff]   ;;  %v3735_v15 = vld [vmem:[%s5704_s1 + $0x630] ss:$8 sps:$4 sm:$0xff]   ;;  %v3738_v17 = vld [vmem:[%s5704_s1 + $0x644] ss:$8 sps:$4 sm:$0xff]  }
   0x7   :  { %2492 = vmatpush1.bf16.msra.mxu1 %v3722_v6  ;;  %v3740_v18 = vld [vmem:[%s5704_s1 + $0x40] ss:$8 sps:$4 sm:$0xff]   ;;  %v3742_v20 = vld [vmem:[%s5704_s1 + $0x54] ss:$8 sps:$4 sm:$0xff]   ;;  %v3746_v22 = vld [vmem:[%s5704_s1 + $0x50] ss:$8 sps:$4 sm:$0xff]  }
   0x8   :  { %2738 = vmatpush1.bf16.msra.mxu0 %v3723_v7  ;;  %2493 = vmatprep.subr.bf16.mxu1 %v3724_v8  ;;  %v3741_v19 = vld [vmem:[%s5704_s1 + $0x640] ss:$8 sps:$4 sm:$0xff]   ;;  %v3744_v21 = vld [vmem:[%s5704_s1 + $0x654] ss:$8 sps:$4 sm:$0xff]   ;;  %v3747_v23 = vld [vmem:[%s5704_s1 + $0x650] ss:$8 sps:$4 sm:$0xff]  }
   0x9   :  { %2739 = vmatprep.subr.bf16.mxu0 %v3726_v9  ;;  %v3748_v24 = vld [vmem:[%s5704_s1 + $0x64] ss:$8 sps:$4 sm:$0xff]   ;;  %v3752_v26 = vld [vmem:[%s5704_s1 + $0x60] ss:$8 sps:$4 sm:$0xff]   ;;  %v3754_v28 = vld [vmem:[%s5704_s1 + $0x74] ss:$8 sps:$4 sm:$0xff]  }
   0xa   :  { %v3750_v25 = vld [vmem:[%s5704_s1 + $0x664] ss:$8 sps:$4 sm:$0xff]   ;;  %v3753_v27 = vld [vmem:[%s5704_s1 + $0x660] ss:$8 sps:$4 sm:$0xff]   ;;  %v3756_v29 = vld [vmem:[%s5704_s1 + $0x674] ss:$8 sps:$4 sm:$0xff]  }
   0xb   :  { %2494 = vmatpush1.bf16.msra.mxu1 %v3728_v10  ;;  %v3758_v30 = vld [vmem:[%s5704_s1 + $0x70] ss:$8 sps:$4 sm:$0xff]   ;;  %v3760_v32 = vld [vmem:[%s5704_s1 + $0x84] ss:$8 sps:$4 sm:$0xff]   ;;  %v3764_v34 = vld [vmem:[%s5704_s1 + $0x80] ss:$8 sps:$4 sm:$0xff]  }
   0xc   :  { %2740 = vmatpush1.bf16.msra.mxu0 %v3729_v11  ;;  %2495 = vmatprep.subr.bf16.mxu1 %v3730_v12  ;;  %v3759_v31 = vld [vmem:[%s5704_s1 + $0x670] ss:$8 sps:$4 sm:$0xff]   ;;  %v3762_v33 = vld [vmem:[%s5704_s1 + $0x684] ss:$8 sps:$4 sm:$0xff]   ;;  %v3765_v35 = vld [vmem:[%s5704_s1 + $0x680] ss:$8 sps:$4 sm:$0xff]  }
   0xd   :  { %2741 = vmatprep.subr.bf16.mxu0 %v3732_v13  ;;  %v3766_v36 = vld [vmem:[%s5704_s1 + $0x94] ss:$8 sps:$4 sm:$0xff]   ;;  %v3770_v38 = vld [vmem:[%s5704_s1 + $0x90] ss:$8 sps:$4 sm:$0xff]   ;;  %v3772_v40 = vld [vmem:[%s5704_s1 + $0xa4] ss:$8 sps:$4 sm:$0xff]  }
   0xe   :  { %v3768_v37 = vld [vmem:[%s5704_s1 + $0x694] ss:$8 sps:$4 sm:$0xff]   ;;  %v3771_v39 = vld [vmem:[%s5704_s1 + $0x690] ss:$8 sps:$4 sm:$0xff]   ;;  %v3774_v41 = vld [vmem:[%s5704_s1 + $0x6a4] ss:$8 sps:$4 sm:$0xff]  }
   0xf   :  { %2496 = vmatpush1.bf16.msra.mxu1 %v3734_v14  ;;  %v3776_v42 = vld [vmem:[%s5704_s1 + $0xa0] ss:$8 sps:$4 sm:$0xff]   ;;  %v3778_v44 = vld [vmem:[%s5704_s1 + $0xb4] ss:$8 sps:$4 sm:$0xff]   ;;  %v3782_v47 = vld [vmem:[%s5704_s1 + $0xb0] ss:$8 sps:$4 sm:$0xff]  }
  0x10   :  { %2742 = vmatpush1.bf16.msra.mxu0 %v3735_v15  ;;  %2497 = vmatprep.subr.bf16.mxu1 %v3736_v16  ;;  %v3777_v43 = vld [vmem:[%s5704_s1 + $0x6a0] ss:$8 sps:$4 sm:$0xff]   ;;  %v3780_v45 = vld [vmem:[%s5704_s1 + $0x6b4] ss:$8 sps:$4 sm:$0xff]   ;;  %v3783_v49 = vld [vmem:[%s5704_s1 + $0x6b0] ss:$8 sps:$4 sm:$0xff]  }
  0x11   :  { %2743 = vmatprep.subr.bf16.mxu0 %v3738_v17  ;;  %v21_v46 = vld [vmem:[%s5705_s0] sm:$0xff]  ;;  %v27_v50 = vld [vmem:[%s5705_s0 + $0x30] sm:$0xff] }
  0x12   :  { %v3207_v48 = vcombine.high %v21_v46, %v21_v46  ;;  %v3784_v51 = vld [vmem:[%s5704_s1 + $0xc4] ss:$8 sps:$4 sm:$0xff]   ;;  %v3219_v53 = vcombine.high %v27_v50, %v27_v50  ;;  %v3788_v54 = vld [vmem:[%s5704_s1 + $0xc0] ss:$8 sps:$4 sm:$0xff]   ;;  %v3790_v56 = vld [vmem:[%s5704_s1 + $0xd4] ss:$8 sps:$4 sm:$0xff]   ;;  %v3206_v6 = vcombine.low %v21_v46, %v21_v46  ;;  %v3218_v7 = vcombine.low %v27_v50, %v27_v50 }
  0x13   :  { %2498 = vmatpush1.bf16.msra.mxu1 %v3740_v18  ;;  %v3786_v52 = vld [vmem:[%s5704_s1 + $0x6c4] ss:$8 sps:$4 sm:$0xff]   ;;  %v3789_v55 = vld [vmem:[%s5704_s1 + $0x6c0] ss:$8 sps:$4 sm:$0xff]   ;;  %v3792_v57 = vld [vmem:[%s5704_s1 + $0x6d4] ss:$8 sps:$4 sm:$0xff]  }
  0x14   :  { %2744 = vmatpush1.bf16.msra.mxu0 %v3741_v19  ;;  %2499 = vmatprep.subr.bf16.mxu1 %v3742_v20  ;;  %v3794_v58 = vld [vmem:[%s5704_s1 + $0xd0] ss:$8 sps:$4 sm:$0xff]   ;;  %v3796_v60 = vld [vmem:[%s5704_s1 + $0xe4] ss:$8 sps:$4 sm:$0xff]   ;;  %v3800_v62 = vld [vmem:[%s5704_s1 + $0xe0] ss:$8 sps:$4 sm:$0xff]  }
  0x15   :  { %2745 = vmatprep.subr.bf16.mxu0 %v3744_v21  ;;  %2521 = vmatprep.mubr.bf16.mxu1 %v3207_v48  ;;  %v3795_v59 = vld [vmem:[%s5704_s1 + $0x6d0] ss:$8 sps:$4 sm:$0xff]   ;;  %v3798_v61 = vld [vmem:[%s5704_s1 + $0x6e4] ss:$8 sps:$4 sm:$0xff]   ;;  %v3801_v63 = vld [vmem:[%s5704_s1 + $0x6e0] ss:$8 sps:$4 sm:$0xff]  }
  0x16   :  { %2767 = vmatprep.mubr.bf16.mxu0 %v3219_v53  ;;  %v3802_v0 = vld [vmem:[%s5704_s1 + $0xf4] ss:$8 sps:$4 sm:$0xff]   ;;  %v3806_v2 = vld [vmem:[%s5704_s1 + $0xf0] ss:$8 sps:$4 sm:$0xff]   ;;  %v3812_v4 = vld [vmem:[%s5704_s1 + $0x104] ss:$8 sps:$4 sm:$0xff]  }
  0x17   :  { %2500 = vmatpush1.bf16.msra.mxu1 %v3746_v22  ;;  %v3804_v1 = vld [vmem:[%s5704_s1 + $0x6f4] ss:$8 sps:$4 sm:$0xff]   ;;  %v3807_v3 = vld [vmem:[%s5704_s1 + $0x6f0] ss:$8 sps:$4 sm:$0xff]   ;;  %v3817_v5 = vld [vmem:[%s5704_s1 + $0x704] ss:$8 sps:$4 sm:$0xff]  }
  0x18   :  { %2746 = vmatpush1.bf16.msra.mxu0 %v3747_v23  ;;  %2501 = vmatprep.subr.bf16.mxu1 %v3748_v24  ;;  %v3810_v8 = vld [vmem:[%s5704_s1 + $0x100] ss:$8 sps:$4 sm:$0xff]   ;;  %v3820_v10 = vld [vmem:[%s5704_s1 + $0x114] ss:$8 sps:$4 sm:$0xff]   ;;  %v3818_v12 = vld [vmem:[%s5704_s1 + $0x110] ss:$8 sps:$4 sm:$0xff]  }
  0x19   :  { %2747 = vmatprep.subr.bf16.mxu0 %v3750_v25  ;;  %v3815_v9 = vld [vmem:[%s5704_s1 + $0x700] ss:$8 sps:$4 sm:$0xff]   ;;  %v3823_v11 = vld [vmem:[%s5704_s1 + $0x714] ss:$8 sps:$4 sm:$0xff]   ;;  %v3821_v13 = vld [vmem:[%s5704_s1 + $0x710] ss:$8 sps:$4 sm:$0xff]  }
  0x1a   :  { %v3826_v14 = vld [vmem:[%s5704_s1 + $0x124] ss:$8 sps:$4 sm:$0xff]   ;;  %v3824_v16 = vld [vmem:[%s5704_s1 + $0x120] ss:$8 sps:$4 sm:$0xff]   ;;  %v3832_v18 = vld [vmem:[%s5704_s1 + $0x134] ss:$8 sps:$4 sm:$0xff]  }
  0x1b   :  { %2502 = vmatpush1.bf16.msra.mxu1 %v3752_v26  ;;  %v3829_v15 = vld [vmem:[%s5704_s1 + $0x724] ss:$8 sps:$4 sm:$0xff]   ;;  %v3827_v17 = vld [vmem:[%s5704_s1 + $0x720] ss:$8 sps:$4 sm:$0xff]   ;;  %v3835_v19 = vld [vmem:[%s5704_s1 + $0x734] ss:$8 sps:$4 sm:$0xff]  }
  0x1c   :  { %2748 = vmatpush1.bf16.msra.mxu0 %v3753_v27  ;;  %2503 = vmatprep.subr.bf16.mxu1 %v3754_v28  ;;  %v3830_v20 = vld [vmem:[%s5704_s1 + $0x130] ss:$8 sps:$4 sm:$0xff]   ;;  %v3838_v22 = vld [vmem:[%s5704_s1 + $0x144] ss:$8 sps:$4 sm:$0xff]   ;;  %v3836_v24 = vld [vmem:[%s5704_s1 + $0x140] ss:$8 sps:$4 sm:$0xff]  }
  0x1d   :  { %2749 = vmatprep.subr.bf16.mxu0 %v3756_v29  ;;  %v3833_v21 = vld [vmem:[%s5704_s1 + $0x730] ss:$8 sps:$4 sm:$0xff]   ;;  %v3841_v23 = vld [vmem:[%s5704_s1 + $0x744] ss:$8 sps:$4 sm:$0xff]   ;;  %v3839_v25 = vld [vmem:[%s5704_s1 + $0x740] ss:$8 sps:$4 sm:$0xff]  }
  0x1e   :  { %v3844_v26 = vld [vmem:[%s5704_s1 + $0x154] ss:$8 sps:$4 sm:$0xff]   ;;  %v3842_v28 = vld [vmem:[%s5704_s1 + $0x150] ss:$8 sps:$4 sm:$0xff]   ;;  %v3874_v50 = vld [vmem:[%s5704_s1 + $0x1a4] ss:$8 sps:$4 sm:$0xff]  }
  0x1f   :  { %2504 = vmatpush1.bf16.msra.mxu1 %v3758_v30  ;;  %v3847_v27 = vld [vmem:[%s5704_s1 + $0x754] ss:$8 sps:$4 sm:$0xff]   ;;  %v3845_v29 = vld [vmem:[%s5704_s1 + $0x750] ss:$8 sps:$4 sm:$0xff]   ;;  %v3850_v30 = vld [vmem:[%s5704_s1 + $0x164] ss:$8 sps:$4 sm:$0xff]  }
  0x20   :  { %2750 = vmatpush1.bf16.msra.mxu0 %v3759_v31  ;;  %2505 = vmatprep.subr.bf16.mxu1 %v3760_v32  ;;  %v3853_v31 = vld [vmem:[%s5704_s1 + $0x764] ss:$8 sps:$4 sm:$0xff]   ;;  %v3868_v46 = vld [vmem:[%s5704_s1 + $0x194] ss:$8 sps:$4 sm:$0xff]   ;;  %v3866_v48 = vld [vmem:[%s5704_s1 + $0x190] ss:$8 sps:$4 sm:$0xff]  }
  0x21   :  { %2751 = vmatprep.subr.bf16.mxu0 %v3762_v33  ;;  %v4651_v32 = vld [vmem:[%s5705_s0 + $0x8] sm:$0xff] }
  0x22   :  { %v3848_v33 = vld [vmem:[%s5704_s1 + $0x160] ss:$8 sps:$4 sm:$0xff]  }
  0x23   :  { %2506 = vmatpush1.bf16.msra.mxu1 %v3764_v34  ;;  %v3851_v34 = vld [vmem:[%s5704_s1 + $0x760] ss:$8 sps:$4 sm:$0xff]  }
  0x24   :  { %2752 = vmatpush1.bf16.msra.mxu0 %v3765_v35  ;;  %2507 = vmatprep.subr.bf16.mxu1 %v3766_v36  ;;  %v3209_v35 = vcombine.high %v4651_v32, %v4651_v32  ;;  %v4664_v36 = vld [vmem:[%s5705_s0 + $0x38] sm:$0xff]  ;;  %v3875_v53 = vld [vmem:[%s5704_s1 + $0x7a0] ss:$8 sps:$4 sm:$0xff]  }
  0x25   :  { %2753 = vmatprep.subr.bf16.mxu0 %v3768_v37  ;;  %v3856_v37 = vld [vmem:[%s5704_s1 + $0x174] ss:$8 sps:$4 sm:$0xff]  }
  0x27   :  { %2508 = vmatpush1.bf16.msra.mxu1 %v3770_v38  ;;  %v3221_v38 = vcombine.high %v4664_v36, %v4664_v36 }
  0x28   :  { %2754 = vmatpush1.bf16.msra.mxu0 %v3771_v39  ;;  %2509 = vmatprep.subr.bf16.mxu1 %v3772_v40  ;;  %v3859_v39 = vld [vmem:[%s5704_s1 + $0x774] ss:$8 sps:$4 sm:$0xff]   ;;  %v3854_v40 = vld [vmem:[%s5704_s1 + $0x170] ss:$8 sps:$4 sm:$0xff]  }
  0x29   :  { %2755 = vmatprep.subr.bf16.mxu0 %v3774_v41  ;;  %v3857_v41 = vld [vmem:[%s5704_s1 + $0x770] ss:$8 sps:$4 sm:$0xff]  }
  0x2b   :  { %2510 = vmatpush1.bf16.msra.mxu1 %v3776_v42  ;;  %v3862_v42 = vld [vmem:[%s5704_s1 + $0x184] ss:$8 sps:$4 sm:$0xff]  }
  0x2c   :  { %2756 = vmatpush1.bf16.msra.mxu0 %v3777_v43  ;;  %2511 = vmatprep.subr.bf16.mxu1 %v3778_v44  ;;  %v3865_v43 = vld [vmem:[%s5704_s1 + $0x784] ss:$8 sps:$4 sm:$0xff]   ;;  %v3860_v44 = vld [vmem:[%s5704_s1 + $0x180] ss:$8 sps:$4 sm:$0xff]  }
  0x2d   :  { %2757 = vmatprep.subr.bf16.mxu0 %v3780_v45  ;;  %v3863_v45 = vld [vmem:[%s5704_s1 + $0x780] ss:$8 sps:$4 sm:$0xff]  }
  0x2f   :  { %2512 = vmatpush1.bf16.msra.mxu1 %v3782_v47  ;;  %v3871_v47 = vld [vmem:[%s5704_s1 + $0x794] ss:$8 sps:$4 sm:$0xff]  }
  0x30   :  { %2758 = vmatpush1.bf16.msra.mxu0 %v3783_v49  ;;  %2513 = vmatprep.subr.bf16.mxu1 %v3784_v51  ;;  %v3869_v49 = vld [vmem:[%s5704_s1 + $0x790] ss:$8 sps:$4 sm:$0xff]   ;;  %v3877_v51 = vld [vmem:[%s5704_s1 + $0x7a4] ss:$8 sps:$4 sm:$0xff]  }
  0x31   :  { %2759 = vmatprep.subr.bf16.mxu0 %v3786_v52  ;;  %v3872_v52 = vld [vmem:[%s5704_s1 + $0x1a0] ss:$8 sps:$4 sm:$0xff]  }
  0x33   :  { %2514 = vmatpush1.bf16.msra.mxu1 %v3788_v54  ;;  %v3880_v54 = vld [vmem:[%s5704_s1 + $0x1b4] ss:$8 sps:$4 sm:$0xff]  }
  0x34   :  { %2760 = vmatpush1.bf16.msra.mxu0 %v3789_v55  ;;  %2515 = vmatprep.subr.bf16.mxu1 %v3790_v56  ;;  %v3883_v55 = vld [vmem:[%s5704_s1 + $0x7b4] ss:$8 sps:$4 sm:$0xff]   ;;  %v3878_v56 = vld [vmem:[%s5704_s1 + $0x1b0] ss:$8 sps:$4 sm:$0xff]  }
  0x35   :  { %2761 = vmatprep.subr.bf16.mxu0 %v3792_v57  ;;  %v3881_v57 = vld [vmem:[%s5704_s1 + $0x7b0] ss:$8 sps:$4 sm:$0xff]  }
  0x37   :  { %2516 = vmatpush1.bf16.msra.mxu1 %v3794_v58  ;;  %v3886_v58 = vld [vmem:[%s5704_s1 + $0x1c4] ss:$8 sps:$4 sm:$0xff]  }
  0x38   :  { %2762 = vmatpush1.bf16.msra.mxu0 %v3795_v59  ;;  %2517 = vmatprep.subr.bf16.mxu1 %v3796_v60  ;;  %v3889_v59 = vld [vmem:[%s5704_s1 + $0x7c4] ss:$8 sps:$4 sm:$0xff]   ;;  %v3884_v60 = vld [vmem:[%s5704_s1 + $0x1c0] ss:$8 sps:$4 sm:$0xff]  }
  0x39   :  { %2763 = vmatprep.subr.bf16.mxu0 %v3798_v61  ;;  %v3887_v61 = vld [vmem:[%s5704_s1 + $0x7c0] ss:$8 sps:$4 sm:$0xff]  }
  0x3b   :  { %2518 = vmatpush1.bf16.msra.mxu1 %v3800_v62  ;;  %v3892_v62 = vld [vmem:[%s5704_s1 + $0x1d4] ss:$8 sps:$4 sm:$0xff]  }
  0x3c   :  { %2764 = vmatpush1.bf16.msra.mxu0 %v3801_v63  ;;  %2519 = vmatprep.subr.bf16.mxu1 %v3802_v0  ;;  %v3895_v63 = vld [vmem:[%s5704_s1 + $0x7d4] ss:$8 sps:$4 sm:$0xff]   ;;  %v3890_v0 = vld [vmem:[%s5704_s1 + $0x1d0] ss:$8 sps:$4 sm:$0xff]  }
  0x3d   :  { %2765 = vmatprep.subr.bf16.mxu0 %v3804_v1  ;;  %v3893_v1 = vld [vmem:[%s5704_s1 + $0x7d0] ss:$8 sps:$4 sm:$0xff]  }
  0x3f   :  { %2520 = vmatpush1.bf16.msra.mxu1 %v3806_v2  ;;  %v3898_v2 = vld [vmem:[%s5704_s1 + $0x1e4] ss:$8 sps:$4 sm:$0xff]  }
  0x40   :  { %2766 = vmatpush1.bf16.msra.mxu0 %v3807_v3  ;;  %2530 = vmatprep.subr.bf16.mxu1 %v3812_v4  ;;  %v3901_v3 = vld [vmem:[%s5704_s1 + $0x7e4] ss:$8 sps:$4 sm:$0xff]   ;;  %v3896_v4 = vld [vmem:[%s5704_s1 + $0x1e0] ss:$8 sps:$4 sm:$0xff]  }
  0x41   :  { %2776 = vmatprep.subr.bf16.mxu0 %v3817_v5  ;;  %v3899_v5 = vld [vmem:[%s5704_s1 + $0x7e0] ss:$8 sps:$4 sm:$0xff]  }
  0x42   :  { %2522 = vmatmul.mubr.bf16.vlgmr.msra.gmra.mrb[0].mxu1 %v3206_v6  ;;  %v3904_v6 = vld [vmem:[%s5704_s1 + $0x1f4] ss:$8 sps:$4 sm:$0xff]  }
  0x43   :  { %2768 = vmatmul.mubr.bf16.vlgmr.msra.gmra.mrb[0].mxu0 %v3218_v7  ;;  %2531 = vmatpush1.bf16.msra.mxu1 %v3810_v8  ;;  %v3907_v7 = vld [vmem:[%s5704_s1 + $0x7f4] ss:$8 sps:$4 sm:$0xff]   ;;  %v3902_v8 = vld [vmem:[%s5704_s1 + $0x1f0] ss:$8 sps:$4 sm:$0xff]  }
  0x44   :  { %2777 = vmatpush1.bf16.msra.mxu0 %v3815_v9  ;;  %2532 = vmatprep.subr.bf16.mxu1 %v3820_v10  ;;  %v3905_v9 = vld [vmem:[%s5704_s1 + $0x7f0] ss:$8 sps:$4 sm:$0xff]   ;;  %v3912_v10 = vld [vmem:[%s5704_s1 + $0x204] ss:$8 sps:$4 sm:$0xff]  }
  0x45   :  { %2778 = vmatprep.subr.bf16.mxu0 %v3823_v11  ;;  %2562 = vmatprep.mubr.bf16.mxu1 %v3209_v35  ;;  %v3917_v11 = vld [vmem:[%s5704_s1 + $0x804] ss:$8 sps:$4 sm:$0xff]   ;;  %v3939_v35 = vld [vmem:[%s5704_s1 + $0x840] ss:$8 sps:$4 sm:$0xff]  }
  0x46   :  { %2808 = vmatprep.mubr.bf16.mxu0 %v3221_v38  ;;  %v3942_v38 = vld [vmem:[%s5704_s1 + $0x250] ss:$8 sps:$4 sm:$0xff]  }
  0x47   :  { %2533 = vmatpush1.bf16.msra.mxu1 %v3818_v12  ;;  %v3208_v12 = vcombine.low %v4651_v32, %v4651_v32  ;;  %v3938_v32 = vld [vmem:[%s5704_s1 + $0x244] ss:$8 sps:$4 sm:$0xff]  }
  0x48   :  { %2779 = vmatpush1.bf16.msra.mxu0 %v3821_v13  ;;  %2534 = vmatprep.subr.bf16.mxu1 %v3826_v14  ;;  %v3910_v13 = vld [vmem:[%s5704_s1 + $0x200] ss:$8 sps:$4 sm:$0xff]   ;;  %v3220_v14 = vcombine.low %v4664_v36, %v4664_v36  ;;  %v3944_v36 = vld [vmem:[%s5704_s1 + $0x254] ss:$8 sps:$4 sm:$0xff]  }
  0x49   :  { %2780 = vmatprep.subr.bf16.mxu0 %v3829_v15  ;;  %v3915_v15 = vld [vmem:[%s5704_s1 + $0x800] ss:$8 sps:$4 sm:$0xff]  }
  0x4b   :  { %2535 = vmatpush1.bf16.msra.mxu1 %v3824_v16  ;;  %v3920_v16 = vld [vmem:[%s5704_s1 + $0x214] ss:$8 sps:$4 sm:$0xff]  }
  0x4c   :  { %2781 = vmatpush1.bf16.msra.mxu0 %v3827_v17  ;;  %2536 = vmatprep.subr.bf16.mxu1 %v3832_v18  ;;  %v3923_v17 = vld [vmem:[%s5704_s1 + $0x814] ss:$8 sps:$4 sm:$0xff]  }
  0x4d   :  { %2782 = vmatprep.subr.bf16.mxu0 %v3835_v19  ;;  %v4801_v18 = vld [vmem:[%s5705_s0 + $0x10] sm:$0xff] }
  0x4e   :  { %v3211_v19 = vcombine.high %v4801_v18, %v4801_v18 }
  0x4f   :  { %2537 = vmatpush1.bf16.msra.mxu1 %v3830_v20  ;;  %v4808_v20 = vld [vmem:[%s5705_s0 + $0x40] sm:$0xff] }
  0x50   :  { %2783 = vmatpush1.bf16.msra.mxu0 %v3833_v21  ;;  %2538 = vmatprep.subr.bf16.mxu1 %v3838_v22  ;;  %v3918_v21 = vld [vmem:[%s5704_s1 + $0x210] ss:$8 sps:$4 sm:$0xff]  }
  0x51   :  { %2784 = vmatprep.subr.bf16.mxu0 %v3841_v23  ;;  %v3921_v22 = vld [vmem:[%s5704_s1 + $0x810] ss:$8 sps:$4 sm:$0xff]   ;;  %v3223_v23 = vcombine.high %v4808_v20, %v4808_v20 }
  0x53   :  { %2539 = vmatpush1.bf16.msra.mxu1 %v3836_v24  ;;  %v3926_v24 = vld [vmem:[%s5704_s1 + $0x224] ss:$8 sps:$4 sm:$0xff]  }
  0x54   :  { %2785 = vmatpush1.bf16.msra.mxu0 %v3839_v25  ;;  %2540 = vmatprep.subr.bf16.mxu1 %v3844_v26  ;;  %v3929_v25 = vld [vmem:[%s5704_s1 + $0x824] ss:$8 sps:$4 sm:$0xff]   ;;  %v3924_v26 = vld [vmem:[%s5704_s1 + $0x220] ss:$8 sps:$4 sm:$0xff]  }
  0x55   :  { %2786 = vmatprep.subr.bf16.mxu0 %v3847_v27  ;;  %v3927_v27 = vld [vmem:[%s5704_s1 + $0x820] ss:$8 sps:$4 sm:$0xff]  }
  0x57   :  { %2541 = vmatpush1.bf16.msra.mxu1 %v3842_v28  ;;  %v3932_v28 = vld [vmem:[%s5704_s1 + $0x234] ss:$8 sps:$4 sm:$0xff]  }
  0x58   :  { %2787 = vmatpush1.bf16.msra.mxu0 %v3845_v29  ;;  %2542 = vmatprep.subr.bf16.mxu1 %v3850_v30  ;;  %v3935_v29 = vld [vmem:[%s5704_s1 + $0x834] ss:$8 sps:$4 sm:$0xff]   ;;  %v3930_v30 = vld [vmem:[%s5704_s1 + $0x230] ss:$8 sps:$4 sm:$0xff]  }
  0x59   :  { %2788 = vmatprep.subr.bf16.mxu0 %v3853_v31  ;;  %v3933_v31 = vld [vmem:[%s5704_s1 + $0x830] ss:$8 sps:$4 sm:$0xff]  }
  0x5b   :  { %2543 = vmatpush1.bf16.msra.mxu1 %v3848_v33  ;;  %v3941_v33 = vld [vmem:[%s5704_s1 + $0x844] ss:$8 sps:$4 sm:$0xff]  }
  0x5c   :  { %2789 = vmatpush1.bf16.msra.mxu0 %v3851_v34  ;;  %2544 = vmatprep.subr.bf16.mxu1 %v3856_v37  ;;  %v3936_v34 = vld [vmem:[%s5704_s1 + $0x240] ss:$8 sps:$4 sm:$0xff]   ;;  %v3947_v37 = vld [vmem:[%s5704_s1 + $0x854] ss:$8 sps:$4 sm:$0xff]  }
  0x5d   :  { %2790 = vmatprep.subr.bf16.mxu0 %v3859_v39  ;;  %v3945_v39 = vld [vmem:[%s5704_s1 + $0x850] ss:$8 sps:$4 sm:$0xff]  }
  0x5f   :  { %2545 = vmatpush1.bf16.msra.mxu1 %v3854_v40  ;;  %v3950_v40 = vld [vmem:[%s5704_s1 + $0x264] ss:$8 sps:$4 sm:$0xff]  }
  0x60   :  { %2791 = vmatpush1.bf16.msra.mxu0 %v3857_v41  ;;  %2546 = vmatprep.subr.bf16.mxu1 %v3862_v42  ;;  %v3953_v41 = vld [vmem:[%s5704_s1 + $0x864] ss:$8 sps:$4 sm:$0xff]   ;;  %v3948_v42 = vld [vmem:[%s5704_s1 + $0x260] ss:$8 sps:$4 sm:$0xff]  }
  0x61   :  { %2792 = vmatprep.subr.bf16.mxu0 %v3865_v43  ;;  %v3951_v43 = vld [vmem:[%s5704_s1 + $0x860] ss:$8 sps:$4 sm:$0xff]  }
  0x63   :  { %2547 = vmatpush1.bf16.msra.mxu1 %v3860_v44  ;;  %v3956_v44 = vld [vmem:[%s5704_s1 + $0x274] ss:$8 sps:$4 sm:$0xff]  }
  0x64   :  { %2793 = vmatpush1.bf16.msra.mxu0 %v3863_v45  ;;  %2548 = vmatprep.subr.bf16.mxu1 %v3868_v46  ;;  %v3959_v45 = vld [vmem:[%s5704_s1 + $0x874] ss:$8 sps:$4 sm:$0xff]   ;;  %v3954_v46 = vld [vmem:[%s5704_s1 + $0x270] ss:$8 sps:$4 sm:$0xff]  }
  0x65   :  { %2794 = vmatprep.subr.bf16.mxu0 %v3871_v47  ;;  %v3957_v47 = vld [vmem:[%s5704_s1 + $0x870] ss:$8 sps:$4 sm:$0xff]  }
  0x67   :  { %2549 = vmatpush1.bf16.msra.mxu1 %v3866_v48  ;;  %v3962_v48 = vld [vmem:[%s5704_s1 + $0x284] ss:$8 sps:$4 sm:$0xff]  }
  0x68   :  { %2795 = vmatpush1.bf16.msra.mxu0 %v3869_v49  ;;  %2550 = vmatprep.subr.bf16.mxu1 %v3874_v50  ;;  %v3965_v49 = vld [vmem:[%s5704_s1 + $0x884] ss:$8 sps:$4 sm:$0xff]   ;;  %v3960_v50 = vld [vmem:[%s5704_s1 + $0x280] ss:$8 sps:$4 sm:$0xff]  }
  0x69   :  { %2796 = vmatprep.subr.bf16.mxu0 %v3877_v51  ;;  %v3963_v51 = vld [vmem:[%s5704_s1 + $0x880] ss:$8 sps:$4 sm:$0xff]  }
  0x6b   :  { %2551 = vmatpush1.bf16.msra.mxu1 %v3872_v52  ;;  %v3968_v52 = vld [vmem:[%s5704_s1 + $0x294] ss:$8 sps:$4 sm:$0xff]  }
  0x6c   :  { %2797 = vmatpush1.bf16.msra.mxu0 %v3875_v53  ;;  %2552 = vmatprep.subr.bf16.mxu1 %v3880_v54  ;;  %v3971_v53 = vld [vmem:[%s5704_s1 + $0x894] ss:$8 sps:$4 sm:$0xff]   ;;  %v3966_v54 = vld [vmem:[%s5704_s1 + $0x290] ss:$8 sps:$4 sm:$0xff]  }
  0x6d   :  { %2798 = vmatprep.subr.bf16.mxu0 %v3883_v55  ;;  %v3969_v55 = vld [vmem:[%s5704_s1 + $0x890] ss:$8 sps:$4 sm:$0xff]  }
  0x6f   :  { %2553 = vmatpush1.bf16.msra.mxu1 %v3878_v56  ;;  %v3974_v56 = vld [vmem:[%s5704_s1 + $0x2a4] ss:$8 sps:$4 sm:$0xff]  }
  0x70   :  { %2799 = vmatpush1.bf16.msra.mxu0 %v3881_v57  ;;  %2554 = vmatprep.subr.bf16.mxu1 %v3886_v58  ;;  %v3977_v57 = vld [vmem:[%s5704_s1 + $0x8a4] ss:$8 sps:$4 sm:$0xff]   ;;  %v3972_v58 = vld [vmem:[%s5704_s1 + $0x2a0] ss:$8 sps:$4 sm:$0xff]  }
  0x71   :  { %2800 = vmatprep.subr.bf16.mxu0 %v3889_v59  ;;  %v3975_v59 = vld [vmem:[%s5704_s1 + $0x8a0] ss:$8 sps:$4 sm:$0xff]  }
  0x73   :  { %2555 = vmatpush1.bf16.msra.mxu1 %v3884_v60  ;;  %v3980_v60 = vld [vmem:[%s5704_s1 + $0x2b4] ss:$8 sps:$4 sm:$0xff]  }
  0x74   :  { %2801 = vmatpush1.bf16.msra.mxu0 %v3887_v61  ;;  %2556 = vmatprep.subr.bf16.mxu1 %v3892_v62  ;;  %v3983_v61 = vld [vmem:[%s5704_s1 + $0x8b4] ss:$8 sps:$4 sm:$0xff]   ;;  %v3978_v62 = vld [vmem:[%s5704_s1 + $0x2b0] ss:$8 sps:$4 sm:$0xff]  }
  0x75   :  { %2802 = vmatprep.subr.bf16.mxu0 %v3895_v63  ;;  %v3981_v63 = vld [vmem:[%s5704_s1 + $0x8b0] ss:$8 sps:$4 sm:$0xff]  }
  0x77   :  { %2557 = vmatpush1.bf16.msra.mxu1 %v3890_v0  ;;  %v3986_v0 = vld [vmem:[%s5704_s1 + $0x2c4] ss:$8 sps:$4 sm:$0xff]  }
  0x78   :  { %2803 = vmatpush1.bf16.msra.mxu0 %v3893_v1  ;;  %2558 = vmatprep.subr.bf16.mxu1 %v3898_v2  ;;  %v3989_v1 = vld [vmem:[%s5704_s1 + $0x8c4] ss:$8 sps:$4 sm:$0xff]   ;;  %v3984_v2 = vld [vmem:[%s5704_s1 + $0x2c0] ss:$8 sps:$4 sm:$0xff]  }
  0x79   :  { %2804 = vmatprep.subr.bf16.mxu0 %v3901_v3  ;;  %v3987_v3 = vld [vmem:[%s5704_s1 + $0x8c0] ss:$8 sps:$4 sm:$0xff]  }
  0x7b   :  { %2559 = vmatpush1.bf16.msra.mxu1 %v3896_v4  ;;  %v3992_v4 = vld [vmem:[%s5704_s1 + $0x2d4] ss:$8 sps:$4 sm:$0xff]  }
  0x7c   :  { %2805 = vmatpush1.bf16.msra.mxu0 %v3899_v5  ;;  %2560 = vmatprep.subr.bf16.mxu1 %v3904_v6  ;;  %v3995_v5 = vld [vmem:[%s5704_s1 + $0x8d4] ss:$8 sps:$4 sm:$0xff]   ;;  %v3990_v6 = vld [vmem:[%s5704_s1 + $0x2d0] ss:$8 sps:$4 sm:$0xff]  }
  0x7d   :  { %2806 = vmatprep.subr.bf16.mxu0 %v3907_v7  ;;  %v3993_v7 = vld [vmem:[%s5704_s1 + $0x8d0] ss:$8 sps:$4 sm:$0xff]  }
  0x7f   :  { %2561 = vmatpush1.bf16.msra.mxu1 %v3902_v8  ;;  %v3998_v8 = vld [vmem:[%s5704_s1 + $0x2e4] ss:$8 sps:$4 sm:$0xff]  }
  0x80   :  { %2807 = vmatpush1.bf16.msra.mxu0 %v3905_v9  ;;  %2571 = vmatprep.subr.bf16.mxu1 %v3912_v10  ;;  %v4001_v9 = vld [vmem:[%s5704_s1 + $0x8e4] ss:$8 sps:$4 sm:$0xff]   ;;  %v3996_v10 = vld [vmem:[%s5704_s1 + $0x2e0] ss:$8 sps:$4 sm:$0xff]  }
  0x81   :  { %2817 = vmatprep.subr.bf16.mxu0 %v3917_v11  ;;  %v3999_v11 = vld [vmem:[%s5704_s1 + $0x8e0] ss:$8 sps:$4 sm:$0xff]  }
  0x82   :  { %2563 = vmatmul.mubr.bf16.vlgmr.msra.gmra.mrb[0].mxu1 %v3208_v12  ;;  %v4004_v12 = vld [vmem:[%s5704_s1 + $0x2f4] ss:$8 sps:$4 sm:$0xff]  }
  0x83   :  { %2809 = vmatmul.mubr.bf16.vlgmr.msra.gmra.mrb[0].mxu0 %v3220_v14  ;;  %2572 = vmatpush1.bf16.msra.mxu1 %v3910_v13  ;;  %v4007_v13 = vld [vmem:[%s5704_s1 + $0x8f4] ss:$8 sps:$4 sm:$0xff]   ;;  %v4002_v14 = vld [vmem:[%s5704_s1 + $0x2f0] ss:$8 sps:$4 sm:$0xff]  }
  0x84   :  { %2818 = vmatpush1.bf16.msra.mxu0 %v3915_v15  ;;  %2573 = vmatprep.subr.bf16.mxu1 %v3920_v16  ;;  %v4005_v15 = vld [vmem:[%s5704_s1 + $0x8f0] ss:$8 sps:$4 sm:$0xff]   ;;  %v4012_v16 = vld [vmem:[%s5704_s1 + $0x304] ss:$8 sps:$4 sm:$0xff]  }
  0x85   :  { %2819 = vmatprep.subr.bf16.mxu0 %v3923_v17  ;;  %2603 = vmatprep.mubr.bf16.mxu1 %v3211_v19  ;;  %v4017_v17 = vld [vmem:[%s5704_s1 + $0x904] ss:$8 sps:$4 sm:$0xff]   ;;  %v4010_v19 = vld [vmem:[%s5704_s1 + $0x300] ss:$8 sps:$4 sm:$0xff]  }
  0x86   :  { %2849 = vmatprep.mubr.bf16.mxu0 %v3223_v23  ;;  %v3222_v23 = vcombine.low %v4808_v20, %v4808_v20 }
  0x87   :  { %2574 = vmatpush1.bf16.msra.mxu1 %v3918_v21  ;;  %v4015_v21 = vld [vmem:[%s5704_s1 + $0x900] ss:$8 sps:$4 sm:$0xff]  }
  0x88   :  { %2820 = vmatpush1.bf16.msra.mxu0 %v3921_v22  ;;  %2575 = vmatprep.subr.bf16.mxu1 %v3926_v24  ;;  %v3210_v22 = vcombine.low %v4801_v18, %v4801_v18  ;;  %v5005_v24 = vld [vmem:[%s5705_s0 + $0x18] sm:$0xff] }
  0x89   :  { %2821 = vmatprep.subr.bf16.mxu0 %v3929_v25  ;;  %v5010_v25 = vld [vmem:[%s5705_s0 + $0x48] sm:$0xff]  ;;  %v4023_v18 = vld [vmem:[%s5704_s1 + $0x914] ss:$8 sps:$4 sm:$0xff]   ;;  %v3213_v20 = vcombine.high %v5005_v24, %v5005_v24 }
  0x8b   :  { %2576 = vmatpush1.bf16.msra.mxu1 %v3924_v26  ;;  %v4020_v26 = vld [vmem:[%s5704_s1 + $0x314] ss:$8 sps:$4 sm:$0xff]  }
  0x8c   :  { %2822 = vmatpush1.bf16.msra.mxu0 %v3927_v27  ;;  %2577 = vmatprep.subr.bf16.mxu1 %v3932_v28  ;;  %v3225_v27 = vcombine.high %v5010_v25, %v5010_v25  ;;  %v4018_v28 = vld [vmem:[%s5704_s1 + $0x310] ss:$8 sps:$4 sm:$0xff]  }
  0x8d   :  { %2823 = vmatprep.subr.bf16.mxu0 %v3935_v29  ;;  %v4021_v29 = vld [vmem:[%s5704_s1 + $0x910] ss:$8 sps:$4 sm:$0xff]  }
  0x8f   :  { %2578 = vmatpush1.bf16.msra.mxu1 %v3930_v30  ;;  %v4026_v30 = vld [vmem:[%s5704_s1 + $0x324] ss:$8 sps:$4 sm:$0xff]  }
  0x90   :  { %2824 = vmatpush1.bf16.msra.mxu0 %v3933_v31  ;;  %2579 = vmatprep.subr.bf16.mxu1 %v3938_v32  ;;  %v4029_v31 = vld [vmem:[%s5704_s1 + $0x924] ss:$8 sps:$4 sm:$0xff]   ;;  %v4024_v32 = vld [vmem:[%s5704_s1 + $0x320] ss:$8 sps:$4 sm:$0xff]  }
  0x91   :  { %2825 = vmatprep.subr.bf16.mxu0 %v3941_v33  ;;  %v4027_v33 = vld [vmem:[%s5704_s1 + $0x920] ss:$8 sps:$4 sm:$0xff]  }
  0x93   :  { %2580 = vmatpush1.bf16.msra.mxu1 %v3936_v34  ;;  %v4032_v34 = vld [vmem:[%s5704_s1 + $0x334] ss:$8 sps:$4 sm:$0xff]  }
  0x94   :  { %2826 = vmatpush1.bf16.msra.mxu0 %v3939_v35  ;;  %2581 = vmatprep.subr.bf16.mxu1 %v3944_v36  ;;  %v4035_v35 = vld [vmem:[%s5704_s1 + $0x934] ss:$8 sps:$4 sm:$0xff]   ;;  %v4030_v36 = vld [vmem:[%s5704_s1 + $0x330] ss:$8 sps:$4 sm:$0xff]  }
  0x95   :  { %2827 = vmatprep.subr.bf16.mxu0 %v3947_v37  ;;  %v4033_v37 = vld [vmem:[%s5704_s1 + $0x930] ss:$8 sps:$4 sm:$0xff]  }
  0x97   :  { %2582 = vmatpush1.bf16.msra.mxu1 %v3942_v38  ;;  %v4038_v38 = vld [vmem:[%s5704_s1 + $0x344] ss:$8 sps:$4 sm:$0xff]  }
  0x98   :  { %2828 = vmatpush1.bf16.msra.mxu0 %v3945_v39  ;;  %2583 = vmatprep.subr.bf16.mxu1 %v3950_v40  ;;  %v4041_v39 = vld [vmem:[%s5704_s1 + $0x944] ss:$8 sps:$4 sm:$0xff]   ;;  %v4036_v40 = vld [vmem:[%s5704_s1 + $0x340] ss:$8 sps:$4 sm:$0xff]  }
  0x99   :  { %2829 = vmatprep.subr.bf16.mxu0 %v3953_v41  ;;  %v4039_v41 = vld [vmem:[%s5704_s1 + $0x940] ss:$8 sps:$4 sm:$0xff]  }
  0x9b   :  { %2584 = vmatpush1.bf16.msra.mxu1 %v3948_v42  ;;  %v4044_v42 = vld [vmem:[%s5704_s1 + $0x354] ss:$8 sps:$4 sm:$0xff]  }
  0x9c   :  { %2830 = vmatpush1.bf16.msra.mxu0 %v3951_v43  ;;  %2585 = vmatprep.subr.bf16.mxu1 %v3956_v44  ;;  %v4047_v43 = vld [vmem:[%s5704_s1 + $0x954] ss:$8 sps:$4 sm:$0xff]   ;;  %v4042_v44 = vld [vmem:[%s5704_s1 + $0x350] ss:$8 sps:$4 sm:$0xff]  }
  0x9d   :  { %2831 = vmatprep.subr.bf16.mxu0 %v3959_v45  ;;  %v4045_v45 = vld [vmem:[%s5704_s1 + $0x950] ss:$8 sps:$4 sm:$0xff]  }
  0x9f   :  { %2586 = vmatpush1.bf16.msra.mxu1 %v3954_v46  ;;  %v4050_v46 = vld [vmem:[%s5704_s1 + $0x364] ss:$8 sps:$4 sm:$0xff]  }
  0xa0   :  { %2832 = vmatpush1.bf16.msra.mxu0 %v3957_v47  ;;  %2587 = vmatprep.subr.bf16.mxu1 %v3962_v48  ;;  %v4053_v47 = vld [vmem:[%s5704_s1 + $0x964] ss:$8 sps:$4 sm:$0xff]   ;;  %v4048_v48 = vld [vmem:[%s5704_s1 + $0x360] ss:$8 sps:$4 sm:$0xff]  }
  0xa1   :  { %2833 = vmatprep.subr.bf16.mxu0 %v3965_v49  ;;  %v4051_v49 = vld [vmem:[%s5704_s1 + $0x960] ss:$8 sps:$4 sm:$0xff]  }
  0xa3   :  { %2588 = vmatpush1.bf16.msra.mxu1 %v3960_v50  ;;  %v4056_v50 = vld [vmem:[%s5704_s1 + $0x374] ss:$8 sps:$4 sm:$0xff]  }
  0xa4   :  { %2834 = vmatpush1.bf16.msra.mxu0 %v3963_v51  ;;  %2589 = vmatprep.subr.bf16.mxu1 %v3968_v52  ;;  %v4059_v51 = vld [vmem:[%s5704_s1 + $0x974] ss:$8 sps:$4 sm:$0xff]   ;;  %v4054_v52 = vld [vmem:[%s5704_s1 + $0x370] ss:$8 sps:$4 sm:$0xff]  }
  0xa5   :  { %2835 = vmatprep.subr.bf16.mxu0 %v3971_v53  ;;  %v4057_v53 = vld [vmem:[%s5704_s1 + $0x970] ss:$8 sps:$4 sm:$0xff]  }
  0xa7   :  { %2590 = vmatpush1.bf16.msra.mxu1 %v3966_v54  ;;  %v4062_v54 = vld [vmem:[%s5704_s1 + $0x384] ss:$8 sps:$4 sm:$0xff]  }
  0xa8   :  { %2836 = vmatpush1.bf16.msra.mxu0 %v3969_v55  ;;  %2591 = vmatprep.subr.bf16.mxu1 %v3974_v56  ;;  %v4065_v55 = vld [vmem:[%s5704_s1 + $0x984] ss:$8 sps:$4 sm:$0xff]   ;;  %v4060_v56 = vld [vmem:[%s5704_s1 + $0x380] ss:$8 sps:$4 sm:$0xff]  }
  0xa9   :  { %2837 = vmatprep.subr.bf16.mxu0 %v3977_v57  ;;  %v4063_v57 = vld [vmem:[%s5704_s1 + $0x980] ss:$8 sps:$4 sm:$0xff]  }
  0xab   :  { %2592 = vmatpush1.bf16.msra.mxu1 %v3972_v58  ;;  %v4068_v58 = vld [vmem:[%s5704_s1 + $0x394] ss:$8 sps:$4 sm:$0xff]  }
  0xac   :  { %2838 = vmatpush1.bf16.msra.mxu0 %v3975_v59  ;;  %2593 = vmatprep.subr.bf16.mxu1 %v3980_v60  ;;  %v4071_v59 = vld [vmem:[%s5704_s1 + $0x994] ss:$8 sps:$4 sm:$0xff]   ;;  %v4066_v60 = vld [vmem:[%s5704_s1 + $0x390] ss:$8 sps:$4 sm:$0xff]  }
  0xad   :  { %2839 = vmatprep.subr.bf16.mxu0 %v3983_v61  ;;  %v4069_v61 = vld [vmem:[%s5704_s1 + $0x990] ss:$8 sps:$4 sm:$0xff]  }
  0xaf   :  { %2594 = vmatpush1.bf16.msra.mxu1 %v3978_v62  ;;  %v4074_v62 = vld [vmem:[%s5704_s1 + $0x3a4] ss:$8 sps:$4 sm:$0xff]  }
  0xb0   :  { %2840 = vmatpush1.bf16.msra.mxu0 %v3981_v63  ;;  %2595 = vmatprep.subr.bf16.mxu1 %v3986_v0  ;;  %v4077_v63 = vld [vmem:[%s5704_s1 + $0x9a4] ss:$8 sps:$4 sm:$0xff]   ;;  %v4072_v0 = vld [vmem:[%s5704_s1 + $0x3a0] ss:$8 sps:$4 sm:$0xff]  }
  0xb1   :  { %2841 = vmatprep.subr.bf16.mxu0 %v3989_v1  ;;  %v4075_v1 = vld [vmem:[%s5704_s1 + $0x9a0] ss:$8 sps:$4 sm:$0xff]  }
  0xb3   :  { %2596 = vmatpush1.bf16.msra.mxu1 %v3984_v2  ;;  %v4080_v2 = vld [vmem:[%s5704_s1 + $0x3b4] ss:$8 sps:$4 sm:$0xff]  }
  0xb4   :  { %2842 = vmatpush1.bf16.msra.mxu0 %v3987_v3  ;;  %2597 = vmatprep.subr.bf16.mxu1 %v3992_v4  ;;  %v4083_v3 = vld [vmem:[%s5704_s1 + $0x9b4] ss:$8 sps:$4 sm:$0xff]   ;;  %v4078_v4 = vld [vmem:[%s5704_s1 + $0x3b0] ss:$8 sps:$4 sm:$0xff]  }
  0xb5   :  { %2843 = vmatprep.subr.bf16.mxu0 %v3995_v5  ;;  %v4081_v5 = vld [vmem:[%s5704_s1 + $0x9b0] ss:$8 sps:$4 sm:$0xff]  }
  0xb7   :  { %2598 = vmatpush1.bf16.msra.mxu1 %v3990_v6  ;;  %v4086_v6 = vld [vmem:[%s5704_s1 + $0x3c4] ss:$8 sps:$4 sm:$0xff]  }
  0xb8   :  { %2844 = vmatpush1.bf16.msra.mxu0 %v3993_v7  ;;  %2599 = vmatprep.subr.bf16.mxu1 %v3998_v8  ;;  %v4089_v7 = vld [vmem:[%s5704_s1 + $0x9c4] ss:$8 sps:$4 sm:$0xff]   ;;  %v4084_v8 = vld [vmem:[%s5704_s1 + $0x3c0] ss:$8 sps:$4 sm:$0xff]  }
  0xb9   :  { %2845 = vmatprep.subr.bf16.mxu0 %v4001_v9  ;;  %v4087_v9 = vld [vmem:[%s5704_s1 + $0x9c0] ss:$8 sps:$4 sm:$0xff]  }
  0xbb   :  { %2600 = vmatpush1.bf16.msra.mxu1 %v3996_v10  ;;  %v4092_v10 = vld [vmem:[%s5704_s1 + $0x3d4] ss:$8 sps:$4 sm:$0xff]  }
  0xbc   :  { %2846 = vmatpush1.bf16.msra.mxu0 %v3999_v11  ;;  %2601 = vmatprep.subr.bf16.mxu1 %v4004_v12  ;;  %v4095_v11 = vld [vmem:[%s5704_s1 + $0x9d4] ss:$8 sps:$4 sm:$0xff]   ;;  %v4090_v12 = vld [vmem:[%s5704_s1 + $0x3d0] ss:$8 sps:$4 sm:$0xff]  }
  0xbd   :  { %2847 = vmatprep.subr.bf16.mxu0 %v4007_v13  ;;  %v4093_v13 = vld [vmem:[%s5704_s1 + $0x9d0] ss:$8 sps:$4 sm:$0xff]  }
  0xbf   :  { %2602 = vmatpush1.bf16.msra.mxu1 %v4002_v14  ;;  %v4098_v14 = vld [vmem:[%s5704_s1 + $0x3e4] ss:$8 sps:$4 sm:$0xff]  }
  0xc0   :  { %2848 = vmatpush1.bf16.msra.mxu0 %v4005_v15  ;;  %2612 = vmatprep.subr.bf16.mxu1 %v4012_v16  ;;  %v4101_v15 = vld [vmem:[%s5704_s1 + $0x9e4] ss:$8 sps:$4 sm:$0xff]   ;;  %v4096_v16 = vld [vmem:[%s5704_s1 + $0x3e0] ss:$8 sps:$4 sm:$0xff]  }
  0xc1   :  { %2858 = vmatprep.subr.bf16.mxu0 %v4017_v17  ;;  %v4099_v17 = vld [vmem:[%s5704_s1 + $0x9e0] ss:$8 sps:$4 sm:$0xff]  }
  0xc2   :  { %2604 = vmatmul.mubr.bf16.vlgmr.msra.gmra.mrb[0].mxu1 %v3210_v22  ;;  %v4102_v22 = vld [vmem:[%s5704_s1 + $0x3f0] ss:$8 sps:$4 sm:$0xff]  }
  0xc3   :  { %2850 = vmatmul.mubr.bf16.vlgmr.msra.gmra.mrb[0].mxu0 %v3222_v23  ;;  %2613 = vmatpush1.bf16.msra.mxu1 %v4010_v19  ;;  %v4104_v19 = vld [vmem:[%s5704_s1 + $0x3f4] ss:$8 sps:$4 sm:$0xff]   ;;  %v4105_v23 = vld [vmem:[%s5704_s1 + $0x9f0] ss:$8 sps:$4 sm:$0xff]  }
  0xc4   :  { %2859 = vmatpush1.bf16.msra.mxu0 %v4015_v21  ;;  %2614 = vmatprep.subr.bf16.mxu1 %v4020_v26  ;;  %v4107_v21 = vld [vmem:[%s5704_s1 + $0x9f4] ss:$8 sps:$4 sm:$0xff]   ;;  %v4112_v26 = vld [vmem:[%s5704_s1 + $0x404] ss:$8 sps:$4 sm:$0xff]  }
  0xc5   :  { %2860 = vmatprep.subr.bf16.mxu0 %v4023_v18  ;;  %2644 = vmatprep.mubr.bf16.mxu1 %v3213_v20  ;;  %v4117_v18 = vld [vmem:[%s5704_s1 + $0xa04] ss:$8 sps:$4 sm:$0xff]  }
  0xc6   :  { %2890 = vmatprep.mubr.bf16.mxu0 %v3225_v27  ;;  %v5205_v20 = vld [vmem:[%s5705_s0 + $0x20] sm:$0xff]  ;;  %v3212_v27 = vcombine.low %v5005_v24, %v5005_v24  ;;  %v4120_v24 = vld [vmem:[%s5704_s1 + $0x414] ss:$8 sps:$4 sm:$0xff]  }
  0xc7   :  { %2615 = vmatpush1.bf16.msra.mxu1 %v4018_v28  ;;  %v3224_v28 = vcombine.low %v5010_v25, %v5010_v25  ;;  %v4123_v25 = vld [vmem:[%s5704_s1 + $0xa14] ss:$8 sps:$4 sm:$0xff]  }
  0xc8   :  { %2861 = vmatpush1.bf16.msra.mxu0 %v4021_v29  ;;  %2616 = vmatprep.subr.bf16.mxu1 %v4026_v30  ;;  %v5214_v29 = vld [vmem:[%s5705_s0 + $0x50] sm:$0xff]  ;;  %v4110_v30 = vld [vmem:[%s5704_s1 + $0x400] ss:$8 sps:$4 sm:$0xff]  }
  0xc9   :  { %2862 = vmatprep.subr.bf16.mxu0 %v4029_v31  ;;  %v4115_v31 = vld [vmem:[%s5704_s1 + $0xa00] ss:$8 sps:$4 sm:$0xff]  }
  0xcb   :  { %2617 = vmatpush1.bf16.msra.mxu1 %v4024_v32  ;;  %v3215_v32 = vcombine.high %v5205_v20, %v5205_v20 }
  0xcc   :  { %2863 = vmatpush1.bf16.msra.mxu0 %v4027_v33  ;;  %2618 = vmatprep.subr.bf16.mxu1 %v4032_v34  ;;  %v3227_v33 = vcombine.high %v5214_v29, %v5214_v29  ;;  %v4118_v34 = vld [vmem:[%s5704_s1 + $0x410] ss:$8 sps:$4 sm:$0xff]  }
  0xcd   :  { %2864 = vmatprep.subr.bf16.mxu0 %v4035_v35  ;;  %v4121_v35 = vld [vmem:[%s5704_s1 + $0xa10] ss:$8 sps:$4 sm:$0xff]  }
  0xcf   :  { %2619 = vmatpush1.bf16.msra.mxu1 %v4030_v36  ;;  %v4126_v36 = vld [vmem:[%s5704_s1 + $0x424] ss:$8 sps:$4 sm:$0xff]  }
  0xd0   :  { %2865 = vmatpush1.bf16.msra.mxu0 %v4033_v37  ;;  %2620 = vmatprep.subr.bf16.mxu1 %v4038_v38  ;;  %v4129_v37 = vld [vmem:[%s5704_s1 + $0xa24] ss:$8 sps:$4 sm:$0xff]   ;;  %v4124_v38 = vld [vmem:[%s5704_s1 + $0x420] ss:$8 sps:$4 sm:$0xff]  }
  0xd1   :  { %2866 = vmatprep.subr.bf16.mxu0 %v4041_v39  ;;  %v4127_v39 = vld [vmem:[%s5704_s1 + $0xa20] ss:$8 sps:$4 sm:$0xff]  }
  0xd3   :  { %2621 = vmatpush1.bf16.msra.mxu1 %v4036_v40  ;;  %v4132_v40 = vld [vmem:[%s5704_s1 + $0x434] ss:$8 sps:$4 sm:$0xff]  }
  0xd4   :  { %2867 = vmatpush1.bf16.msra.mxu0 %v4039_v41  ;;  %2622 = vmatprep.subr.bf16.mxu1 %v4044_v42  ;;  %v4135_v41 = vld [vmem:[%s5704_s1 + $0xa34] ss:$8 sps:$4 sm:$0xff]   ;;  %v4130_v42 = vld [vmem:[%s5704_s1 + $0x430] ss:$8 sps:$4 sm:$0xff]  }
  0xd5   :  { %2868 = vmatprep.subr.bf16.mxu0 %v4047_v43  ;;  %v4133_v43 = vld [vmem:[%s5704_s1 + $0xa30] ss:$8 sps:$4 sm:$0xff]  }
  0xd7   :  { %2623 = vmatpush1.bf16.msra.mxu1 %v4042_v44  ;;  %v4138_v44 = vld [vmem:[%s5704_s1 + $0x444] ss:$8 sps:$4 sm:$0xff]  }
  0xd8   :  { %2869 = vmatpush1.bf16.msra.mxu0 %v4045_v45  ;;  %2624 = vmatprep.subr.bf16.mxu1 %v4050_v46  ;;  %v4141_v45 = vld [vmem:[%s5704_s1 + $0xa44] ss:$8 sps:$4 sm:$0xff]   ;;  %v4136_v46 = vld [vmem:[%s5704_s1 + $0x440] ss:$8 sps:$4 sm:$0xff]  }
  0xd9   :  { %2870 = vmatprep.subr.bf16.mxu0 %v4053_v47  ;;  %v4139_v47 = vld [vmem:[%s5704_s1 + $0xa40] ss:$8 sps:$4 sm:$0xff]  }
  0xdb   :  { %2625 = vmatpush1.bf16.msra.mxu1 %v4048_v48  ;;  %v4144_v48 = vld [vmem:[%s5704_s1 + $0x454] ss:$8 sps:$4 sm:$0xff]  }
  0xdc   :  { %2871 = vmatpush1.bf16.msra.mxu0 %v4051_v49  ;;  %2626 = vmatprep.subr.bf16.mxu1 %v4056_v50  ;;  %v4147_v49 = vld [vmem:[%s5704_s1 + $0xa54] ss:$8 sps:$4 sm:$0xff]   ;;  %v4142_v50 = vld [vmem:[%s5704_s1 + $0x450] ss:$8 sps:$4 sm:$0xff]  }
  0xdd   :  { %2872 = vmatprep.subr.bf16.mxu0 %v4059_v51  ;;  %v4145_v51 = vld [vmem:[%s5704_s1 + $0xa50] ss:$8 sps:$4 sm:$0xff]  }
  0xdf   :  { %2627 = vmatpush1.bf16.msra.mxu1 %v4054_v52  ;;  %v4150_v52 = vld [vmem:[%s5704_s1 + $0x464] ss:$8 sps:$4 sm:$0xff]  }
  0xe0   :  { %2873 = vmatpush1.bf16.msra.mxu0 %v4057_v53  ;;  %2628 = vmatprep.subr.bf16.mxu1 %v4062_v54  ;;  %v4153_v53 = vld [vmem:[%s5704_s1 + $0xa64] ss:$8 sps:$4 sm:$0xff]   ;;  %v4148_v54 = vld [vmem:[%s5704_s1 + $0x460] ss:$8 sps:$4 sm:$0xff]  }
  0xe1   :  { %2874 = vmatprep.subr.bf16.mxu0 %v4065_v55  ;;  %v4151_v55 = vld [vmem:[%s5704_s1 + $0xa60] ss:$8 sps:$4 sm:$0xff]  }
  0xe3   :  { %2629 = vmatpush1.bf16.msra.mxu1 %v4060_v56  ;;  %v4156_v56 = vld [vmem:[%s5704_s1 + $0x474] ss:$8 sps:$4 sm:$0xff]  }
  0xe4   :  { %2875 = vmatpush1.bf16.msra.mxu0 %v4063_v57  ;;  %2630 = vmatprep.subr.bf16.mxu1 %v4068_v58  ;;  %v4159_v57 = vld [vmem:[%s5704_s1 + $0xa74] ss:$8 sps:$4 sm:$0xff]   ;;  %v4154_v58 = vld [vmem:[%s5704_s1 + $0x470] ss:$8 sps:$4 sm:$0xff]  }
  0xe5   :  { %2876 = vmatprep.subr.bf16.mxu0 %v4071_v59  ;;  %v4157_v59 = vld [vmem:[%s5704_s1 + $0xa70] ss:$8 sps:$4 sm:$0xff]  }
  0xe7   :  { %2631 = vmatpush1.bf16.msra.mxu1 %v4066_v60  ;;  %v4162_v60 = vld [vmem:[%s5704_s1 + $0x484] ss:$8 sps:$4 sm:$0xff]  }
  0xe8   :  { %2877 = vmatpush1.bf16.msra.mxu0 %v4069_v61  ;;  %2632 = vmatprep.subr.bf16.mxu1 %v4074_v62  ;;  %v4165_v61 = vld [vmem:[%s5704_s1 + $0xa84] ss:$8 sps:$4 sm:$0xff]   ;;  %v4160_v62 = vld [vmem:[%s5704_s1 + $0x480] ss:$8 sps:$4 sm:$0xff]  }
  0xe9   :  { %2878 = vmatprep.subr.bf16.mxu0 %v4077_v63  ;;  %v4163_v63 = vld [vmem:[%s5704_s1 + $0xa80] ss:$8 sps:$4 sm:$0xff]  }
  0xeb   :  { %2633 = vmatpush1.bf16.msra.mxu1 %v4072_v0  ;;  %v4168_v0 = vld [vmem:[%s5704_s1 + $0x494] ss:$8 sps:$4 sm:$0xff]  }
  0xec   :  { %2879 = vmatpush1.bf16.msra.mxu0 %v4075_v1  ;;  %2634 = vmatprep.subr.bf16.mxu1 %v4080_v2  ;;  %v4171_v1 = vld [vmem:[%s5704_s1 + $0xa94] ss:$8 sps:$4 sm:$0xff]   ;;  %v4166_v2 = vld [vmem:[%s5704_s1 + $0x490] ss:$8 sps:$4 sm:$0xff]  }
  0xed   :  { %2880 = vmatprep.subr.bf16.mxu0 %v4083_v3  ;;  %v4169_v3 = vld [vmem:[%s5704_s1 + $0xa90] ss:$8 sps:$4 sm:$0xff]  }
  0xef   :  { %2635 = vmatpush1.bf16.msra.mxu1 %v4078_v4  ;;  %v4174_v4 = vld [vmem:[%s5704_s1 + $0x4a4] ss:$8 sps:$4 sm:$0xff]  }
  0xf0   :  { %2881 = vmatpush1.bf16.msra.mxu0 %v4081_v5  ;;  %2636 = vmatprep.subr.bf16.mxu1 %v4086_v6  ;;  %v4177_v5 = vld [vmem:[%s5704_s1 + $0xaa4] ss:$8 sps:$4 sm:$0xff]   ;;  %v4172_v6 = vld [vmem:[%s5704_s1 + $0x4a0] ss:$8 sps:$4 sm:$0xff]  }
  0xf1   :  { %2882 = vmatprep.subr.bf16.mxu0 %v4089_v7  ;;  %v4175_v7 = vld [vmem:[%s5704_s1 + $0xaa0] ss:$8 sps:$4 sm:$0xff]  }
  0xf3   :  { %2637 = vmatpush1.bf16.msra.mxu1 %v4084_v8  ;;  %v4180_v8 = vld [vmem:[%s5704_s1 + $0x4b4] ss:$8 sps:$4 sm:$0xff]  }
  0xf4   :  { %2883 = vmatpush1.bf16.msra.mxu0 %v4087_v9  ;;  %2638 = vmatprep.subr.bf16.mxu1 %v4092_v10  ;;  %v4183_v9 = vld [vmem:[%s5704_s1 + $0xab4] ss:$8 sps:$4 sm:$0xff]   ;;  %v4178_v10 = vld [vmem:[%s5704_s1 + $0x4b0] ss:$8 sps:$4 sm:$0xff]  }
  0xf5   :  { %2884 = vmatprep.subr.bf16.mxu0 %v4095_v11  ;;  %v4181_v11 = vld [vmem:[%s5704_s1 + $0xab0] ss:$8 sps:$4 sm:$0xff]  }
  0xf7   :  { %2639 = vmatpush1.bf16.msra.mxu1 %v4090_v12  ;;  %v4186_v12 = vld [vmem:[%s5704_s1 + $0x4c4] ss:$8 sps:$4 sm:$0xff]  }
  0xf8   :  { %2885 = vmatpush1.bf16.msra.mxu0 %v4093_v13  ;;  %2640 = vmatprep.subr.bf16.mxu1 %v4098_v14  ;;  %v4189_v13 = vld [vmem:[%s5704_s1 + $0xac4] ss:$8 sps:$4 sm:$0xff]   ;;  %v4184_v14 = vld [vmem:[%s5704_s1 + $0x4c0] ss:$8 sps:$4 sm:$0xff]  }
  0xf9   :  { %2886 = vmatprep.subr.bf16.mxu0 %v4101_v15  ;;  %v4187_v15 = vld [vmem:[%s5704_s1 + $0xac0] ss:$8 sps:$4 sm:$0xff]  }
  0xfb   :  { %2641 = vmatpush1.bf16.msra.mxu1 %v4096_v16  ;;  %v4192_v16 = vld [vmem:[%s5704_s1 + $0x4d4] ss:$8 sps:$4 sm:$0xff]  }
  0xfc   :  { %2887 = vmatpush1.bf16.msra.mxu0 %v4099_v17  ;;  %2642 = vmatprep.subr.bf16.mxu1 %v4104_v19  ;;  %v4195_v17 = vld [vmem:[%s5704_s1 + $0xad4] ss:$8 sps:$4 sm:$0xff]   ;;  %v4190_v19 = vld [vmem:[%s5704_s1 + $0x4d0] ss:$8 sps:$4 sm:$0xff]  }
  0xfd   :  { %2888 = vmatprep.subr.bf16.mxu0 %v4107_v21  ;;  %v4193_v21 = vld [vmem:[%s5704_s1 + $0xad0] ss:$8 sps:$4 sm:$0xff]  }
  0xff   :  { %2643 = vmatpush1.bf16.msra.mxu1 %v4102_v22  ;;  %v4198_v22 = vld [vmem:[%s5704_s1 + $0x4e4] ss:$8 sps:$4 sm:$0xff]  }
 0x100   :  { %2889 = vmatpush1.bf16.msra.mxu0 %v4105_v23  ;;  %2653 = vmatprep.subr.bf16.mxu1 %v4112_v26  ;;  %v4201_v23 = vld [vmem:[%s5704_s1 + $0xae4] ss:$8 sps:$4 sm:$0xff]   ;;  %v4196_v26 = vld [vmem:[%s5704_s1 + $0x4e0] ss:$8 sps:$4 sm:$0xff]  }
 0x101   :  { %2899 = vmatprep.subr.bf16.mxu0 %v4117_v18  ;;  %v4199_v18 = vld [vmem:[%s5704_s1 + $0xae0] ss:$8 sps:$4 sm:$0xff]  }
 0x102   :  { %2645 = vmatmul.mubr.bf16.vlgmr.msra.gmra.mrb[0].mxu1 %v3212_v27  ;;  %v4204_v27 = vld [vmem:[%s5704_s1 + $0x4f4] ss:$8 sps:$4 sm:$0xff]  }
 0x103   :  { %2891 = vmatmul.mubr.bf16.vlgmr.msra.gmra.mrb[0].mxu0 %v3224_v28  ;;  %2654 = vmatpush1.bf16.msra.mxu1 %v4110_v30  ;;  %v4207_v28 = vld [vmem:[%s5704_s1 + $0xaf4] ss:$8 sps:$4 sm:$0xff]   ;;  %v4202_v30 = vld [vmem:[%s5704_s1 + $0x4f0] ss:$8 sps:$4 sm:$0xff]  }
 0x104   :  { %2900 = vmatpush1.bf16.msra.mxu0 %v4115_v31  ;;  %2655 = vmatprep.subr.bf16.mxu1 %v4120_v24  ;;  %v4205_v31 = vld [vmem:[%s5704_s1 + $0xaf0] ss:$8 sps:$4 sm:$0xff]   ;;  %v4212_v24 = vld [vmem:[%s5704_s1 + $0x504] ss:$8 sps:$4 sm:$0xff]  }
 0x105   :  { %2901 = vmatprep.subr.bf16.mxu0 %v4123_v25  ;;  %2685 = vmatprep.mubr.bf16.mxu1 %v3215_v32  ;;  %v4217_v25 = vld [vmem:[%s5704_s1 + $0xb04] ss:$8 sps:$4 sm:$0xff]   ;;  %v3214_v32 = vcombine.low %v5205_v20, %v5205_v20  ;;  %v4215_v20 = vld [vmem:[%s5704_s1 + $0xb00] ss:$8 sps:$4 sm:$0xff]  }
 0x106   :  { %2931 = vmatprep.mubr.bf16.mxu0 %v3227_v33  ;;  %v3226_v33 = vcombine.low %v5214_v29, %v5214_v29  ;;  %v4220_v29 = vld [vmem:[%s5704_s1 + $0x514] ss:$8 sps:$4 sm:$0xff]  }
 0x107   :  { %2656 = vmatpush1.bf16.msra.mxu1 %v4118_v34  ;;  %v5419_v34 = vld [vmem:[%s5705_s0 + $0x28] sm:$0xff] }
 0x108   :  { %2902 = vmatpush1.bf16.msra.mxu0 %v4121_v35  ;;  %2657 = vmatprep.subr.bf16.mxu1 %v4126_v36  ;;  %v5424_v35 = vld [vmem:[%s5705_s0 + $0x58] sm:$0xff]  ;;  %v4210_v36 = vld [vmem:[%s5704_s1 + $0x500] ss:$8 sps:$4 sm:$0xff]  }
 0x109   :  { %2903 = vmatprep.subr.bf16.mxu0 %v4129_v37  ;;  %v4223_v37 = vld [vmem:[%s5704_s1 + $0xb14] ss:$8 sps:$4 sm:$0xff]  }
 0x10b   :  { %2658 = vmatpush1.bf16.msra.mxu1 %v4124_v38  ;;  %v3217_v38 = vcombine.high %v5419_v34, %v5419_v34 }
 0x10c   :  { %2904 = vmatpush1.bf16.msra.mxu0 %v4127_v39  ;;  %2659 = vmatprep.subr.bf16.mxu1 %v4132_v40  ;;  %v3229_v39 = vcombine.high %v5424_v35, %v5424_v35  ;;  %v4218_v40 = vld [vmem:[%s5704_s1 + $0x510] ss:$8 sps:$4 sm:$0xff]  }
 0x10d   :  { %2905 = vmatprep.subr.bf16.mxu0 %v4135_v41  ;;  %v4221_v41 = vld [vmem:[%s5704_s1 + $0xb10] ss:$8 sps:$4 sm:$0xff]  }
 0x10f   :  { %2660 = vmatpush1.bf16.msra.mxu1 %v4130_v42  ;;  %v4226_v42 = vld [vmem:[%s5704_s1 + $0x524] ss:$8 sps:$4 sm:$0xff]  }
 0x110   :  { %2906 = vmatpush1.bf16.msra.mxu0 %v4133_v43  ;;  %2661 = vmatprep.subr.bf16.mxu1 %v4138_v44  ;;  %v4229_v43 = vld [vmem:[%s5704_s1 + $0xb24] ss:$8 sps:$4 sm:$0xff]   ;;  %v4224_v44 = vld [vmem:[%s5704_s1 + $0x520] ss:$8 sps:$4 sm:$0xff]  }
 0x111   :  { %2907 = vmatprep.subr.bf16.mxu0 %v4141_v45  ;;  %v4227_v45 = vld [vmem:[%s5704_s1 + $0xb20] ss:$8 sps:$4 sm:$0xff]  }
 0x113   :  { %2662 = vmatpush1.bf16.msra.mxu1 %v4136_v46  ;;  %v4232_v46 = vld [vmem:[%s5704_s1 + $0x534] ss:$8 sps:$4 sm:$0xff]  }
 0x114   :  { %2908 = vmatpush1.bf16.msra.mxu0 %v4139_v47  ;;  %2663 = vmatprep.subr.bf16.mxu1 %v4144_v48  ;;  %v4235_v47 = vld [vmem:[%s5704_s1 + $0xb34] ss:$8 sps:$4 sm:$0xff]   ;;  %v4230_v48 = vld [vmem:[%s5704_s1 + $0x530] ss:$8 sps:$4 sm:$0xff]  }
 0x115   :  { %2909 = vmatprep.subr.bf16.mxu0 %v4147_v49  ;;  %v4233_v49 = vld [vmem:[%s5704_s1 + $0xb30] ss:$8 sps:$4 sm:$0xff]  }
 0x117   :  { %2664 = vmatpush1.bf16.msra.mxu1 %v4142_v50  ;;  %v4238_v50 = vld [vmem:[%s5704_s1 + $0x544] ss:$8 sps:$4 sm:$0xff]  }
 0x118   :  { %2910 = vmatpush1.bf16.msra.mxu0 %v4145_v51  ;;  %2665 = vmatprep.subr.bf16.mxu1 %v4150_v52  ;;  %v4241_v51 = vld [vmem:[%s5704_s1 + $0xb44] ss:$8 sps:$4 sm:$0xff]   ;;  %v4236_v52 = vld [vmem:[%s5704_s1 + $0x540] ss:$8 sps:$4 sm:$0xff]  }
 0x119   :  { %2911 = vmatprep.subr.bf16.mxu0 %v4153_v53  ;;  %v4239_v53 = vld [vmem:[%s5704_s1 + $0xb40] ss:$8 sps:$4 sm:$0xff]  }
 0x11b   :  { %2666 = vmatpush1.bf16.msra.mxu1 %v4148_v54  ;;  %v4244_v54 = vld [vmem:[%s5704_s1 + $0x554] ss:$8 sps:$4 sm:$0xff]  }
 0x11c   :  { %2912 = vmatpush1.bf16.msra.mxu0 %v4151_v55  ;;  %2667 = vmatprep.subr.bf16.mxu1 %v4156_v56  ;;  %v4247_v55 = vld [vmem:[%s5704_s1 + $0xb54] ss:$8 sps:$4 sm:$0xff]   ;;  %v4242_v56 = vld [vmem:[%s5704_s1 + $0x550] ss:$8 sps:$4 sm:$0xff]  }
 0x11d   :  { %2913 = vmatprep.subr.bf16.mxu0 %v4159_v57  ;;  %v4245_v57 = vld [vmem:[%s5704_s1 + $0xb50] ss:$8 sps:$4 sm:$0xff]  }
 0x11f   :  { %2668 = vmatpush1.bf16.msra.mxu1 %v4154_v58  ;;  %v4250_v58 = vld [vmem:[%s5704_s1 + $0x564] ss:$8 sps:$4 sm:$0xff]  }
 0x120   :  { %2914 = vmatpush1.bf16.msra.mxu0 %v4157_v59  ;;  %2669 = vmatprep.subr.bf16.mxu1 %v4162_v60  ;;  %v4253_v59 = vld [vmem:[%s5704_s1 + $0xb64] ss:$8 sps:$4 sm:$0xff]   ;;  %v4248_v60 = vld [vmem:[%s5704_s1 + $0x560] ss:$8 sps:$4 sm:$0xff]  }
 0x121   :  { %2915 = vmatprep.subr.bf16.mxu0 %v4165_v61  ;;  %v4251_v61 = vld [vmem:[%s5704_s1 + $0xb60] ss:$8 sps:$4 sm:$0xff]  }
 0x123   :  { %2670 = vmatpush1.bf16.msra.mxu1 %v4160_v62  ;;  %v4256_v62 = vld [vmem:[%s5704_s1 + $0x574] ss:$8 sps:$4 sm:$0xff]  }
 0x124   :  { %2916 = vmatpush1.bf16.msra.mxu0 %v4163_v63  ;;  %2671 = vmatprep.subr.bf16.mxu1 %v4168_v0  ;;  %v4259_v63 = vld [vmem:[%s5704_s1 + $0xb74] ss:$8 sps:$4 sm:$0xff]   ;;  %v4254_v0 = vld [vmem:[%s5704_s1 + $0x570] ss:$8 sps:$4 sm:$0xff]  }
 0x125   :  { %2917 = vmatprep.subr.bf16.mxu0 %v4171_v1  ;;  %v4257_v1 = vld [vmem:[%s5704_s1 + $0xb70] ss:$8 sps:$4 sm:$0xff]  }
 0x127   :  { %2672 = vmatpush1.bf16.msra.mxu1 %v4166_v2  ;;  %v4262_v2 = vld [vmem:[%s5704_s1 + $0x584] ss:$8 sps:$4 sm:$0xff]  }
 0x128   :  { %2918 = vmatpush1.bf16.msra.mxu0 %v4169_v3  ;;  %2673 = vmatprep.subr.bf16.mxu1 %v4174_v4  ;;  %v4265_v3 = vld [vmem:[%s5704_s1 + $0xb84] ss:$8 sps:$4 sm:$0xff]   ;;  %v4260_v4 = vld [vmem:[%s5704_s1 + $0x580] ss:$8 sps:$4 sm:$0xff]  }
 0x129   :  { %2919 = vmatprep.subr.bf16.mxu0 %v4177_v5  ;;  %v4263_v5 = vld [vmem:[%s5704_s1 + $0xb80] ss:$8 sps:$4 sm:$0xff]  }
 0x12b   :  { %2674 = vmatpush1.bf16.msra.mxu1 %v4172_v6  ;;  %v4268_v6 = vld [vmem:[%s5704_s1 + $0x594] ss:$8 sps:$4 sm:$0xff]  }
 0x12c   :  { %2920 = vmatpush1.bf16.msra.mxu0 %v4175_v7  ;;  %2675 = vmatprep.subr.bf16.mxu1 %v4180_v8  ;;  %v4271_v7 = vld [vmem:[%s5704_s1 + $0xb94] ss:$8 sps:$4 sm:$0xff]   ;;  %v4266_v8 = vld [vmem:[%s5704_s1 + $0x590] ss:$8 sps:$4 sm:$0xff]  }
 0x12d   :  { %2921 = vmatprep.subr.bf16.mxu0 %v4183_v9  ;;  %v4269_v9 = vld [vmem:[%s5704_s1 + $0xb90] ss:$8 sps:$4 sm:$0xff]  }
 0x12f   :  { %2676 = vmatpush1.bf16.msra.mxu1 %v4178_v10  ;;  %v4274_v10 = vld [vmem:[%s5704_s1 + $0x5a4] ss:$8 sps:$4 sm:$0xff]  }
 0x130   :  { %2922 = vmatpush1.bf16.msra.mxu0 %v4181_v11  ;;  %2677 = vmatprep.subr.bf16.mxu1 %v4186_v12  ;;  %v4277_v11 = vld [vmem:[%s5704_s1 + $0xba4] ss:$8 sps:$4 sm:$0xff]   ;;  %v4272_v12 = vld [vmem:[%s5704_s1 + $0x5a0] ss:$8 sps:$4 sm:$0xff]  }
 0x131   :  { %2923 = vmatprep.subr.bf16.mxu0 %v4189_v13  ;;  %v4275_v13 = vld [vmem:[%s5704_s1 + $0xba0] ss:$8 sps:$4 sm:$0xff]  }
 0x133   :  { %2678 = vmatpush1.bf16.msra.mxu1 %v4184_v14  ;;  %v4280_v14 = vld [vmem:[%s5704_s1 + $0x5b4] ss:$8 sps:$4 sm:$0xff]  }
 0x134   :  { %2924 = vmatpush1.bf16.msra.mxu0 %v4187_v15  ;;  %2679 = vmatprep.subr.bf16.mxu1 %v4192_v16  ;;  %v4283_v15 = vld [vmem:[%s5704_s1 + $0xbb4] ss:$8 sps:$4 sm:$0xff]   ;;  %v4278_v16 = vld [vmem:[%s5704_s1 + $0x5b0] ss:$8 sps:$4 sm:$0xff]  }
 0x135   :  { %2925 = vmatprep.subr.bf16.mxu0 %v4195_v17  ;;  %v4281_v17 = vld [vmem:[%s5704_s1 + $0xbb0] ss:$8 sps:$4 sm:$0xff]  }
 0x137   :  { %2680 = vmatpush1.bf16.msra.mxu1 %v4190_v19  ;;  %v4286_v19 = vld [vmem:[%s5704_s1 + $0x5c4] ss:$8 sps:$4 sm:$0xff]  }
 0x138   :  { %2926 = vmatpush1.bf16.msra.mxu0 %v4193_v21  ;;  %2681 = vmatprep.subr.bf16.mxu1 %v4198_v22  ;;  %v4289_v21 = vld [vmem:[%s5704_s1 + $0xbc4] ss:$8 sps:$4 sm:$0xff]   ;;  %v4284_v22 = vld [vmem:[%s5704_s1 + $0x5c0] ss:$8 sps:$4 sm:$0xff]  }
 0x139   :  { %2927 = vmatprep.subr.bf16.mxu0 %v4201_v23  ;;  %v4287_v23 = vld [vmem:[%s5704_s1 + $0xbc0] ss:$8 sps:$4 sm:$0xff]  }
 0x13b   :  { %2682 = vmatpush1.bf16.msra.mxu1 %v4196_v26  ;;  %v4292_v26 = vld [vmem:[%s5704_s1 + $0x5d4] ss:$8 sps:$4 sm:$0xff]  }
 0x13c   :  { %2928 = vmatpush1.bf16.msra.mxu0 %v4199_v18  ;;  %2683 = vmatprep.subr.bf16.mxu1 %v4204_v27  ;;  %v4295_v18 = vld [vmem:[%s5704_s1 + $0xbd4] ss:$8 sps:$4 sm:$0xff]   ;;  %v4290_v27 = vld [vmem:[%s5704_s1 + $0x5d0] ss:$8 sps:$4 sm:$0xff]  }
 0x13d   :  { %2929 = vmatprep.subr.bf16.mxu0 %v4207_v28  ;;  %v4293_v28 = vld [vmem:[%s5704_s1 + $0xbd0] ss:$8 sps:$4 sm:$0xff]  }
 0x13f   :  { %2684 = vmatpush1.bf16.msra.mxu1 %v4202_v30  ;;  %v4298_v30 = vld [vmem:[%s5704_s1 + $0x5e4] ss:$8 sps:$4 sm:$0xff]  }
 0x140   :  { %2930 = vmatpush1.bf16.msra.mxu0 %v4205_v31  ;;  %2694 = vmatprep.subr.bf16.mxu1 %v4212_v24  ;;  %v4301_v31 = vld [vmem:[%s5704_s1 + $0xbe4] ss:$8 sps:$4 sm:$0xff]   ;;  %v4296_v24 = vld [vmem:[%s5704_s1 + $0x5e0] ss:$8 sps:$4 sm:$0xff]  }
 0x141   :  { %2940 = vmatprep.subr.bf16.mxu0 %v4217_v25  ;;  %v4299_v25 = vld [vmem:[%s5704_s1 + $0xbe0] ss:$8 sps:$4 sm:$0xff]  }
 0x142   :  { %2686 = vmatmul.mubr.bf16.vlgmr.msra.gmra.mrb[0].mxu1 %v3214_v32  ;;  %v4304_v32 = vld [vmem:[%s5704_s1 + $0x5f4] ss:$8 sps:$4 sm:$0xff]  }
 0x143   :  { %2932 = vmatmul.mubr.bf16.vlgmr.msra.gmra.mrb[0].mxu0 %v3226_v33  ;;  %2695 = vmatpush1.bf16.msra.mxu1 %v4210_v36  ;;  %v4307_v33 = vld [vmem:[%s5704_s1 + $0xbf4] ss:$8 sps:$4 sm:$0xff]   ;;  %v4302_v36 = vld [vmem:[%s5704_s1 + $0x5f0] ss:$8 sps:$4 sm:$0xff]  }
 0x144   :  { %2941 = vmatpush1.bf16.msra.mxu0 %v4215_v20  ;;  %2696 = vmatprep.subr.bf16.mxu1 %v4220_v29  ;;  %v4305_v20 = vld [vmem:[%s5704_s1 + $0xbf0] ss:$8 sps:$4 sm:$0xff]   ;;  %v4314_v29 = vld [vmem:[%s5704_s1 + $0xc04] ss:$8 sps:$4 sm:$0xff]  }
 0x145   :  { %2942 = vmatprep.subr.bf16.mxu0 %v4223_v37  ;;  %2726 = vmatprep.mubr.bf16.mxu1 %v3217_v38  ;;  %v4325_v37 = vld [vmem:[%s5706_s3 + $0x40] sm:$0xff]   ;;  %v3216_v38 = vcombine.low %v5419_v34, %v5419_v34  ;;  %v4327_v34 = vld [vmem:[%s5706_s3 + $0x48] sm:$0xff]  }
 0x146   :  { %2972 = vmatprep.mubr.bf16.mxu0 %v3229_v39  ;;  %v3228_v39 = vcombine.low %v5424_v35, %v5424_v35  ;;  %v4315_v35 = vld [vmem:[%s5704_s1 + $0xc10] ss:$8 sps:$4 sm:$0xff]  }
 0x147   :  { %2697 = vmatpush1.bf16.msra.mxu1 %v4218_v40  ;;  %v4312_v40 = vld [vmem:[%s5704_s1 + $0xc00] ss:$8 sps:$4 sm:$0xff]  }
 0x148   :  { %2943 = vmatpush1.bf16.msra.mxu0 %v4221_v41  ;;  %2698 = vmatprep.subr.bf16.mxu1 %v4226_v42  ;;  %v4317_v41 = vld [vmem:[%s5704_s1 + $0xc14] ss:$8 sps:$4 sm:$0xff]   ;;  %v4326_v42 = vld [vmem:[%s5706_s3] sm:$0xff]  }
 0x149   :  { %2944 = vmatprep.subr.bf16.mxu0 %v4229_v43  ;;  %v4341_v43 = vmov 0  }
 0x14b   :  { %2699 = vmatpush1.bf16.msra.mxu1 %v4224_v44  ;;  %v4320_v44 = vld [vmem:[%s5704_s1 + $0xc24] ss:$8 sps:$4 sm:$0xff]  }
 0x14c   :  { %2945 = vmatpush1.bf16.msra.mxu0 %v4227_v45  ;;  %2700 = vmatprep.subr.bf16.mxu1 %v4232_v46  ;;  %v4328_v45 = vld [vmem:[%s5706_s3 + $0x8] sm:$0xff]  }
 0x14d   :  { %2946 = vmatprep.subr.bf16.mxu0 %v4235_v47  ;;  %v4318_v46 = vld [vmem:[%s5704_s1 + $0xc20] ss:$8 sps:$4 sm:$0xff]   ;;  %v4323_v47 = vld [vmem:[%s5704_s1 + $0xc34] ss:$8 sps:$4 sm:$0xff]  }
 0x14f   :  { %2701 = vmatpush1.bf16.msra.mxu1 %v4230_v48  ;;  %v4321_v48 = vld [vmem:[%s5704_s1 + $0xc30] ss:$8 sps:$4 sm:$0xff]  }
 0x150   :  { %2947 = vmatpush1.bf16.msra.mxu0 %v4233_v49  ;;  %2702 = vmatprep.subr.bf16.mxu1 %v4238_v50  ;;  %v4324_v49 = vld [vmem:[%s5705_s0 + $0x60] ss:$0 sps:$4 sm:$0xff]   ;;  %v4329_v50 = vld [vmem:[%s5706_s3 + $0x50] sm:$0xff]  }
 0x151   :  { %2948 = vmatprep.subr.bf16.mxu0 %v4241_v51  ;;  %v4330_v51 = vld [vmem:[%s5706_s3 + $0x10] sm:$0xff]  }
 0x153   :  { %2703 = vmatpush1.bf16.msra.mxu1 %v4236_v52  ;;  %v4331_v52 = vld [vmem:[%s5706_s3 + $0x58] sm:$0xff]  }
 0x154   :  { %2949 = vmatpush1.bf16.msra.mxu0 %v4239_v53  ;;  %2704 = vmatprep.subr.bf16.mxu1 %v4244_v54  ;;  %v4332_v53 = vld [vmem:[%s5706_s3 + $0x18] sm:$0xff]   ;;  %v4333_v54 = vld [vmem:[%s5706_s3 + $0x60] sm:$0xff]  }
 0x155   :  { %2950 = vmatprep.subr.bf16.mxu0 %v4247_v55  ;;  %v4334_v55 = vld [vmem:[%s5706_s3 + $0x20] sm:$0xff]  }
 0x157   :  { %2705 = vmatpush1.bf16.msra.mxu1 %v4242_v56  ;;  %v4335_v56 = vld [vmem:[%s5706_s3 + $0x68] sm:$0xff]  }
 0x158   :  { %2951 = vmatpush1.bf16.msra.mxu0 %v4245_v57  ;;  %2706 = vmatprep.subr.bf16.mxu1 %v4250_v58  ;;  %v4336_v57 = vld [vmem:[%s5706_s3 + $0x28] sm:$0xff]   ;;  %v4337_v58 = vld [vmem:[%s5706_s3 + $0x70] sm:$0xff]  }
 0x159   :  { %2952 = vmatprep.subr.bf16.mxu0 %v4253_v59  ;;  %v4338_v59 = vld [vmem:[%s5706_s3 + $0x30] sm:$0xff]  }
 0x15b   :  { %2707 = vmatpush1.bf16.msra.mxu1 %v4248_v60  ;;  %v4339_v60 = vld [vmem:[%s5706_s3 + $0x78] sm:$0xff]  }
 0x15c   :  { %2953 = vmatpush1.bf16.msra.mxu0 %v4251_v61  ;;  %2708 = vmatprep.subr.bf16.mxu1 %v4256_v62  ;;  %v4340_v61 = vld [vmem:[%s5706_s3 + $0x38] sm:$0xff]   ;;  %v428_v62 = vlaneseq }
 0x15d   :  { %2954 = vmatprep.subr.bf16.mxu0 %v4259_v63 }
 0x15f   :  { %2709 = vmatpush1.bf16.msra.mxu1 %v4254_v0 }
 0x160   :  { %2955 = vmatpush1.bf16.msra.mxu0 %v4257_v1  ;;  %2710 = vmatprep.subr.bf16.mxu1 %v4262_v2  ;;  %v429_v2 = vshrl.u32 %v428_v62, 7 }
 0x161   :  { %2956 = vmatprep.subr.bf16.mxu0 %v4265_v3 }
 0x163   :  { %2711 = vmatpush1.bf16.msra.mxu1 %v4260_v4  ;;  %v430_v4 = vsub.s32 0, %v429_v2 }
 0x164   :  { %2957 = vmatpush1.bf16.msra.mxu0 %v4263_v5  ;;  %2712 = vmatprep.subr.bf16.mxu1 %v4268_v6  ;;  %v426_v5 = vld [vmem:[%s5707_s2] sm:$0x3]  ;;  %v434_v6 = vsub.s32 1, %v429_v2 }
 0x165   :  { %2958 = vmatprep.subr.bf16.mxu0 %v4271_v7  ;;  %v431_v7 = vrot.slane %v426_v5, %v430_v4 }
 0x167   :  { %2713 = vmatpush1.bf16.msra.mxu1 %v4266_v8  ;;  %v435_v8 = vrot.slane %v426_v5, %v434_v6 }
 0x168   :  { %2959 = vmatpush1.bf16.msra.mxu0 %v4269_v9  ;;  %2714 = vmatprep.subr.bf16.mxu1 %v4274_v10 }
 0x169   :  { %2960 = vmatprep.subr.bf16.mxu0 %v4277_v11 }
 0x16b   :  { %2715 = vmatpush1.bf16.msra.mxu1 %v4272_v12 }
 0x16c   :  { %2961 = vmatpush1.bf16.msra.mxu0 %v4275_v13  ;;  %2716 = vmatprep.subr.bf16.mxu1 %v4280_v14 }
 0x16d   :  { %2962 = vmatprep.subr.bf16.mxu0 %v4283_v15 }
 0x16f   :  { %2717 = vmatpush1.bf16.msra.mxu1 %v4278_v16 }
 0x170   :  { %2963 = vmatpush1.bf16.msra.mxu0 %v4281_v17  ;;  %2718 = vmatprep.subr.bf16.mxu1 %v4286_v19 }
 0x171   :  { %2964 = vmatprep.subr.bf16.mxu0 %v4289_v21 }
 0x173   :  { %2719 = vmatpush1.bf16.msra.mxu1 %v4284_v22 }
 0x174   :  { %2965 = vmatpush1.bf16.msra.mxu0 %v4287_v23  ;;  %2720 = vmatprep.subr.bf16.mxu1 %v4292_v26  ;;  %v3624_v26 = vld [vmem:[%s5708_s4] ss:$0 sm:$0xff] }
 0x175   :  { %2966 = vmatprep.subr.bf16.mxu0 %v4295_v18 }
 0x177   :  { %2721 = vmatpush1.bf16.msra.mxu1 %v4290_v27 }
 0x178   :  { %2967 = vmatpush1.bf16.msra.mxu0 %v4293_v28  ;;  %2722 = vmatprep.subr.bf16.mxu1 %v4298_v30 }
 0x179   :  { %2968 = vmatprep.subr.bf16.mxu0 %v4301_v31 }
 0x17b   :  { %2723 = vmatpush1.bf16.msra.mxu1 %v4296_v24 }
 0x17c   :  { %2969 = vmatpush1.bf16.msra.mxu0 %v4299_v25  ;;  %2724 = vmatprep.subr.bf16.mxu1 %v4304_v32 }
 0x17d   :  { %2970 = vmatprep.subr.bf16.mxu0 %v4307_v33 }
 0x17f   :  { %2725 = vmatpush1.bf16.msra.mxu1 %v4302_v36 }
 0x180   :  { %2971 = vmatpush1.bf16.msra.mxu0 %v4305_v20  ;;  %3641 = vmatprep.subr.bf16.mxu1 %v4325_v37 }
 0x181   :  { %2981 = vmatprep.subr.bf16.mxu0 %v4314_v29 }
 0x182   :  { %2727 = vmatmul.mubr.bf16.vlgmr.msra.gmra.mrb[0].mxu1 %v3216_v38 }
 0x183   :  { %2973 = vmatmul.mubr.bf16.vlgmr.msra.gmra.mrb[0].mxu0 %v3228_v39  ;;  %3642 = vmatpush3.bf16.msra.mxu1 %v4326_v42 }
 0x184   :  { %2982 = vmatpush1.bf16.msra.mxu0 %v4312_v40  ;;  %3013 = vmatprep.mubr.bf16.mxu0 %v4341_v43 }
 0x185   :  { %2983 = vmatprep.subr.bf16.mxu0 %v4317_v41  ;;  %3643 = vmatprep.subr.bf16.mxu1 %v4327_v34 }
 0x187   :  { %3644 = vmatpush3.bf16.msra.mxu1 %v4328_v45 }
 0x188   :  { %2984 = vmatpush1.bf16.msra.mxu0 %v4315_v35  ;;  %3645 = vmatprep.subr.bf16.mxu1 %v4329_v50 }
 0x189   :  { %2985 = vmatprep.subr.bf16.mxu0 %v4320_v44 }
 0x18b   :  { %3646 = vmatpush3.bf16.msra.mxu1 %v4330_v51 }
 0x18c   :  { %2986 = vmatpush1.bf16.msra.mxu0 %v4318_v46  ;;  %3647 = vmatprep.subr.bf16.mxu1 %v4331_v52 }
 0x18d   :  { %2987 = vmatprep.subr.bf16.mxu0 %v4323_v47 }
 0x18f   :  { %3648 = vmatpush3.bf16.msra.mxu1 %v4332_v53 }
 0x190   :  { %2988 = vmatpush1.bf16.msra.mxu0 %v4321_v48  ;;  %3649 = vmatprep.subr.bf16.mxu1 %v4333_v54 }
 0x193   :  { %3623 = vmatmul.mubr.msk.bf16.vlgmr.msra.gmra.mrb[0].mxu0 %vm2485_vm0, %v4324_v49  ;;  %3650 = vmatpush3.bf16.msra.mxu1 %v4334_v55 }
 0x194   :  { %3651 = vmatprep.subr.bf16.mxu1 %v4335_v56 }
 0x197   :  { %3652 = vmatpush3.bf16.msra.mxu1 %v4336_v57 }
 0x198   :  { %3653 = vmatprep.subr.bf16.mxu1 %v4337_v58 }
 0x19b   :  { %3654 = vmatpush3.bf16.msra.mxu1 %v4338_v59 }
 0x19c   :  { %3655 = vmatprep.subr.bf16.mxu1 %v4339_v60 }
 0x19f   :  { %3656 = vmatpush3.bf16.msra.mxu1 %v4340_v61 }
 0x255   :  { %v2728_v63 = vpop.f32.mrb[0].mxu1 }
 0x256   :  { %v2730_v0 = vpop.f32.mrb[1].mxu1  ;;  %v3663_v9 = vadd.f32 %v2728_v63, %v431_v7 }
 0x257   :  { %v2732_v1 = vpop.f32.mrb[2].mxu1  ;;  %v3665_v10 = vadd.f32 %v2730_v0, %v435_v8 }
 0x258   :  { %v2733_v3 = vpop.f32.mrb[3].mxu1 }
 0x266   :  { %v3015_v11 = vpop.f32.mrb[0].mxu0 }
 0x267   :  { %v3664_v12 = vadd.f32 %v3663_v9, %v3015_v11  ;;  %v3017_v13 = vpop.f32.mrb[1].mxu0 }
 0x268   :  { %v3666_v14 = vadd.f32 %v3665_v10, %v3017_v13  ;;  %v3019_v15 = vpop.f32.mrb[2].mxu0 }
 0x269   :  { %v3022_v16 = vmax.f32 %v3664_v12, 0.0  ;;  %v3020_v17 = vpop.f32.mrb[3].mxu0 }
 0x26a   :  { %v3023_v19 = vmax.f32 %v3666_v14, 0.0 }
 0x26b   :  { %v3024_v22 = vpack.c.bf16 %v3022_v16, %v3022_v16 }
 0x26c   :  { %v3025_v21 = vpack.c.bf16 %v3023_v19, %v3023_v19 }
 0x26e   :  { %3193 = vmatprep.mubr.bf16.mxu1 %v3025_v21 }
 0x26f   :  { %3194 = vmatmul.mubr.bf16.vlgmr.msra.gmra.mrb[4].mxu1 %v3024_v22 }
 0x342   :  { %v3657_v23 = vpop.f32.mrb[4].mxu1 }
 0x343   :  { %v3658_v18 = vpop.f32.mrb[5].mxu1 }
 0x344   :  { %v3659_v27 = vadd.f32 %v3658_v18, %v3657_v23  ;;  %v3660_v28 = vpop.f32.mrb[6].mxu1 }
 0x345   :  { %v3661_v30 = vpop.f32.mrb[7].mxu1 }
 0x346   :  { %v3196_v31 = vadd.f32 %v3659_v27, %v3624_v26 }
 0x348   :  { %3201 = vst [vmem:[%s5709_s5] sm:$0xff] %v3196_v31 }

</bundles_post_ra>
